<compile_context>
chip_gen: v6e
topology: v6e:2x2x1
jax: 0.10.0
libtpu: 0.0.40
codegen_flags: <defaults>
</compile_context>

<pallas_src>
import math

import jax
import jax.numpy as jnp
from jax.experimental import pallas as pl
from jax.experimental.pallas import tpu as pltpu  # noqa: F401  (not needed: no grid / manual DMA)

# ----------------------- configuration (small, consistent with the module) -----
B = 2              # batch
S = 8              # user feature size == sequence length
E = 32             # embed_dim
H = 4              # nhead
HD = E // H        # per-head dim
L = 2              # num_layers
FF = 2048          # dim_feedforward (PyTorch TransformerEncoderLayer default)
O = 16             # output_dim (number of predicted classes / items)
NUM_FEATURE = 8    # feat_embed table has NUM_FEATURE + 1 rows
EPS = 1e-5         # LayerNorm eps (PyTorch default)
NEG = -1e30        # finite stand-in for -inf (underflows to exactly 0 in softmax)


def _layer_norm(x, w, b):
    mu = jnp.mean(x, axis=-1, keepdims=True)
    var = jnp.mean((x - mu) ** 2, axis=-1, keepdims=True)
    return (x - mu) * jax.lax.rsqrt(var + EPS) * w + b


def _dot_nt(a, b):
    # a @ b.T without materializing the transpose (contract last dims).
    return jax.lax.dot_general(a, b, (((1,), (1,)), ((), ())),
                               preferred_element_type=jnp.float32)


# --------------------- single fused kernel: encoder + pooling + logits ---------
def transrec_kernel(x_ref, mask_ref, itemnt_ref,
                    wqkv_ref, bqkv_ref, wo_ref, bo_ref,
                    ln1w_ref, ln1b_ref, ln2w_ref, ln2b_ref,
                    w1_ref, b1_ref, w2_ref, b2_ref,
                    poolw_ref, poolb_ref, normw_ref, normb_ref,
                    out_ref):
    x = x_ref[...]                       # (B*S, E) -- whole batch, flattened
    mask = mask_ref[...]                 # (B*H*S, B*H*S) additive block-diag + key-pad mask

    for l in range(L):                   # num_layers static -> unrolled
        # fused QKV projection: one (B*S, E) @ (E, 3E) push per layer
        # (1/sqrt(HD) score scale is already folded into the q columns / q bias)
        qkv = jnp.dot(x, wqkv_ref[l], preferred_element_type=jnp.float32) + bqkv_ref[l]
        q = qkv[:, 0 * E:1 * E]
        k = qkv[:, 1 * E:2 * E]
        v = qkv[:, 2 * E:3 * E]

        # block-diagonal attention: restack heads onto rows -> (B*H*S, HD) = (64, 8),
        # row order (h, b, s); the mask kills cross-head / cross-batch / padded keys.
        q_r = jnp.concatenate([q[:, h * HD:(h + 1) * HD] for h in range(H)], axis=0)
        k_r = jnp.concatenate([k[:, h * HD:(h + 1) * HD] for h in range(H)], axis=0)
        v_r = jnp.concatenate([v[:, h * HD:(h + 1) * HD] for h in range(H)], axis=0)

        s = _dot_nt(q_r, k_r) + mask                              # (64, 64) one MXU push
        s = s - jnp.max(s, axis=-1, keepdims=True)
        p = jnp.exp(s)
        p = p * pl.reciprocal(jnp.sum(p, axis=-1, keepdims=True), approx=True)
        ctx = jnp.dot(p, v_r, preferred_element_type=jnp.float32)  # (64, HD)

        # restack head rows back onto lanes -> (B*S, E), then one output projection
        attn = jnp.concatenate(
            [ctx[h * (B * S):(h + 1) * (B * S), :] for h in range(H)], axis=1)
        attn = jnp.dot(attn, wo_ref[l], preferred_element_type=jnp.float32) + bo_ref[l]

        # post-norm transformer layer (PyTorch default norm_first=False, relu)
        x = _layer_norm(x + attn, ln1w_ref[l], ln1b_ref[l])
        # FFN: bf16 operands straight to the MXU, f32 accumulation
        ff = jnp.dot(x.astype(jnp.bfloat16), w1_ref[l],
                     preferred_element_type=jnp.float32) + b1_ref[l]
        ff = jnp.maximum(ff, 0.0)
        ff = jnp.dot(ff.astype(jnp.bfloat16), w2_ref[l],
                     preferred_element_type=jnp.float32) + b2_ref[l]
        x = _layer_norm(x + ff, ln2w_ref[l], ln2b_ref[l])

    # SelfAttentionPooling (no padding mask, exactly like the reference module),
    # vectorized over the batch with a block-diagonal selector matmul.
    score = jnp.dot(x, poolw_ref[...], preferred_element_type=jnp.float32) + poolb_ref[...]  # (B*S, 1)
    score = score - jnp.max(score, axis=0, keepdims=True)   # shared shift, softmax-invariant per group
    p = jnp.exp(score)                                       # (B*S, 1)

    row = jax.lax.broadcasted_iota(jnp.int32, (B, B * S), 0)
    col = jax.lax.broadcasted_iota(jnp.int32, (B, B * S), 1)
    sel = ((col >= row * S) & (col < (row + 1) * S)).astype(jnp.float32)   # (B, B*S)

    denom = jnp.dot(sel, p, preferred_element_type=jnp.float32)            # (B, 1)
    pooled = jnp.dot(sel, p * x, preferred_element_type=jnp.float32)       # (B, E)
    pooled = pooled * pl.reciprocal(denom, approx=True)

    # final LayerNorm on the pooled vector + logits against the precomputed
    # (feature-independent, already normalized & transposed) item embeddings.
    pool_norm = _layer_norm(pooled, normw_ref[...], normb_ref[...])        # (B, E)
    out_ref[...] = jnp.dot(pool_norm, itemnt_ref[...],
                           preferred_element_type=jnp.float32)             # (B, O)


# ----------------------------- parameters --------------------------------------
def init_params(key):
    ks = jax.random.split(key, 12)
    n = lambda k, shape, s: s * jax.random.normal(k, shape, jnp.float32)
    scale = 1.0 / math.sqrt(HD)

    p = {}
    p["feat_embed"] = n(ks[0], (NUM_FEATURE + 1, E), 0.1)   # nn.init.normal_(std=0.1)
    p["item_embed"] = n(ks[1], (O, E), 0.1)                 # nn.init.normal_(std=0.1)

    in_proj_w = n(ks[2], (L, 3 * E, E), 0.1)                # MultiheadAttention in_proj
    in_proj_b = n(ks[3], (L, 3 * E), 0.02)
    # 1/sqrt(HD) attention scale folded into the q projection (weights AND bias);
    # the function computed is identical to scaling the scores afterwards.
    wq_t = jnp.transpose(in_proj_w[:, 0 * E:1 * E, :], (0, 2, 1)) * scale
    wk_t = jnp.transpose(in_proj_w[:, 1 * E:2 * E, :], (0, 2, 1))
    wv_t = jnp.transpose(in_proj_w[:, 2 * E:3 * E, :], (0, 2, 1))
    p["wqkv_t"] = jnp.concatenate([wq_t, wk_t, wv_t], axis=-1)   # (L, E, 3E)
    bq = in_proj_b[:, 0 * E:1 * E] * scale
    p["bqkv"] = jnp.concatenate([bq, in_proj_b[:, E:]], axis=-1)  # (L, 3E), q part pre-scaled

    p["wo_t"] = jnp.transpose(n(ks[4], (L, E, E), 0.1), (0, 2, 1))
    p["bo"] = n(ks[5], (L, E), 0.02)

    p["ln1_w"] = jnp.ones((L, E), jnp.float32)
    p["ln1_b"] = jnp.zeros((L, E), jnp.float32)
    p["ln2_w"] = jnp.ones((L, E), jnp.float32)
    p["ln2_b"] = jnp.zeros((L, E), jnp.float32)

    # FFN weights shipped & consumed as bf16 (native MXU path); accumulation stays f32.
    p["w1_t"] = jnp.transpose(n(ks[6], (L, FF, E), 0.05), (0, 2, 1)).astype(jnp.bfloat16)  # (L, E, FF)
    p["b1"] = n(ks[7], (L, FF), 0.02)
    p["w2_t"] = jnp.transpose(n(ks[8], (L, E, FF), 0.05), (0, 2, 1)).astype(jnp.bfloat16)  # (L, FF, E)
    p["b2"] = n(ks[9], (L, E), 0.02)

    p["pool_w_t"] = jnp.transpose(n(ks[10], (1, E), 0.1), (1, 0))      # (E, 1)
    p["pool_b"] = n(ks[11], (1, 1), 0.02)

    p["norm_w"] = jnp.ones((1, E), jnp.float32)
    p["norm_b"] = jnp.zeros((1, E), jnp.float32)
    return p


_WEIGHT_ORDER = ["wqkv_t", "bqkv", "wo_t", "bo",
                 "ln1_w", "ln1_b", "ln2_w", "ln2_b",
                 "w1_t", "b1", "w2_t", "b2",
                 "pool_w_t", "pool_b", "norm_w", "norm_b"]


# ----------------------------- wrapper ------------------------------------------
def trans_rec_forward(feature, params):
    # glue: embedding-index construction, gather, flatten (plain JAX)
    embed_idx = jnp.where(feature != 0, jnp.arange(S, dtype=feature.dtype), 0)
    embed = params["feat_embed"][embed_idx].reshape(B * S, E)            # (B*S, E)

    # (B*H*S, B*H*S) additive attention mask for the block-diagonal formulation:
    # 0 where query/key share (batch, head) AND the key position is not padding, NEG elsewhere.
    # Row/col index order is (h, b, s) to match the in-kernel head restacking.
    idx = jnp.arange(H * B * S)
    h_i = idx // (B * S)
    b_i = (idx // S) % B
    s_i = idx % S
    same_blk = (b_i[:, None] == b_i[None, :]) & (h_i[:, None] == h_i[None, :])
    key_valid = feature[b_i, s_i] != 0
    mask64 = jnp.where(same_blk & key_valid[None, :], 0.0, NEG).astype(jnp.float32)

    # item-side LayerNorm depends only on params, not on `feature`: hoisted out of
    # the kernel's serial tail and passed in already transposed to (E, O).
    item_norm_t = _layer_norm(params["item_embed"],
                              params["norm_w"][0], params["norm_b"][0]).T   # (E, O)

    weights = [params[k] for k in _WEIGHT_ORDER]

    # Single program, no grid: every operand is a full-array VMEM block (~1 MiB total,
    # far below the scoped-VMEM limit on v5e/v6e/v7x), so there is no per-step pipeline
    # overhead, no second launch, and no duplicated weight DMA across cores.
    logits = pl.pallas_call(
        transrec_kernel,
        out_shape=jax.ShapeDtypeStruct((B, O), jnp.float32),
    )(embed, mask64, item_norm_t, *weights)
    return logits


# ----------------------------- pure-JAX reference (for validation) --------------
def reference_forward(feature, params):
    hp = jax.lax.Precision.HIGHEST

    def ln(t, w, b):
        mu = jnp.mean(t, -1, keepdims=True)
        var = jnp.mean((t - mu) ** 2, -1, keepdims=True)
        return (t - mu) / jnp.sqrt(var + EPS) * w + b

    embed_idx = jnp.where(feature != 0, jnp.arange(S, dtype=feature.dtype), 0)
    x = params["feat_embed"][embed_idx]                                   # (B, S, E)
    neg = jnp.where(feature == 0, NEG, 0.0).astype(jnp.float32)[:, None, None, :]

    for l in range(L):
        wqkv = params["wqkv_t"][l]
        bqkv = params["bqkv"][l]
        q = jnp.einsum("bse,ef->bsf", x, wqkv[:, 0 * E:1 * E], precision=hp) + bqkv[0 * E:1 * E]
        k = jnp.einsum("bse,ef->bsf", x, wqkv[:, 1 * E:2 * E], precision=hp) + bqkv[1 * E:2 * E]
        v = jnp.einsum("bse,ef->bsf", x, wqkv[:, 2 * E:3 * E], precision=hp) + bqkv[2 * E:3 * E]
        split = lambda t: t.reshape(B, S, H, HD).transpose(0, 2, 1, 3)
        qh, kh, vh = split(q), split(k), split(v)
        # NOTE: 1/sqrt(HD) is already folded into the stored q weights/bias.
        sc = jnp.einsum("bhqd,bhkd->bhqk", qh, kh, precision=hp) + neg
        pr = jax.nn.softmax(sc, axis=-1)
        o = jnp.einsum("bhqk,bhkd->bhqd", pr, vh, precision=hp).transpose(0, 2, 1, 3).reshape(B, S, E)
        o = jnp.einsum("bse,ef->bsf", o, params["wo_t"][l], precision=hp) + params["bo"][l]
        x = ln(x + o, params["ln1_w"][l], params["ln1_b"][l])
        # FFN with the same bf16-operand / f32-accumulate numerics as the kernel
        # (the stored FFN weights are bf16 either way).
        f = jnp.einsum("bse,ef->bsf", x.astype(jnp.bfloat16), params["w1_t"][l],
                       preferred_element_type=jnp.float32) + params["b1"][l]
        f = jax.nn.relu(f)
        f = jnp.einsum("bsf,fe->bse", f.astype(jnp.bfloat16), params["w2_t"][l],
                       preferred_element_type=jnp.float32) + params["b2"][l]
        x = ln(x + f, params["ln2_w"][l], params["ln2_b"][l])

    score = jnp.einsum("bse,eo->bso", x, params["pool_w_t"], precision=hp) + params["pool_b"][0]
    w = jax.nn.softmax(score[..., 0], axis=-1)[..., None]
    pooled = jnp.sum(x * w, axis=1)
    pool_norm = ln(pooled, params["norm_w"][0], params["norm_b"][0])
    item_norm = ln(params["item_embed"], params["norm_w"][0], params["norm_b"][0])
    return jnp.einsum("be,oe->bo", pool_norm, item_norm, precision=hp)


if __name__ == "__main__":
    key = jax.random.PRNGKey(0)
    pkey, fkey = jax.random.split(key)
    params = init_params(pkey)

    # feature values in {0,1,2,3}; 0 means padding; guarantee >=1 valid token per row
    # (an all-padded row would give a uniform/garbage softmax row, same as the reference).
    feature = jax.random.randint(fkey, (B, S), 0, 4, dtype=jnp.int32)
    feature = feature.at[:, 0].set(1)

    logits = jax.block_until_ready(trans_rec_forward(feature, params))
    assert logits.shape == (B, O) and logits.dtype == jnp.float32

    ref = jax.block_until_ready(reference_forward(feature, params))
    err = float(jnp.max(jnp.abs(logits - ref)))
    if not (err < 5e-2):
        raise AssertionError(f"kernel/reference mismatch: max abs err = {err}")

    print("KERNEL_OK")
</pallas_src>

<mosaic_0001>
module attributes {stable_mosaic.version = 11 : i64} {
  func.func @transrec_kernel(%arg0: memref<16x32xf32, #tpu.memory_space<vmem>>, %arg1: memref<64x64xf32, #tpu.memory_space<vmem>>, %arg2: memref<32x16xf32, #tpu.memory_space<vmem>>, %arg3: memref<2x32x96xf32, #tpu.memory_space<vmem>>, %arg4: memref<2x96xf32, #tpu.memory_space<vmem>>, %arg5: memref<2x32x32xf32, #tpu.memory_space<vmem>>, %arg6: memref<2x32xf32, #tpu.memory_space<vmem>>, %arg7: memref<2x32xf32, #tpu.memory_space<vmem>>, %arg8: memref<2x32xf32, #tpu.memory_space<vmem>>, %arg9: memref<2x32xf32, #tpu.memory_space<vmem>>, %arg10: memref<2x32xf32, #tpu.memory_space<vmem>>, %arg11: memref<2x32x2048xbf16, #tpu.memory_space<vmem>>, %arg12: memref<2x2048xf32, #tpu.memory_space<vmem>>, %arg13: memref<2x2048x32xbf16, #tpu.memory_space<vmem>>, %arg14: memref<2x32xf32, #tpu.memory_space<vmem>>, %arg15: memref<32x1xf32, #tpu.memory_space<vmem>>, %arg16: memref<1x1xf32, #tpu.memory_space<vmem>>, %arg17: memref<1x32xf32, #tpu.memory_space<vmem>>, %arg18: memref<1x32xf32, #tpu.memory_space<vmem>>, %arg19: memref<2x16xf32, #tpu.memory_space<vmem>>) attributes {dimension_semantics = [], scalar_prefetch = 0 : i64, scratch_operands = 0 : i64, tpu.core_type = #tpu.core_type<tc>} {
    %c0 = arith.constant 0 : index
    %c0_0 = arith.constant 0 : index
    %0 = vector.load %arg0[%c0, %c0_0] : memref<16x32xf32, #tpu.memory_space<vmem>>, vector<16x32xf32>
    %c0_1 = arith.constant 0 : index
    %c0_2 = arith.constant 0 : index
    %1 = vector.load %arg1[%c0_1, %c0_2] : memref<64x64xf32, #tpu.memory_space<vmem>>, vector<64x64xf32>
    %c0_3 = arith.constant 0 : index
    %c0_4 = arith.constant 0 : index
    %c0_5 = arith.constant 0 : index
    %2 = vector.load %arg3[%c0_3, %c0_4, %c0_5] : memref<2x32x96xf32, #tpu.memory_space<vmem>>, vector<1x32x96xf32>
    %3 = vector.shape_cast %2 : vector<1x32x96xf32> to vector<32x96xf32>
    %cst = arith.constant dense<0.000000e+00> : vector<16x96xf32>
    %4 = tpu.matmul %0, %3, %cst {dimension_numbers = #tpu.dot_dimension_numbers<[1], [0], [0], [1], [0, 0, 1, 1], [], []>} : vector<16x32xf32>, vector<32x96xf32>, vector<16x96xf32> -> vector<16x96xf32>
    %c0_6 = arith.constant 0 : index
    %c0_7 = arith.constant 0 : index
    %5 = vector.load %arg4[%c0_6, %c0_7] : memref<2x96xf32, #tpu.memory_space<vmem>>, vector<1x96xf32>
    %6 = vector.shape_cast %5 : vector<1x96xf32> to vector<96xf32>
    %7 = vector.shape_cast %6 : vector<96xf32> to vector<1x96xf32>
    %8 = vector.broadcast %7 : vector<1x96xf32> to vector<16x96xf32>
    %9 = arith.addf %4, %8 : vector<16x96xf32>
    %10 = vector.extract_strided_slice %9 {offsets = [0, 0], sizes = [16, 32], strides = [1, 1]} : vector<16x96xf32> to vector<16x32xf32>
    %11 = vector.extract_strided_slice %9 {offsets = [0, 32], sizes = [16, 32], strides = [1, 1]} : vector<16x96xf32> to vector<16x32xf32>
    %12 = vector.extract_strided_slice %9 {offsets = [0, 64], sizes = [16, 32], strides = [1, 1]} : vector<16x96xf32> to vector<16x32xf32>
    %13 = vector.extract_strided_slice %10 {offsets = [0, 0], sizes = [16, 8], strides = [1, 1]} : vector<16x32xf32> to vector<16x8xf32>
    %14 = vector.extract_strided_slice %10 {offsets = [0, 8], sizes = [16, 8], strides = [1, 1]} : vector<16x32xf32> to vector<16x8xf32>
    %15 = vector.extract_strided_slice %10 {offsets = [0, 16], sizes = [16, 8], strides = [1, 1]} : vector<16x32xf32> to vector<16x8xf32>
    %16 = vector.extract_strided_slice %10 {offsets = [0, 24], sizes = [16, 8], strides = [1, 1]} : vector<16x32xf32> to vector<16x8xf32>
    %17 = tpu.concatenate %13, %14, %15, %16 in 0 : vector<16x8xf32>, vector<16x8xf32>, vector<16x8xf32>, vector<16x8xf32> -> vector<64x8xf32>
    %18 = vector.extract_strided_slice %11 {offsets = [0, 0], sizes = [16, 8], strides = [1, 1]} : vector<16x32xf32> to vector<16x8xf32>
    %19 = vector.extract_strided_slice %11 {offsets = [0, 8], sizes = [16, 8], strides = [1, 1]} : vector<16x32xf32> to vector<16x8xf32>
    %20 = vector.extract_strided_slice %11 {offsets = [0, 16], sizes = [16, 8], strides = [1, 1]} : vector<16x32xf32> to vector<16x8xf32>
    %21 = vector.extract_strided_slice %11 {offsets = [0, 24], sizes = [16, 8], strides = [1, 1]} : vector<16x32xf32> to vector<16x8xf32>
    %22 = tpu.concatenate %18, %19, %20, %21 in 0 : vector<16x8xf32>, vector<16x8xf32>, vector<16x8xf32>, vector<16x8xf32> -> vector<64x8xf32>
    %23 = vector.extract_strided_slice %12 {offsets = [0, 0], sizes = [16, 8], strides = [1, 1]} : vector<16x32xf32> to vector<16x8xf32>
    %24 = vector.extract_strided_slice %12 {offsets = [0, 8], sizes = [16, 8], strides = [1, 1]} : vector<16x32xf32> to vector<16x8xf32>
    %25 = vector.extract_strided_slice %12 {offsets = [0, 16], sizes = [16, 8], strides = [1, 1]} : vector<16x32xf32> to vector<16x8xf32>
    %26 = vector.extract_strided_slice %12 {offsets = [0, 24], sizes = [16, 8], strides = [1, 1]} : vector<16x32xf32> to vector<16x8xf32>
    %27 = tpu.concatenate %23, %24, %25, %26 in 0 : vector<16x8xf32>, vector<16x8xf32>, vector<16x8xf32>, vector<16x8xf32> -> vector<64x8xf32>
    %cst_8 = arith.constant dense<0.000000e+00> : vector<64x64xf32>
    %28 = tpu.matmul %17, %22, %cst_8 {dimension_numbers = #tpu.dot_dimension_numbers<[1], [1], [0], [0], [0, 0, 1, 0], [], []>} : vector<64x8xf32>, vector<64x8xf32>, vector<64x64xf32> -> vector<64x64xf32>
    %29 = arith.addf %28, %1 : vector<64x64xf32>
    %cst_9 = arith.constant dense<0xFF800000> : vector<64xf32>
    %30 = vector.multi_reduction <maximumf>, %29, %cst_9 [1] : vector<64x64xf32> to vector<64xf32>
    %31 = vector.shape_cast %30 : vector<64xf32> to vector<64x1xf32>
    %32 = vector.broadcast %31 : vector<64x1xf32> to vector<64x64xf32>
    %33 = arith.subf %29, %32 : vector<64x64xf32>
    %34 = math.exp %33 : vector<64x64xf32>
    %cst_10 = arith.constant dense<0.000000e+00> : vector<64xf32>
    %35 = vector.multi_reduction <add>, %34, %cst_10 [1] : vector<64x64xf32> to vector<64xf32>
    %36 = vector.shape_cast %35 : vector<64xf32> to vector<64x1xf32>
    %37 = tpu.reciprocal %36 {approx = true} : vector<64x1xf32> -> vector<64x1xf32>
    %38 = vector.broadcast %37 : vector<64x1xf32> to vector<64x64xf32>
    %39 = arith.mulf %34, %38 : vector<64x64xf32>
    %cst_11 = arith.constant dense<0.000000e+00> : vector<64x8xf32>
    %40 = tpu.matmul %39, %27, %cst_11 {dimension_numbers = #tpu.dot_dimension_numbers<[1], [0], [0], [1], [0, 0, 1, 1], [], []>} : vector<64x64xf32>, vector<64x8xf32>, vector<64x8xf32> -> vector<64x8xf32>
    %41 = vector.extract_strided_slice %40 {offsets = [0, 0], sizes = [16, 8], strides = [1, 1]} : vector<64x8xf32> to vector<16x8xf32>
    %42 = vector.extract_strided_slice %40 {offsets = [16, 0], sizes = [16, 8], strides = [1, 1]} : vector<64x8xf32> to vector<16x8xf32>
    %43 = vector.extract_strided_slice %40 {offsets = [32, 0], sizes = [16, 8], strides = [1, 1]} : vector<64x8xf32> to vector<16x8xf32>
    %44 = vector.extract_strided_slice %40 {offsets = [48, 0], sizes = [16, 8], strides = [1, 1]} : vector<64x8xf32> to vector<16x8xf32>
    %45 = tpu.concatenate %41, %42, %43, %44 in 1 : vector<16x8xf32>, vector<16x8xf32>, vector<16x8xf32>, vector<16x8xf32> -> vector<16x32xf32>
    %c0_12 = arith.constant 0 : index
    %c0_13 = arith.constant 0 : index
    %c0_14 = arith.constant 0 : index
    %46 = vector.load %arg5[%c0_12, %c0_13, %c0_14] : memref<2x32x32xf32, #tpu.memory_space<vmem>>, vector<1x32x32xf32>
    %47 = vector.shape_cast %46 : vector<1x32x32xf32> to vector<32x32xf32>
    %cst_15 = arith.constant dense<0.000000e+00> : vector<16x32xf32>
    %48 = tpu.matmul %45, %47, %cst_15 {dimension_numbers = #tpu.dot_dimension_numbers<[1], [0], [0], [1], [0, 0, 1, 1], [], []>} : vector<16x32xf32>, vector<32x32xf32>, vector<16x32xf32> -> vector<16x32xf32>
    %c0_16 = arith.constant 0 : index
    %c0_17 = arith.constant 0 : index
    %49 = vector.load %arg6[%c0_16, %c0_17] : memref<2x32xf32, #tpu.memory_space<vmem>>, vector<1x32xf32>
    %50 = vector.shape_cast %49 : vector<1x32xf32> to vector<32xf32>
    %51 = vector.shape_cast %50 : vector<32xf32> to vector<1x32xf32>
    %52 = vector.broadcast %51 : vector<1x32xf32> to vector<16x32xf32>
    %53 = arith.addf %48, %52 : vector<16x32xf32>
    %54 = arith.addf %0, %53 : vector<16x32xf32>
    %c0_18 = arith.constant 0 : index
    %c0_19 = arith.constant 0 : index
    %55 = vector.load %arg7[%c0_18, %c0_19] : memref<2x32xf32, #tpu.memory_space<vmem>>, vector<1x32xf32>
    %56 = vector.shape_cast %55 : vector<1x32xf32> to vector<32xf32>
    %c0_20 = arith.constant 0 : index
    %c0_21 = arith.constant 0 : index
    %57 = vector.load %arg8[%c0_20, %c0_21] : memref<2x32xf32, #tpu.memory_space<vmem>>, vector<1x32xf32>
    %58 = vector.shape_cast %57 : vector<1x32xf32> to vector<32xf32>
    %cst_22 = arith.constant dense<0.000000e+00> : vector<16xf32>
    %59 = vector.multi_reduction <add>, %54, %cst_22 [1] : vector<16x32xf32> to vector<16xf32>
    %60 = vector.shape_cast %59 : vector<16xf32> to vector<16x1xf32>
    %cst_23 = arith.constant 3.200000e+01 : f32
    %61 = vector.broadcast %cst_23 : f32 to vector<16x1xf32>
    %62 = arith.divf %60, %61 : vector<16x1xf32>
    %63 = vector.broadcast %62 : vector<16x1xf32> to vector<16x32xf32>
    %64 = arith.subf %54, %63 : vector<16x32xf32>
    %65 = arith.mulf %64, %64 : vector<16x32xf32>
    %cst_24 = arith.constant dense<0.000000e+00> : vector<16xf32>
    %66 = vector.multi_reduction <add>, %65, %cst_24 [1] : vector<16x32xf32> to vector<16xf32>
    %67 = vector.shape_cast %66 : vector<16xf32> to vector<16x1xf32>
    %cst_25 = arith.constant 3.200000e+01 : f32
    %68 = vector.broadcast %cst_25 : f32 to vector<16x1xf32>
    %69 = arith.divf %67, %68 : vector<16x1xf32>
    %70 = vector.broadcast %62 : vector<16x1xf32> to vector<16x32xf32>
    %71 = arith.subf %54, %70 : vector<16x32xf32>
    %cst_26 = arith.constant 9.99999974E-6 : f32
    %72 = vector.broadcast %cst_26 : f32 to vector<16x1xf32>
    %73 = arith.addf %69, %72 : vector<16x1xf32>
    %74 = math.rsqrt %73 : vector<16x1xf32>
    %75 = vector.broadcast %74 : vector<16x1xf32> to vector<16x32xf32>
    %76 = arith.mulf %71, %75 : vector<16x32xf32>
    %77 = vector.shape_cast %56 : vector<32xf32> to vector<1x32xf32>
    %78 = vector.broadcast %77 : vector<1x32xf32> to vector<16x32xf32>
    %79 = arith.mulf %76, %78 : vector<16x32xf32>
    %80 = vector.shape_cast %58 : vector<32xf32> to vector<1x32xf32>
    %81 = vector.broadcast %80 : vector<1x32xf32> to vector<16x32xf32>
    %82 = arith.addf %79, %81 : vector<16x32xf32>
    %83 = arith.truncf %82 : vector<16x32xf32> to vector<16x32xbf16>
    %c0_27 = arith.constant 0 : index
    %c0_28 = arith.constant 0 : index
    %c0_29 = arith.constant 0 : index
    %84 = vector.load %arg11[%c0_27, %c0_28, %c0_29] : memref<2x32x2048xbf16, #tpu.memory_space<vmem>>, vector<1x32x2048xbf16>
    %85 = vector.shape_cast %84 : vector<1x32x2048xbf16> to vector<32x2048xbf16>
    %cst_30 = arith.constant dense<0.000000e+00> : vector<16x2048xf32>
    %86 = tpu.matmul %83, %85, %cst_30 {dimension_numbers = #tpu.dot_dimension_numbers<[1], [0], [0], [1], [0, 0, 1, 1], [], []>} : vector<16x32xbf16>, vector<32x2048xbf16>, vector<16x2048xf32> -> vector<16x2048xf32>
    %c0_31 = arith.constant 0 : index
    %c0_32 = arith.constant 0 : index
    %87 = vector.load %arg12[%c0_31, %c0_32] : memref<2x2048xf32, #tpu.memory_space<vmem>>, vector<1x2048xf32>
    %88 = vector.shape_cast %87 : vector<1x2048xf32> to vector<2048xf32>
    %89 = vector.shape_cast %88 : vector<2048xf32> to vector<1x2048xf32>
    %90 = vector.broadcast %89 : vector<1x2048xf32> to vector<16x2048xf32>
    %91 = arith.addf %86, %90 : vector<16x2048xf32>
    %cst_33 = arith.constant 0.000000e+00 : f32
    %92 = vector.broadcast %cst_33 : f32 to vector<16x2048xf32>
    %93 = arith.maximumf %91, %92 : vector<16x2048xf32>
    %94 = arith.truncf %93 : vector<16x2048xf32> to vector<16x2048xbf16>
    %c0_34 = arith.constant 0 : index
    %c0_35 = arith.constant 0 : index
    %c0_36 = arith.constant 0 : index
    %95 = vector.load %arg13[%c0_34, %c0_35, %c0_36] : memref<2x2048x32xbf16, #tpu.memory_space<vmem>>, vector<1x2048x32xbf16>
    %96 = vector.shape_cast %95 : vector<1x2048x32xbf16> to vector<2048x32xbf16>
    %cst_37 = arith.constant dense<0.000000e+00> : vector<16x32xf32>
    %97 = tpu.matmul %94, %96, %cst_37 {dimension_numbers = #tpu.dot_dimension_numbers<[1], [0], [0], [1], [0, 0, 1, 1], [], []>} : vector<16x2048xbf16>, vector<2048x32xbf16>, vector<16x32xf32> -> vector<16x32xf32>
    %c0_38 = arith.constant 0 : index
    %c0_39 = arith.constant 0 : index
    %98 = vector.load %arg14[%c0_38, %c0_39] : memref<2x32xf32, #tpu.memory_space<vmem>>, vector<1x32xf32>
    %99 = vector.shape_cast %98 : vector<1x32xf32> to vector<32xf32>
    %100 = vector.shape_cast %99 : vector<32xf32> to vector<1x32xf32>
    %101 = vector.broadcast %100 : vector<1x32xf32> to vector<16x32xf32>
    %102 = arith.addf %97, %101 : vector<16x32xf32>
    %103 = arith.addf %82, %102 : vector<16x32xf32>
    %c0_40 = arith.constant 0 : index
    %c0_41 = arith.constant 0 : index
    %104 = vector.load %arg9[%c0_40, %c0_41] : memref<2x32xf32, #tpu.memory_space<vmem>>, vector<1x32xf32>
    %105 = vector.shape_cast %104 : vector<1x32xf32> to vector<32xf32>
    %c0_42 = arith.constant 0 : index
    %c0_43 = arith.constant 0 : index
    %106 = vector.load %arg10[%c0_42, %c0_43] : memref<2x32xf32, #tpu.memory_space<vmem>>, vector<1x32xf32>
    %107 = vector.shape_cast %106 : vector<1x32xf32> to vector<32xf32>
    %cst_44 = arith.constant dense<0.000000e+00> : vector<16xf32>
    %108 = vector.multi_reduction <add>, %103, %cst_44 [1] : vector<16x32xf32> to vector<16xf32>
    %109 = vector.shape_cast %108 : vector<16xf32> to vector<16x1xf32>
    %cst_45 = arith.constant 3.200000e+01 : f32
    %110 = vector.broadcast %cst_45 : f32 to vector<16x1xf32>
    %111 = arith.divf %109, %110 : vector<16x1xf32>
    %112 = vector.broadcast %111 : vector<16x1xf32> to vector<16x32xf32>
    %113 = arith.subf %103, %112 : vector<16x32xf32>
    %114 = arith.mulf %113, %113 : vector<16x32xf32>
    %cst_46 = arith.constant dense<0.000000e+00> : vector<16xf32>
    %115 = vector.multi_reduction <add>, %114, %cst_46 [1] : vector<16x32xf32> to vector<16xf32>
    %116 = vector.shape_cast %115 : vector<16xf32> to vector<16x1xf32>
    %cst_47 = arith.constant 3.200000e+01 : f32
    %117 = vector.broadcast %cst_47 : f32 to vector<16x1xf32>
    %118 = arith.divf %116, %117 : vector<16x1xf32>
    %119 = vector.broadcast %111 : vector<16x1xf32> to vector<16x32xf32>
    %120 = arith.subf %103, %119 : vector<16x32xf32>
    %cst_48 = arith.constant 9.99999974E-6 : f32
    %121 = vector.broadcast %cst_48 : f32 to vector<16x1xf32>
    %122 = arith.addf %118, %121 : vector<16x1xf32>
    %123 = math.rsqrt %122 : vector<16x1xf32>
    %124 = vector.broadcast %123 : vector<16x1xf32> to vector<16x32xf32>
    %125 = arith.mulf %120, %124 : vector<16x32xf32>
    %126 = vector.shape_cast %105 : vector<32xf32> to vector<1x32xf32>
    %127 = vector.broadcast %126 : vector<1x32xf32> to vector<16x32xf32>
    %128 = arith.mulf %125, %127 : vector<16x32xf32>
    %129 = vector.shape_cast %107 : vector<32xf32> to vector<1x32xf32>
    %130 = vector.broadcast %129 : vector<1x32xf32> to vector<16x32xf32>
    %131 = arith.addf %128, %130 : vector<16x32xf32>
    %c1 = arith.constant 1 : index
    %c0_49 = arith.constant 0 : index
    %c0_50 = arith.constant 0 : index
    %132 = vector.load %arg3[%c1, %c0_49, %c0_50] : memref<2x32x96xf32, #tpu.memory_space<vmem>>, vector<1x32x96xf32>
    %133 = vector.shape_cast %132 : vector<1x32x96xf32> to vector<32x96xf32>
    %cst_51 = arith.constant dense<0.000000e+00> : vector<16x96xf32>
    %134 = tpu.matmul %131, %133, %cst_51 {dimension_numbers = #tpu.dot_dimension_numbers<[1], [0], [0], [1], [0, 0, 1, 1], [], []>} : vector<16x32xf32>, vector<32x96xf32>, vector<16x96xf32> -> vector<16x96xf32>
    %c1_52 = arith.constant 1 : index
    %c0_53 = arith.constant 0 : index
    %135 = vector.load %arg4[%c1_52, %c0_53] : memref<2x96xf32, #tpu.memory_space<vmem>>, vector<1x96xf32>
    %136 = vector.shape_cast %135 : vector<1x96xf32> to vector<96xf32>
    %137 = vector.shape_cast %136 : vector<96xf32> to vector<1x96xf32>
    %138 = vector.broadcast %137 : vector<1x96xf32> to vector<16x96xf32>
    %139 = arith.addf %134, %138 : vector<16x96xf32>
    %140 = vector.extract_strided_slice %139 {offsets = [0, 0], sizes = [16, 32], strides = [1, 1]} : vector<16x96xf32> to vector<16x32xf32>
    %141 = vector.extract_strided_slice %139 {offsets = [0, 32], sizes = [16, 32], strides = [1, 1]} : vector<16x96xf32> to vector<16x32xf32>
    %142 = vector.extract_strided_slice %139 {offsets = [0, 64], sizes = [16, 32], strides = [1, 1]} : vector<16x96xf32> to vector<16x32xf32>
    %143 = vector.extract_strided_slice %140 {offsets = [0, 0], sizes = [16, 8], strides = [1, 1]} : vector<16x32xf32> to vector<16x8xf32>
    %144 = vector.extract_strided_slice %140 {offsets = [0, 8], sizes = [16, 8], strides = [1, 1]} : vector<16x32xf32> to vector<16x8xf32>
    %145 = vector.extract_strided_slice %140 {offsets = [0, 16], sizes = [16, 8], strides = [1, 1]} : vector<16x32xf32> to vector<16x8xf32>
    %146 = vector.extract_strided_slice %140 {offsets = [0, 24], sizes = [16, 8], strides = [1, 1]} : vector<16x32xf32> to vector<16x8xf32>
    %147 = tpu.concatenate %143, %144, %145, %146 in 0 : vector<16x8xf32>, vector<16x8xf32>, vector<16x8xf32>, vector<16x8xf32> -> vector<64x8xf32>
    %148 = vector.extract_strided_slice %141 {offsets = [0, 0], sizes = [16, 8], strides = [1, 1]} : vector<16x32xf32> to vector<16x8xf32>
    %149 = vector.extract_strided_slice %141 {offsets = [0, 8], sizes = [16, 8], strides = [1, 1]} : vector<16x32xf32> to vector<16x8xf32>
    %150 = vector.extract_strided_slice %141 {offsets = [0, 16], sizes = [16, 8], strides = [1, 1]} : vector<16x32xf32> to vector<16x8xf32>
    %151 = vector.extract_strided_slice %141 {offsets = [0, 24], sizes = [16, 8], strides = [1, 1]} : vector<16x32xf32> to vector<16x8xf32>
    %152 = tpu.concatenate %148, %149, %150, %151 in 0 : vector<16x8xf32>, vector<16x8xf32>, vector<16x8xf32>, vector<16x8xf32> -> vector<64x8xf32>
    %153 = vector.extract_strided_slice %142 {offsets = [0, 0], sizes = [16, 8], strides = [1, 1]} : vector<16x32xf32> to vector<16x8xf32>
    %154 = vector.extract_strided_slice %142 {offsets = [0, 8], sizes = [16, 8], strides = [1, 1]} : vector<16x32xf32> to vector<16x8xf32>
    %155 = vector.extract_strided_slice %142 {offsets = [0, 16], sizes = [16, 8], strides = [1, 1]} : vector<16x32xf32> to vector<16x8xf32>
    %156 = vector.extract_strided_slice %142 {offsets = [0, 24], sizes = [16, 8], strides = [1, 1]} : vector<16x32xf32> to vector<16x8xf32>
    %157 = tpu.concatenate %153, %154, %155, %156 in 0 : vector<16x8xf32>, vector<16x8xf32>, vector<16x8xf32>, vector<16x8xf32> -> vector<64x8xf32>
    %cst_54 = arith.constant dense<0.000000e+00> : vector<64x64xf32>
    %158 = tpu.matmul %147, %152, %cst_54 {dimension_numbers = #tpu.dot_dimension_numbers<[1], [1], [0], [0], [0, 0, 1, 0], [], []>} : vector<64x8xf32>, vector<64x8xf32>, vector<64x64xf32> -> vector<64x64xf32>
    %159 = arith.addf %158, %1 : vector<64x64xf32>
    %cst_55 = arith.constant dense<0xFF800000> : vector<64xf32>
    %160 = vector.multi_reduction <maximumf>, %159, %cst_55 [1] : vector<64x64xf32> to vector<64xf32>
    %161 = vector.shape_cast %160 : vector<64xf32> to vector<64x1xf32>
    %162 = vector.broadcast %161 : vector<64x1xf32> to vector<64x64xf32>
    %163 = arith.subf %159, %162 : vector<64x64xf32>
    %164 = math.exp %163 : vector<64x64xf32>
    %cst_56 = arith.constant dense<0.000000e+00> : vector<64xf32>
    %165 = vector.multi_reduction <add>, %164, %cst_56 [1] : vector<64x64xf32> to vector<64xf32>
    %166 = vector.shape_cast %165 : vector<64xf32> to vector<64x1xf32>
    %167 = tpu.reciprocal %166 {approx = true} : vector<64x1xf32> -> vector<64x1xf32>
    %168 = vector.broadcast %167 : vector<64x1xf32> to vector<64x64xf32>
    %169 = arith.mulf %164, %168 : vector<64x64xf32>
    %cst_57 = arith.constant dense<0.000000e+00> : vector<64x8xf32>
    %170 = tpu.matmul %169, %157, %cst_57 {dimension_numbers = #tpu.dot_dimension_numbers<[1], [0], [0], [1], [0, 0, 1, 1], [], []>} : vector<64x64xf32>, vector<64x8xf32>, vector<64x8xf32> -> vector<64x8xf32>
    %171 = vector.extract_strided_slice %170 {offsets = [0, 0], sizes = [16, 8], strides = [1, 1]} : vector<64x8xf32> to vector<16x8xf32>
    %172 = vector.extract_strided_slice %170 {offsets = [16, 0], sizes = [16, 8], strides = [1, 1]} : vector<64x8xf32> to vector<16x8xf32>
    %173 = vector.extract_strided_slice %170 {offsets = [32, 0], sizes = [16, 8], strides = [1, 1]} : vector<64x8xf32> to vector<16x8xf32>
    %174 = vector.extract_strided_slice %170 {offsets = [48, 0], sizes = [16, 8], strides = [1, 1]} : vector<64x8xf32> to vector<16x8xf32>
    %175 = tpu.concatenate %171, %172, %173, %174 in 1 : vector<16x8xf32>, vector<16x8xf32>, vector<16x8xf32>, vector<16x8xf32> -> vector<16x32xf32>
    %c1_58 = arith.constant 1 : index
    %c0_59 = arith.constant 0 : index
    %c0_60 = arith.constant 0 : index
    %176 = vector.load %arg5[%c1_58, %c0_59, %c0_60] : memref<2x32x32xf32, #tpu.memory_space<vmem>>, vector<1x32x32xf32>
    %177 = vector.shape_cast %176 : vector<1x32x32xf32> to vector<32x32xf32>
    %cst_61 = arith.constant dense<0.000000e+00> : vector<16x32xf32>
    %178 = tpu.matmul %175, %177, %cst_61 {dimension_numbers = #tpu.dot_dimension_numbers<[1], [0], [0], [1], [0, 0, 1, 1], [], []>} : vector<16x32xf32>, vector<32x32xf32>, vector<16x32xf32> -> vector<16x32xf32>
    %c1_62 = arith.constant 1 : index
    %c0_63 = arith.constant 0 : index
    %179 = vector.load %arg6[%c1_62, %c0_63] : memref<2x32xf32, #tpu.memory_space<vmem>>, vector<1x32xf32>
    %180 = vector.shape_cast %179 : vector<1x32xf32> to vector<32xf32>
    %181 = vector.shape_cast %180 : vector<32xf32> to vector<1x32xf32>
    %182 = vector.broadcast %181 : vector<1x32xf32> to vector<16x32xf32>
    %183 = arith.addf %178, %182 : vector<16x32xf32>
    %184 = arith.addf %131, %183 : vector<16x32xf32>
    %c1_64 = arith.constant 1 : index
    %c0_65 = arith.constant 0 : index
    %185 = vector.load %arg7[%c1_64, %c0_65] : memref<2x32xf32, #tpu.memory_space<vmem>>, vector<1x32xf32>
    %186 = vector.shape_cast %185 : vector<1x32xf32> to vector<32xf32>
    %c1_66 = arith.constant 1 : index
    %c0_67 = arith.constant 0 : index
    %187 = vector.load %arg8[%c1_66, %c0_67] : memref<2x32xf32, #tpu.memory_space<vmem>>, vector<1x32xf32>
    %188 = vector.shape_cast %187 : vector<1x32xf32> to vector<32xf32>
    %cst_68 = arith.constant dense<0.000000e+00> : vector<16xf32>
    %189 = vector.multi_reduction <add>, %184, %cst_68 [1] : vector<16x32xf32> to vector<16xf32>
    %190 = vector.shape_cast %189 : vector<16xf32> to vector<16x1xf32>
    %cst_69 = arith.constant 3.200000e+01 : f32
    %191 = vector.broadcast %cst_69 : f32 to vector<16x1xf32>
    %192 = arith.divf %190, %191 : vector<16x1xf32>
    %193 = vector.broadcast %192 : vector<16x1xf32> to vector<16x32xf32>
    %194 = arith.subf %184, %193 : vector<16x32xf32>
    %195 = arith.mulf %194, %194 : vector<16x32xf32>
    %cst_70 = arith.constant dense<0.000000e+00> : vector<16xf32>
    %196 = vector.multi_reduction <add>, %195, %cst_70 [1] : vector<16x32xf32> to vector<16xf32>
    %197 = vector.shape_cast %196 : vector<16xf32> to vector<16x1xf32>
    %cst_71 = arith.constant 3.200000e+01 : f32
    %198 = vector.broadcast %cst_71 : f32 to vector<16x1xf32>
    %199 = arith.divf %197, %198 : vector<16x1xf32>
    %200 = vector.broadcast %192 : vector<16x1xf32> to vector<16x32xf32>
    %201 = arith.subf %184, %200 : vector<16x32xf32>
    %cst_72 = arith.constant 9.99999974E-6 : f32
    %202 = vector.broadcast %cst_72 : f32 to vector<16x1xf32>
    %203 = arith.addf %199, %202 : vector<16x1xf32>
    %204 = math.rsqrt %203 : vector<16x1xf32>
    %205 = vector.broadcast %204 : vector<16x1xf32> to vector<16x32xf32>
    %206 = arith.mulf %201, %205 : vector<16x32xf32>
    %207 = vector.shape_cast %186 : vector<32xf32> to vector<1x32xf32>
    %208 = vector.broadcast %207 : vector<1x32xf32> to vector<16x32xf32>
    %209 = arith.mulf %206, %208 : vector<16x32xf32>
    %210 = vector.shape_cast %188 : vector<32xf32> to vector<1x32xf32>
    %211 = vector.broadcast %210 : vector<1x32xf32> to vector<16x32xf32>
    %212 = arith.addf %209, %211 : vector<16x32xf32>
    %213 = arith.truncf %212 : vector<16x32xf32> to vector<16x32xbf16>
    %c1_73 = arith.constant 1 : index
    %c0_74 = arith.constant 0 : index
    %c0_75 = arith.constant 0 : index
    %214 = vector.load %arg11[%c1_73, %c0_74, %c0_75] : memref<2x32x2048xbf16, #tpu.memory_space<vmem>>, vector<1x32x2048xbf16>
    %215 = vector.shape_cast %214 : vector<1x32x2048xbf16> to vector<32x2048xbf16>
    %cst_76 = arith.constant dense<0.000000e+00> : vector<16x2048xf32>
    %216 = tpu.matmul %213, %215, %cst_76 {dimension_numbers = #tpu.dot_dimension_numbers<[1], [0], [0], [1], [0, 0, 1, 1], [], []>} : vector<16x32xbf16>, vector<32x2048xbf16>, vector<16x2048xf32> -> vector<16x2048xf32>
    %c1_77 = arith.constant 1 : index
    %c0_78 = arith.constant 0 : index
    %217 = vector.load %arg12[%c1_77, %c0_78] : memref<2x2048xf32, #tpu.memory_space<vmem>>, vector<1x2048xf32>
    %218 = vector.shape_cast %217 : vector<1x2048xf32> to vector<2048xf32>
    %219 = vector.shape_cast %218 : vector<2048xf32> to vector<1x2048xf32>
    %220 = vector.broadcast %219 : vector<1x2048xf32> to vector<16x2048xf32>
    %221 = arith.addf %216, %220 : vector<16x2048xf32>
    %cst_79 = arith.constant 0.000000e+00 : f32
    %222 = vector.broadcast %cst_79 : f32 to vector<16x2048xf32>
    %223 = arith.maximumf %221, %222 : vector<16x2048xf32>
    %224 = arith.truncf %223 : vector<16x2048xf32> to vector<16x2048xbf16>
    %c1_80 = arith.constant 1 : index
    %c0_81 = arith.constant 0 : index
    %c0_82 = arith.constant 0 : index
    %225 = vector.load %arg13[%c1_80, %c0_81, %c0_82] : memref<2x2048x32xbf16, #tpu.memory_space<vmem>>, vector<1x2048x32xbf16>
    %226 = vector.shape_cast %225 : vector<1x2048x32xbf16> to vector<2048x32xbf16>
    %cst_83 = arith.constant dense<0.000000e+00> : vector<16x32xf32>
    %227 = tpu.matmul %224, %226, %cst_83 {dimension_numbers = #tpu.dot_dimension_numbers<[1], [0], [0], [1], [0, 0, 1, 1], [], []>} : vector<16x2048xbf16>, vector<2048x32xbf16>, vector<16x32xf32> -> vector<16x32xf32>
    %c1_84 = arith.constant 1 : index
    %c0_85 = arith.constant 0 : index
    %228 = vector.load %arg14[%c1_84, %c0_85] : memref<2x32xf32, #tpu.memory_space<vmem>>, vector<1x32xf32>
    %229 = vector.shape_cast %228 : vector<1x32xf32> to vector<32xf32>
    %230 = vector.shape_cast %229 : vector<32xf32> to vector<1x32xf32>
    %231 = vector.broadcast %230 : vector<1x32xf32> to vector<16x32xf32>
    %232 = arith.addf %227, %231 : vector<16x32xf32>
    %233 = arith.addf %212, %232 : vector<16x32xf32>
    %c1_86 = arith.constant 1 : index
    %c0_87 = arith.constant 0 : index
    %234 = vector.load %arg9[%c1_86, %c0_87] : memref<2x32xf32, #tpu.memory_space<vmem>>, vector<1x32xf32>
    %235 = vector.shape_cast %234 : vector<1x32xf32> to vector<32xf32>
    %c1_88 = arith.constant 1 : index
    %c0_89 = arith.constant 0 : index
    %236 = vector.load %arg10[%c1_88, %c0_89] : memref<2x32xf32, #tpu.memory_space<vmem>>, vector<1x32xf32>
    %237 = vector.shape_cast %236 : vector<1x32xf32> to vector<32xf32>
    %cst_90 = arith.constant dense<0.000000e+00> : vector<16xf32>
    %238 = vector.multi_reduction <add>, %233, %cst_90 [1] : vector<16x32xf32> to vector<16xf32>
    %239 = vector.shape_cast %238 : vector<16xf32> to vector<16x1xf32>
    %cst_91 = arith.constant 3.200000e+01 : f32
    %240 = vector.broadcast %cst_91 : f32 to vector<16x1xf32>
    %241 = arith.divf %239, %240 : vector<16x1xf32>
    %242 = vector.broadcast %241 : vector<16x1xf32> to vector<16x32xf32>
    %243 = arith.subf %233, %242 : vector<16x32xf32>
    %244 = arith.mulf %243, %243 : vector<16x32xf32>
    %cst_92 = arith.constant dense<0.000000e+00> : vector<16xf32>
    %245 = vector.multi_reduction <add>, %244, %cst_92 [1] : vector<16x32xf32> to vector<16xf32>
    %246 = vector.shape_cast %245 : vector<16xf32> to vector<16x1xf32>
    %cst_93 = arith.constant 3.200000e+01 : f32
    %247 = vector.broadcast %cst_93 : f32 to vector<16x1xf32>
    %248 = arith.divf %246, %247 : vector<16x1xf32>
    %249 = vector.broadcast %241 : vector<16x1xf32> to vector<16x32xf32>
    %250 = arith.subf %233, %249 : vector<16x32xf32>
    %cst_94 = arith.constant 9.99999974E-6 : f32
    %251 = vector.broadcast %cst_94 : f32 to vector<16x1xf32>
    %252 = arith.addf %248, %251 : vector<16x1xf32>
    %253 = math.rsqrt %252 : vector<16x1xf32>
    %254 = vector.broadcast %253 : vector<16x1xf32> to vector<16x32xf32>
    %255 = arith.mulf %250, %254 : vector<16x32xf32>
    %256 = vector.shape_cast %235 : vector<32xf32> to vector<1x32xf32>
    %257 = vector.broadcast %256 : vector<1x32xf32> to vector<16x32xf32>
    %258 = arith.mulf %255, %257 : vector<16x32xf32>
    %259 = vector.shape_cast %237 : vector<32xf32> to vector<1x32xf32>
    %260 = vector.broadcast %259 : vector<1x32xf32> to vector<16x32xf32>
    %261 = arith.addf %258, %260 : vector<16x32xf32>
    %c0_95 = arith.constant 0 : index
    %c0_96 = arith.constant 0 : index
    %262 = vector.load %arg15[%c0_95, %c0_96] : memref<32x1xf32, #tpu.memory_space<vmem>>, vector<32x1xf32>
    %cst_97 = arith.constant dense<0.000000e+00> : vector<16x1xf32>
    %263 = tpu.matmul %261, %262, %cst_97 {dimension_numbers = #tpu.dot_dimension_numbers<[1], [0], [0], [1], [0, 0, 1, 1], [], []>} : vector<16x32xf32>, vector<32x1xf32>, vector<16x1xf32> -> vector<16x1xf32>
    %c0_98 = arith.constant 0 : index
    %c0_99 = arith.constant 0 : index
    %264 = vector.load %arg16[%c0_98, %c0_99] : memref<1x1xf32, #tpu.memory_space<vmem>>, vector<1x1xf32>
    %265 = vector.broadcast %264 : vector<1x1xf32> to vector<16x1xf32>
    %266 = arith.addf %263, %265 : vector<16x1xf32>
    %cst_100 = arith.constant dense<0xFF800000> : vector<1xf32>
    %267 = vector.multi_reduction <maximumf>, %266, %cst_100 [0] : vector<16x1xf32> to vector<1xf32>
    %268 = vector.shape_cast %267 : vector<1xf32> to vector<1x1xf32>
    %269 = vector.broadcast %268 : vector<1x1xf32> to vector<16x1xf32>
    %270 = arith.subf %266, %269 : vector<16x1xf32>
    %271 = math.exp %270 : vector<16x1xf32>
    %272 = tpu.iota {dimensions = array<i32: 0>} : vector<2x16xi32>
    %273 = tpu.iota {dimensions = array<i32: 1>} : vector<2x16xi32>
    %c8_i32 = arith.constant 8 : i32
    %274 = vector.broadcast %c8_i32 : i32 to vector<2x16xi32>
    %275 = arith.muli %272, %274 : vector<2x16xi32>
    %276 = arith.cmpi sge, %273, %275 : vector<2x16xi32>
    %c1_i32 = arith.constant 1 : i32
    %277 = vector.broadcast %c1_i32 : i32 to vector<2x16xi32>
    %278 = arith.addi %272, %277 : vector<2x16xi32>
    %c8_i32_101 = arith.constant 8 : i32
    %279 = vector.broadcast %c8_i32_101 : i32 to vector<2x16xi32>
    %280 = arith.muli %278, %279 : vector<2x16xi32>
    %281 = arith.cmpi slt, %273, %280 : vector<2x16xi32>
    %282 = arith.andi %276, %281 : vector<2x16xi1>
    %283 = arith.extui %282 : vector<2x16xi1> to vector<2x16xi32>
    %284 = arith.sitofp %283 : vector<2x16xi32> to vector<2x16xf32>
    %cst_102 = arith.constant dense<0.000000e+00> : vector<2x1xf32>
    %285 = tpu.matmul %284, %271, %cst_102 {dimension_numbers = #tpu.dot_dimension_numbers<[1], [0], [0], [1], [0, 0, 1, 1], [], []>} : vector<2x16xf32>, vector<16x1xf32>, vector<2x1xf32> -> vector<2x1xf32>
    %286 = vector.broadcast %271 : vector<16x1xf32> to vector<16x32xf32>
    %287 = arith.mulf %286, %261 : vector<16x32xf32>
    %cst_103 = arith.constant dense<0.000000e+00> : vector<2x32xf32>
    %288 = tpu.matmul %284, %287, %cst_103 {dimension_numbers = #tpu.dot_dimension_numbers<[1], [0], [0], [1], [0, 0, 1, 1], [], []>} : vector<2x16xf32>, vector<16x32xf32>, vector<2x32xf32> -> vector<2x32xf32>
    %289 = tpu.reciprocal %285 {approx = true} : vector<2x1xf32> -> vector<2x1xf32>
    %290 = vector.broadcast %289 : vector<2x1xf32> to vector<2x32xf32>
    %291 = arith.mulf %288, %290 : vector<2x32xf32>
    %c0_104 = arith.constant 0 : index
    %c0_105 = arith.constant 0 : index
    %292 = vector.load %arg17[%c0_104, %c0_105] : memref<1x32xf32, #tpu.memory_space<vmem>>, vector<1x32xf32>
    %c0_106 = arith.constant 0 : index
    %c0_107 = arith.constant 0 : index
    %293 = vector.load %arg18[%c0_106, %c0_107] : memref<1x32xf32, #tpu.memory_space<vmem>>, vector<1x32xf32>
    %cst_108 = arith.constant dense<0.000000e+00> : vector<2xf32>
    %294 = vector.multi_reduction <add>, %291, %cst_108 [1] : vector<2x32xf32> to vector<2xf32>
    %295 = vector.shape_cast %294 : vector<2xf32> to vector<2x1xf32>
    %cst_109 = arith.constant 3.200000e+01 : f32
    %296 = vector.broadcast %cst_109 : f32 to vector<2x1xf32>
    %297 = arith.divf %295, %296 : vector<2x1xf32>
    %298 = vector.broadcast %297 : vector<2x1xf32> to vector<2x32xf32>
    %299 = arith.subf %291, %298 : vector<2x32xf32>
    %300 = arith.mulf %299, %299 : vector<2x32xf32>
    %cst_110 = arith.constant dense<0.000000e+00> : vector<2xf32>
    %301 = vector.multi_reduction <add>, %300, %cst_110 [1] : vector<2x32xf32> to vector<2xf32>
    %302 = vector.shape_cast %301 : vector<2xf32> to vector<2x1xf32>
    %cst_111 = arith.constant 3.200000e+01 : f32
    %303 = vector.broadcast %cst_111 : f32 to vector<2x1xf32>
    %304 = arith.divf %302, %303 : vector<2x1xf32>
    %305 = vector.broadcast %297 : vector<2x1xf32> to vector<2x32xf32>
    %306 = arith.subf %291, %305 : vector<2x32xf32>
    %cst_112 = arith.constant 9.99999974E-6 : f32
    %307 = vector.broadcast %cst_112 : f32 to vector<2x1xf32>
    %308 = arith.addf %304, %307 : vector<2x1xf32>
    %309 = math.rsqrt %308 : vector<2x1xf32>
    %310 = vector.broadcast %309 : vector<2x1xf32> to vector<2x32xf32>
    %311 = arith.mulf %306, %310 : vector<2x32xf32>
    %312 = vector.broadcast %292 : vector<1x32xf32> to vector<2x32xf32>
    %313 = arith.mulf %311, %312 : vector<2x32xf32>
    %314 = vector.broadcast %293 : vector<1x32xf32> to vector<2x32xf32>
    %315 = arith.addf %313, %314 : vector<2x32xf32>
    %c0_113 = arith.constant 0 : index
    %c0_114 = arith.constant 0 : index
    %316 = vector.load %arg2[%c0_113, %c0_114] : memref<32x16xf32, #tpu.memory_space<vmem>>, vector<32x16xf32>
    %cst_115 = arith.constant dense<0.000000e+00> : vector<2x16xf32>
    %317 = tpu.matmul %315, %316, %cst_115 {dimension_numbers = #tpu.dot_dimension_numbers<[1], [0], [0], [1], [0, 0, 1, 1], [], []>} : vector<2x32xf32>, vector<32x16xf32>, vector<2x16xf32> -> vector<2x16xf32>
    %c0_116 = arith.constant 0 : index
    %c0_117 = arith.constant 0 : index
    %318 = vector.load %arg19[%c0_116, %c0_117] : memref<2x16xf32, #tpu.memory_space<vmem>>, vector<2x16xf32>
    tpu.vector_store %arg19[%c0_116, %c0_117], %317 {strides = array<i32>} : memref<2x16xf32, #tpu.memory_space<vmem>>, vector<2x16xf32>,
    return
  }
}

</mosaic_0001>

<bundles_post_ra>
// kernel: tpu_custom_call.1
= control target key start
LH: loop header
LB: loop body
LE: loop exit
PB: predicated region body
PF: predicated region fallthrough
CT: control target
= control target key end

     0   :  { %s9579_s0 = inlined_call_operand.vmem [shape: f32[16,32], index: 0, kind: input, shape index: {}]   ;;  %s9580_s1 = inlined_call_operand.vmem [shape: f32[64,64], index: 1, kind: input, shape index: {}]   ;;  %s9581_s2 = inlined_call_operand.vmem [shape: f32[32,16], index: 2, kind: input, shape index: {}]   ;;  %s9582_s3 = inlined_call_operand.vmem [shape: f32[2,32,96], index: 3, kind: input, shape index: {}]   ;;  %s9583_s4 = inlined_call_operand.vmem [shape: f32[2,96], index: 4, kind: input, shape index: {}]   ;;  %s9584_s5 = inlined_call_operand.vmem [shape: f32[2,32,32], index: 5, kind: input, shape index: {}]   ;;  %s9585_s6 = inlined_call_operand.vmem [shape: f32[2,32], index: 6, kind: input, shape index: {}]   ;;  %s9586_s7 = inlined_call_operand.vmem [shape: f32[2,32], index: 7, kind: input, shape index: {}]   ;;  %s9587_s8 = inlined_call_operand.vmem [shape: f32[2,32], index: 8, kind: input, shape index: {}]   ;;  %s9588_s9 = inlined_call_operand.vmem [shape: f32[2,32], index: 9, kind: input, shape index: {}]   ;;  %s9589_s10 = inlined_call_operand.vmem [shape: f32[2,32], index: 10, kind: input, shape index: {}]   ;;  %s9590_s11 = inlined_call_operand.vmem [shape: bf16[2,32,2048], index: 11, kind: input, shape index: {}]   ;;  %s9591_s12 = inlined_call_operand.vmem [shape: f32[2,2048], index: 12, kind: input, shape index: {}]   ;;  %s9592_s13 = inlined_call_operand.vmem [shape: bf16[2,2048,32], index: 13, kind: input, shape index: {}]   ;;  %s9593_s14 = inlined_call_operand.vmem [shape: f32[2,32], index: 14, kind: input, shape index: {}]   ;;  %s9594_s15 = inlined_call_operand.vmem [shape: f32[32,1], index: 15, kind: input, shape index: {}]   ;;  %s9595_s16 = inlined_call_operand.<no memory space> [shape: f32[1,1], index: 16, kind: input, shape index: {}]   ;;  %s9596_s17 = inlined_call_operand.vmem [shape: f32[1,32], index: 17, kind: input, shape index: {}]   ;;  %s9597_s18 = inlined_call_operand.vmem [shape: f32[1,32], index: 18, kind: input, shape index: {}]   ;;  %s9598_s19 = inlined_call_operand.hbm [shape: f32[2,16], index: 19, kind: output, shape index: {}]  }
   0x1   :  { %9611 = sst [smem:[#allocation6_spill]] %s9579_s0  ;;  %v24_v0 = vstv %s9595_s16 }
   0x2   :  { %9612 = sst [smem:[#allocation7_spill]] %s9580_s1  ;;  %25 = vst [vmem:[#allocation2] sm:$0x1] %v24_v0 }
   0x3   :  { %9613 = sst [smem:[#allocation8_spill]] %s9581_s2 }
   0x4   :  { %9614 = sst [smem:[#allocation9_spill]] %s9582_s3 }
   0x5   :  { %s9615_s1 = sld [smem:[#allocation9_spill]]  ;;  %vm85_vm0 = vcmask 261120  }
   0x6   :  { %s9616_s26 = sld [smem:[#allocation6_spill]] }
   0xb   :  { %v79_v1 = vld [vmem:[%s9615_s1 + $0x18] sm:$0xff]  ;;  %v78_v2 = vld [vmem:[%s9615_s1 + $0x10] sm:$0xff]  ;;  %v77_v3 = vld [vmem:[%s9615_s1 + $0x8] sm:$0xff] }
   0xc   :  { %7127 = vmatprep.subr.mxu0 %v79_v1  ;;  %v66_v4 = vld [vmem:[%s9616_s26] sm:$0xff]  ;;  %v67_v6 = vld [vmem:[%s9616_s26 + $0x8] sm:$0xff] }
   0xd   :  { %7128 = vmatpush3.msra.mxu0 %v79_v1  ;;  %v76_v5 = vld [vmem:[%s9615_s1] sm:$0xff]  ;;  %7135 = vmatprep.mubr.msk.f32.mxu0 %vm85_vm0, %v66_v4 }
   0xe   :  { %7129 = vmatprep.subr.mxu0 %v78_v2 }
   0xf   :  { %7130 = vmatpush3.msra.mxu0 %v78_v2 }
  0x10   :  { %7131 = vmatprep.subr.mxu0 %v77_v3 }
  0x11   :  { %7132 = vmatpush3.msra.mxu0 %v77_v3 }
  0x12   :  { %7133 = vmatprep.subr.mxu0 %v76_v5 }
  0x13   :  { %7134 = vmatpush3.msra.mxu0 %v76_v5 }
  0x14   :  { %7136 = vmatmul.mubr.msk.f32.vlgmr.msra.gmra.mxu0 %vm85_vm0, %v67_v6 }
  0x15   :  { %26 = vsyncpa [#allocation4], 0  ;;  %v5956_v7 = vld [vmem:[%s9583_s4] ss:$0 sm:$0xff]  ;;  %vm197_vm1 = vcmask 64512   ;;  %s7709_s20 = smov 112  }
  0x16   :  { %s7710_s21 = smov 104   ;;  %s7711_s22 = smov 120   ;;  %vm335_vm2 = vcmask 523264   ;;  %vm603_vm3 = vcmask 130048   ;;  %vm606_vm4 = vcmask 195584   ;;  %vm7719_vm5 = vmmov 0  }
  0x17   :  { %s7712_s2 = smov 96   ;;  %s9617_s25 = sld [smem:[#allocation7_spill]]  ;;  %vm5643_vm6 = vcmask 7168   ;;  %vm5835_vm10 = vcmask 254976   ;;  %vm5940_vm11 = vcmask 123904  }
  0x18   :  { %s9609_s28 = smov 64   ;;  %s9607_s30 = smov 8  }
  0x19   :  { %s9605_s23 = smov 16   ;;  %s9603_s24 = smov 24  }
  0x1a   :  { %s9619_s3 = smov 8   ;;  %s9620_s16 = smov 16  }
  0x1d   :  { %v69_v26 = vld [vmem:[%s9617_s25 + $0x8] sm:$0xff]  ;;  %v68_v28 = vld [vmem:[%s9617_s25] sm:$0xff]  ;;  %v70_v34 = vld [vmem:[%s9617_s25 + $0x10] sm:$0xff] }
  0x1e   :  { %v71_v36 = vld [vmem:[%s9617_s25 + $0x18] sm:$0xff]  ;;  %v72_v40 = vld [vmem:[%s9617_s25 + $0x20] sm:$0xff]  ;;  %v73_v43 = vld [vmem:[%s9617_s25 + $0x28] sm:$0xff] }
  0x1f   :  { %v75_v49 = vld [vmem:[%s9617_s25 + $0x38] sm:$0xff]  ;;  %v74_v55 = vld [vmem:[%s9617_s25 + $0x30] sm:$0xff] }
  0xd4   :  { %v7137_v8 = vpop.f32.mrf.mxu0 }
  0xd5   :  { %v7847_v9 = vadd.f32 %v7137_v8, %v5956_v7 }
  0xd6   :  { %v158_v10 = vpop.f32.mrf.mxu0 }
  0xd7   :  { %v7849_v11 = vadd.f32 %v5956_v7, %v158_v10  ;;  %175 = vrot.lane.b32.xlu1 %v7847_v9, %s7709_s20  ;;  %179 = vrot.lane.b32.xlu0 %v7847_v9, %s7710_s21 }
  0xd9   :  { %7154 = vmatprep.mubr.msk.f32.mxu1 %vm197_vm1, %v7849_v11 }
  0xdb   :  { %173 = vrot.lane.b32.xlu1 %v7849_v11, %s7709_s20  ;;  %177 = vrot.lane.b32.xlu0 %v7849_v11, %s7710_s21 }
  0xdf   :  { %169 = vrot.lane.b32.xlu1 %v7849_v11, %s7711_s22  ;;  %171 = vrot.lane.b32.xlu0 %v7847_v9, %s7711_s22 }
 0x149   :  { %v7865_v12 = vpop.permute.xlu1 %175  ;;  %v7867_v13 = vpop.permute.xlu0 %179 }
 0x14a   :  { %195 = vrot.lane.b32.xlu0 %v7867_v13, %s7712_s2 }
 0x14d   :  { %v7871_v14 = vpop.permute.xlu0 %177  ;;  %v7877_v15 = vpop.permute.xlu1 %173 }
 0x14e   :  { %191 = vrot.lane.b32.xlu0 %v7865_v12, %s7712_s2  ;;  %193 = vrot.lane.b32.xlu1 %v7871_v14, %s7712_s2 }
 0x151   :  { %v7879_v16 = vpop.permute.xlu0 %171  ;;  %v7885_v17 = vpop.permute.xlu1 %169 }
 0x152   :  { %189 = vrot.lane.b32.xlu1 %v7877_v15, %s7712_s2  ;;  %187 = vrot.lane.b32.xlu0 %v7879_v16, %s7712_s2 }
 0x156   :  { %185 = vrot.lane.b32.xlu1 %v7885_v17, %s7712_s2  ;;  %183 = vrot.lane.b32.xlu0 %v7847_v9, %s7712_s2 }
 0x15a   :  { %181 = vrot.lane.b32.xlu1 %v7849_v11, %s7712_s2 }
 0x1bc   :  { %v196_v18 = vpop.permute.xlu0 %195 }
 0x1bd   :  { %7138 = vmatprep.subr.msk.mxu1 %vm197_vm1, %v196_v18 }
 0x1be   :  { %7139 = vmatpush3.xpose.msk.msra.mxu1 %vm197_vm1, %v196_v18 }
 0x1c0   :  { %v194_v19 = vpop.permute.xlu1 %193  ;;  %v192_v20 = vpop.permute.xlu0 %191 }
 0x1c1   :  { %7140 = vmatprep.subr.msk.mxu1 %vm197_vm1, %v194_v19 }
 0x1c2   :  { %7141 = vmatpush3.xpose.msk.msra.mxu1 %vm197_vm1, %v194_v19 }
 0x1c3   :  { %7142 = vmatprep.subr.msk.mxu1 %vm197_vm1, %v192_v20 }
 0x1c4   :  { %v190_v21 = vpop.permute.xlu1 %189  ;;  %v188_v22 = vpop.permute.xlu0 %187 }
 0x1c6   :  { %7143 = vmatpush3.xpose.msk.msra.mxu1 %vm197_vm1, %v192_v20 }
 0x1c7   :  { %7144 = vmatprep.subr.msk.mxu1 %vm197_vm1, %v190_v21 }
 0x1c8   :  { %v186_v23 = vpop.permute.xlu1 %185  ;;  %v184_v24 = vpop.permute.xlu0 %183 }
 0x1ca   :  { %7145 = vmatpush3.xpose.msk.msra.mxu1 %vm197_vm1, %v190_v21 }
 0x1cb   :  { %7146 = vmatprep.subr.msk.mxu1 %vm197_vm1, %v188_v22 }
 0x1cc   :  { %v182_v25 = vpop.permute.xlu1 %181 }
 0x1ce   :  { %7147 = vmatpush3.xpose.msk.msra.mxu1 %vm197_vm1, %v188_v22 }
 0x1cf   :  { %7148 = vmatprep.subr.msk.mxu1 %vm197_vm1, %v186_v23 }
 0x1d2   :  { %7149 = vmatpush3.xpose.msk.msra.mxu1 %vm197_vm1, %v186_v23 }
 0x1d3   :  { %7150 = vmatprep.subr.msk.mxu1 %vm197_vm1, %v184_v24 }
 0x1d6   :  { %7151 = vmatpush3.xpose.msk.msra.mxu1 %vm197_vm1, %v184_v24 }
 0x1d7   :  { %7152 = vmatprep.subr.msk.mxu1 %vm197_vm1, %v182_v25 }
 0x1da   :  { %7153 = vmatpush3.xpose.msk.msra.mxu1 %vm197_vm1, %v182_v25 }
 0x1dd   :  { %7155 = vmatmul.mubr.msk.f32.vlgmr.msra.gmra.mxu1 %vm197_vm1, %v7847_v9 }
 0x1de   :  { %7157 = vmatprep.mubr.msk.f32.mxu1 %vm197_vm1, %v7885_v17 }
 0x1e1   :  { %7158 = vmatmul.mubr.msk.f32.gmra.mxu1 %vm197_vm1, %v7879_v16 }
 0x1e2   :  { %7160 = vmatprep.mubr.msk.f32.mxu1 %vm197_vm1, %v7877_v15 }
 0x1e5   :  { %7161 = vmatmul.mubr.msk.f32.gmra.mxu1 %vm197_vm1, %v7865_v12 }
 0x1e6   :  { %7163 = vmatprep.mubr.msk.f32.mxu1 %vm197_vm1, %v7871_v14 }
 0x1e9   :  { %7164 = vmatmul.mubr.msk.f32.gmra.mxu1 %vm197_vm1, %v7867_v13 }
 0x29d   :  { %v7156_v27 = vpop.f32.mrf.mxu1 }
 0x29e   :  { %v302_v29 = vadd.f32 %v7156_v27, %v69_v26 }
 0x29f   :  { %v296_v30 = vpop.f32.mrf.mxu1 }
 0x2a0   :  { %v297_v31 = vadd.f32 %v296_v30, %v68_v28  ;;  %v339_v32 = vsel %vm335_vm2, %v302_v29, -inf }
 0x2a1   :  { %340 = vmax.xlane.f32.xlu1 %v339_v32  ;;  %v7159_v33 = vpop.f32.mrf.mxu1 }
 0x2a2   :  { %v336_v35 = vsel %vm335_vm2, %v297_v31, -inf  ;;  %v312_v41 = vadd.f32 %v7159_v33, %v71_v36 }
 0x2a3   :  { %v306_v37 = vpop.f32.mrf.mxu1  ;;  %337 = vmax.xlane.f32.xlu0 %v336_v35 }
 0x2a4   :  { %v307_v38 = vadd.f32 %v306_v37, %v70_v34  ;;  %v345_v48 = vsel %vm335_vm2, %v312_v41, -inf }
 0x2a5   :  { %v7162_v39 = vpop.f32.mrf.mxu1 }
 0x2a6   :  { %v342_v42 = vsel %vm335_vm2, %v307_v38, -inf  ;;  %v322_v46 = vadd.f32 %v7162_v39, %v73_v43 }
 0x2a7   :  { %v316_v44 = vpop.f32.mrf.mxu1  ;;  %343 = vmax.xlane.f32.xlu0 %v342_v42 }
 0x2a8   :  { %v317_v45 = vadd.f32 %v316_v44, %v72_v40  ;;  %v351_v52 = vsel %vm335_vm2, %v322_v46, -inf }
 0x2a9   :  { %v7165_v50 = vpop.f32.mrf.mxu1 }
 0x2aa   :  { %v348_v47 = vsel %vm335_vm2, %v317_v45, -inf  ;;  %v332_v51 = vadd.f32 %v7165_v50, %v75_v49 }
 0x2ab   :  { %349 = vmax.xlane.f32.xlu1 %v348_v47  ;;  %346 = vmax.xlane.f32.xlu0 %v345_v48  ;;  %v326_v54 = vpop.f32.mrf.mxu1 }
 0x2ac   :  { %v357_v53 = vsel %vm335_vm2, %v332_v51, -inf  ;;  %v7962_v56 = vadd.f32 %v326_v54, %v74_v55 }
 0x2ae   :  { %v354_v57 = vsel %vm335_vm2, %v7962_v56, -inf }
 0x2af   :  { %352 = vmax.xlane.f32.xlu0 %v351_v52 }
 0x2b3   :  { %358 = vmax.xlane.f32.xlu0 %v357_v53 }
 0x2bc   :  { %438 = vrot.lane.b32.xlu1 %v7867_v13, %s9609_s28 }
 0x2c0   :  { %434 = vrot.lane.b32.xlu1 %v7865_v12, %s9609_s28 }
 0x2c9   :  { %436 = vrot.lane.b32.xlu0 %v7871_v14, %s9609_s28 }
 0x2cd   :  { %430 = vrot.lane.b32.xlu0 %v7879_v16, %s9609_s28 }
 0x2e4   :  { %355 = vmax.xlane.f32.xlu1 %v354_v57 }
 0x2f5   :  { %432 = vrot.lane.b32.xlu1 %v7877_v15, %s9609_s28 }
 0x2f9   :  { %428 = vrot.lane.b32.xlu1 %v7885_v17, %s9609_s28 }
 0x32a   :  { %v341_v58 = vpop.xlane.xlu1 %340 }
 0x32b   :  { %v361_v59 = vsub.f32 %v302_v29, %v341_v58 }
 0x32c   :  { %v338_v60 = vpop.xlane.xlu0 %337 }
 0x32d   :  { %v370_v61 = vmul.f32 1.442695, %v361_v59  ;;  %v360_v62 = vsub.f32 %v297_v31, %v338_v60 }
 0x32f   :  { %7589 = vpow2.f32 %v370_v61  ;;  %v368_v63 = vmul.f32 1.442695, %v360_v62 }
 0x330   :  { %v344_v0 = vpop.xlane.xlu0 %343 }
 0x331   :  { %7591 = vpow2.f32 %v368_v63  ;;  %v362_v1 = vsub.f32 %v307_v38, %v344_v0 }
 0x333   :  { %v372_v2 = vmul.f32 1.442695, %v362_v1 }
 0x334   :  { %v350_v3 = vpop.xlane.xlu1 %349  ;;  %v347_v4 = vpop.xlane.xlu0 %346 }
 0x335   :  { %7593 = vpow2.f32 %v372_v2  ;;  %v364_v5 = vsub.f32 %v317_v45, %v350_v3  ;;  %v363_v6 = vsub.f32 %v312_v41, %v347_v4  ;;  %v612_v2 = vld [vmem:[%s9584_s5 + $0x18] sm:$0xff]  ;;  %v611_v3 = vld [vmem:[%s9584_s5 + $0x10] sm:$0xff] }
 0x337   :  { %v376_v7 = vmul.f32 1.442695, %v364_v5  ;;  %v374_v8 = vmul.f32 1.442695, %v363_v6  ;;  %v610_v5 = vld [vmem:[%s9584_s5 + $0x8] sm:$0xff] }
 0x338   :  { %v439_v10 = vpop.permute.xlu1 %438  ;;  %v353_v12 = vpop.xlane.xlu0 %352 }
 0x339   :  { %7595 = vpow2.f32 %v376_v7  ;;  %v365_v13 = vsub.f32 %v322_v46, %v353_v12  ;;  %7166 = vmatprep.subr.mxu0 %v439_v10  ;;  %v609_v7 = vld [vmem:[%s9584_s5] sm:$0xff] }
 0x33a   :  { %7597 = vpow2.f32 %v374_v8  ;;  %7167 = vmatpush3.msra.mxu0 %v439_v10 }
 0x33b   :  { %v378_v14 = vmul.f32 1.442695, %v365_v13 }
 0x33c   :  { %v7970_v15 = vpop.eup %7589  ;;  %v359_v16 = vpop.xlane.xlu0 %358 }
 0x33d   :  { %7599 = vpow2.f32 %v378_v14  ;;  %v367_v17 = vsub.f32 %v332_v51, %v359_v16  ;;  %v387_v18 = vsel %vm335_vm2, %v7970_v15, 0.0  ;;  %v435_v24 = vpop.permute.xlu1 %434 }
 0x33e   :  { %v7592_v19 = vpop.eup %7591  ;;  %388 = vadd.xlane.f32.xlu0 %v387_v18 }
 0x33f   :  { %v382_v20 = vmul.f32 1.442695, %v367_v17  ;;  %v384_v21 = vsel %vm335_vm2, %v7592_v19, 0.0 }
 0x340   :  { %385 = vadd.xlane.f32.xlu1 %v384_v21  ;;  %v437_v22 = vpop.permute.xlu0 %436 }
 0x341   :  { %7601 = vpow2.f32 %v382_v20  ;;  %7168 = vmatprep.subr.mxu0 %v437_v22 }
 0x342   :  { %v7975_v23 = vpop.eup %7593  ;;  %7169 = vmatpush3.msra.mxu0 %v437_v22 }
 0x343   :  { %7170 = vmatprep.subr.mxu0 %v435_v24  ;;  %v390_v25 = vsel %vm335_vm2, %v7975_v23, 0.0 }
 0x344   :  { %391 = vadd.xlane.f32.xlu1 %v390_v25  ;;  %7171 = vmatpush3.msra.mxu0 %v435_v24  ;;  %v431_v38 = vpop.permute.xlu0 %430 }
 0x346   :  { %v7979_v26 = vpop.eup %7595 }
 0x347   :  { %v7598_v27 = vpop.eup %7597  ;;  %v396_v28 = vsel %vm335_vm2, %v7979_v26, 0.0 }
 0x348   :  { %397 = vadd.xlane.f32.xlu1 %v396_v28  ;;  %v393_v29 = vsel %vm335_vm2, %v7598_v27, 0.0  ;;  %v5983_v28 = vld [vmem:[%s9585_s6] ss:$0 sm:$0xff] }
 0x349   :  { %394 = vadd.xlane.f32.xlu0 %v393_v29 }
 0x34a   :  { %v7984_v30 = vpop.eup %7599 }
 0x34b   :  { %v399_v31 = vsel %vm335_vm2, %v7984_v30, 0.0 }
 0x34d   :  { %400 = vadd.xlane.f32.xlu0 %v399_v31 }
 0x34e   :  { %v7988_v32 = vpop.eup %7601 }
 0x34f   :  { %v405_v33 = vsel %vm335_vm2, %v7988_v32, 0.0 }
 0x351   :  { %406 = vadd.xlane.f32.xlu0 %v405_v33  ;;  %v7677_v33 = vld [vmem:[%s9616_s26 + $0x8] sm:$0xff] }
 0x367   :  { %426 = vrot.lane.b32.xlu0 %v7847_v9, %s9609_s28 }
 0x36d   :  { %v356_v34 = vpop.xlane.xlu1 %355 }
 0x36e   :  { %v366_v35 = vsub.f32 %v7962_v56, %v356_v34 }
 0x370   :  { %v380_v36 = vmul.f32 1.442695, %v366_v35 }
 0x371   :  { %v433_v37 = vpop.permute.xlu1 %432 }
 0x372   :  { %7603 = vpow2.f32 %v380_v36  ;;  %7172 = vmatprep.subr.mxu0 %v433_v37  ;;  %v7678_v36 = vld [vmem:[%s9616_s26] sm:$0xff] }
 0x373   :  { %7173 = vmatpush3.msra.mxu0 %v433_v37 }
 0x374   :  { %7174 = vmatprep.subr.mxu0 %v431_v38 }
 0x375   :  { %v429_v39 = vpop.permute.xlu1 %428  ;;  %7175 = vmatpush3.msra.mxu0 %v431_v38 }
 0x376   :  { %7176 = vmatprep.subr.mxu0 %v429_v39 }
 0x377   :  { %7177 = vmatpush3.msra.mxu0 %v429_v39 }
 0x37f   :  { %v7604_v40 = vpop.eup %7603 }
 0x380   :  { %v402_v41 = vsel %vm335_vm2, %v7604_v40, 0.0 }
 0x381   :  { %403 = vadd.xlane.f32.xlu1 %v402_v41 }
 0x392   :  { %424 = vrot.lane.b32.xlu1 %v7849_v11, %s9609_s28  ;;  %s9621_s28 = smov 24  }
 0x3c7   :  { %v389_v42 = vpop.xlane.xlu0 %388 }
 0x3c9   :  { %v386_v9 = vpop.xlane.xlu1 %385 }
 0x3ca   :  { %7605 = vrcp.f32 %v386_v9 }
 0x3cb   :  { %7607 = vrcp.f32 %v389_v42 }
 0x3cd   :  { %v392_v49 = vpop.xlane.xlu1 %391 }
 0x3ce   :  { %7609 = vrcp.f32 %v392_v49  ;;  %v768_v49 = vld [vmem:[%s9590_s11 + $0xc8] sm:$0xff] }
 0x3d1   :  { %v398_v50 = vpop.xlane.xlu1 %397 }
 0x3d2   :  { %v395_v43 = vpop.xlane.xlu0 %394 }
 0x3d3   :  { %7611 = vrcp.f32 %v395_v43 }
 0x3d4   :  { %7613 = vrcp.f32 %v398_v50  ;;  %v759_v50 = vld [vmem:[%s9590_s11 + $0x80] sm:$0xff] }
 0x3d6   :  { %v401_v44 = vpop.xlane.xlu0 %400 }
 0x3d7   :  { %v7606_v45 = vpop.eup %7605  ;;  %7615 = vrcp.f32 %v401_v44 }
 0x3d8   :  { %v416_v46 = vmul.f32 %v7606_v45, %v7592_v19  ;;  %v7608_v51 = vpop.eup %7607 }
 0x3d9   :  { %v417_v54 = vmul.f32 %v7608_v51, %v7970_v15  ;;  %v767_v51 = vld [vmem:[%s9590_s11 + $0xc0] sm:$0xff] }
 0x3da   :  { %v407_v47 = vpop.xlane.xlu0 %406  ;;  %7182 = vmatprep.mubr.msk.f32.mxu0 %vm335_vm2, %v416_v46 }
 0x3db   :  { %7617 = vrcp.f32 %v407_v47  ;;  %v7610_v52 = vpop.eup %7609 }
 0x3dc   :  { %v418_v56 = vmul.f32 %v7610_v52, %v7975_v23 }
 0x3de   :  { %v427_v48 = vpop.permute.xlu0 %426 }
 0x3df   :  { %7178 = vmatprep.subr.mxu0 %v427_v48 }
 0x3e0   :  { %7179 = vmatpush3.msra.mxu0 %v427_v48  ;;  %v7612_v55 = vpop.eup %7611  ;;  %v760_v48 = vld [vmem:[%s9590_s11 + $0x88] sm:$0xff] }
 0x3e1   :  { %v7614_v57 = vpop.eup %7613  ;;  %v419_v58 = vmul.f32 %v7612_v55, %v7598_v27  ;;  %v6007_v52 = vcombine.low %v760_v48, %v768_v49  ;;  %v743_v55 = vld [vmem:[%s9590_s11] sm:$0xff] }
 0x3e2   :  { %v420_v60 = vmul.f32 %v7614_v57, %v7979_v26  ;;  %v744_v57 = vld [vmem:[%s9590_s11 + $0x8] sm:$0xff] }
 0x3e4   :  { %v7616_v59 = vpop.eup %7615 }
 0x3e5   :  { %v421_v62 = vmul.f32 %v7616_v59, %v7984_v30  ;;  %v752_v59 = vld [vmem:[%s9590_s11 + $0x48] sm:$0xff] }
 0x3e8   :  { %v7618_v61 = vpop.eup %7617 }
 0x3e9   :  { %v423_v1 = vmul.f32 %v7618_v61, %v7988_v32  ;;  %v5991_v61 = vcombine.low %v744_v57, %v752_v59 }
 0x40a   :  { %v404_v11 = vpop.xlane.xlu1 %403 }
 0x40b   :  { %7619 = vrcp.f32 %v404_v11  ;;  %v6008_v11 = vcombine.high %v760_v48, %v768_v49  ;;  %v765_v48 = vld [vmem:[%s9590_s11 + $0xb0] sm:$0xff] }
 0x40c   :  { %v773_v49 = vld [vmem:[%s9590_s11 + $0xf0] sm:$0xff] }
 0x40d   :  { %1078 = vmatprep.subr.bf16.mxu1 %v6008_v11  ;;  %v774_v11 = vld [vmem:[%s9590_s11 + $0xf8] sm:$0xff] }
 0x40e   :  { %v425_v53 = vpop.permute.xlu1 %424  ;;  %1079 = vmatpush1.bf16.msra.mxu1 %v6007_v52 }
 0x40f   :  { %7180 = vmatprep.subr.mxu0 %v425_v53 }
 0x410   :  { %7181 = vmatpush3.msra.mxu0 %v425_v53  ;;  %v6005_v53 = vcombine.low %v759_v50, %v767_v51 }
 0x411   :  { %7183 = vmatmul.mubr.msk.f32.vlgmr.msra.gmra.mxu0 %vm335_vm2, %v417_v54  ;;  %7194 = vmatprep.subr.mxu0 %v612_v2  ;;  %v6006_v54 = vcombine.high %v759_v50, %v767_v51  ;;  %v766_v50 = vld [vmem:[%s9590_s11 + $0xb8] sm:$0xff] }
 0x412   :  { %7185 = vmatprep.mubr.msk.f32.mxu0 %vm335_vm2, %v418_v56  ;;  %7195 = vmatpush3.msra.mxu0 %v612_v2  ;;  %v751_v56 = vld [vmem:[%s9590_s11 + $0x40] sm:$0xff] }
 0x413   :  { %7196 = vmatprep.subr.mxu0 %v611_v3 }
 0x414   :  { %7197 = vmatpush3.msra.mxu0 %v611_v3  ;;  %v770_v3 = vld [vmem:[%s9590_s11 + $0xd8] sm:$0xff] }
 0x415   :  { %7186 = vmatmul.mubr.msk.f32.gmra.mxu0 %vm335_vm2, %v419_v58  ;;  %7198 = vmatprep.subr.mxu0 %v610_v5  ;;  %v5990_v58 = vcombine.high %v743_v55, %v751_v56 }
 0x416   :  { %7188 = vmatprep.mubr.msk.f32.mxu0 %vm335_vm2, %v420_v60  ;;  %7199 = vmatpush3.msra.mxu0 %v610_v5  ;;  %v5989_v60 = vcombine.low %v743_v55, %v751_v56  ;;  %v749_v55 = vld [vmem:[%s9590_s11 + $0x30] sm:$0xff] }
 0x417   :  { %7200 = vmatprep.subr.mxu0 %v609_v7  ;;  %v757_v56 = vld [vmem:[%s9590_s11 + $0x70] sm:$0xff] }
 0x418   :  { %v7620_v63 = vpop.eup %7619  ;;  %7201 = vmatpush3.msra.mxu0 %v609_v7 }
 0x419   :  { %7189 = vmatmul.mubr.msk.f32.gmra.mxu0 %vm335_vm2, %v421_v62  ;;  %v422_v0 = vmul.f32 %v7620_v63, %v7604_v40  ;;  %1035 = vmatprep.subr.bf16.mxu0 %v6006_v54  ;;  %v5992_v62 = vcombine.high %v744_v57, %v752_v59  ;;  %v761_v63 = vld [vmem:[%s9590_s11 + $0x90] sm:$0xff]  ;;  %v6020_v54 = vcombine.high %v766_v50, %v774_v11  ;;  %v750_v57 = vld [vmem:[%s9590_s11 + $0x38] sm:$0xff] }
 0x41a   :  { %v6017_v59 = vcombine.low %v765_v48, %v773_v49 }
 0x41b   :  { %7191 = vmatprep.mubr.msk.f32.mxu0 %vm335_vm2, %v422_v0  ;;  %1080 = vmatprep.subr.bf16.mxu1 %v5992_v62  ;;  %v769_v0 = vld [vmem:[%s9590_s11 + $0xd0] sm:$0xff] }
 0x41c   :  { %1081 = vmatpush1.bf16.msra.mxu1 %v5991_v61  ;;  %v6010_v2 = vcombine.high %v761_v63, %v769_v0  ;;  %v6009_v5 = vcombine.low %v761_v63, %v769_v0  ;;  %v6002_v61 = vcombine.high %v749_v55, %v757_v56  ;;  %v6001_v63 = vcombine.low %v749_v55, %v757_v56 }
 0x41d   :  { %7192 = vmatmul.mubr.msk.f32.gmra.mxu0 %vm335_vm2, %v423_v1  ;;  %v762_v1 = vld [vmem:[%s9590_s11 + $0x98] sm:$0xff] }
 0x41e   :  { %v6012_v7 = vcombine.high %v762_v1, %v770_v3 }
 0x420   :  { %1164 = vmatprep.subr.bf16.mxu1 %v6012_v7  ;;  %v7338_v7 = vld [vmem:[%s9592_s13 + $0xf0] sm:$0xff]  }
 0x4d1   :  { %v7184_v4 = vpop.f32.mrf.mxu0 }
 0x4d3   :  { %v538_v6 = vpop.f32.mrf.mxu0 }
 0x4d5   :  { %v7187_v8 = vpop.f32.mrf.mxu0 }
 0x4d6   :  { %581 = vrot.lane.b32.xlu1 %v7187_v8, %s9607_s30 }
 0x4d7   :  { %v548_v10 = vpop.f32.mrf.mxu0 }
 0x4d8   :  { %579 = vrot.lane.b32.xlu0 %v548_v10, %s9607_s30 }
 0x4d9   :  { %v7190_v12 = vpop.f32.mrf.mxu0 }
 0x4da   :  { %589 = vrot.lane.b32.xlu1 %v7190_v12, %s9605_s23 }
 0x4db   :  { %v558_v13 = vpop.f32.mrf.mxu0 }
 0x4dc   :  { %587 = vrot.lane.b32.xlu0 %v558_v13, %s9605_s23 }
 0x4dd   :  { %v7193_v14 = vpop.f32.mrf.mxu0 }
 0x4de   :  { %597 = vrot.lane.b32.xlu1 %v7193_v14, %s9603_s24 }
 0x4df   :  { %v568_v15 = vpop.f32.mrf.mxu0 }
 0x4e0   :  { %595 = vrot.lane.b32.xlu0 %v568_v15, %s9603_s24 }
 0x548   :  { %v582_v16 = vpop.permute.xlu1 %581 }
 0x549   :  { %v602_v22 = vsel %vm197_vm1, %v7184_v4, %v582_v16  ;;  %v7717_v4 = vmov 0  }
 0x54a   :  { %v580_v17 = vpop.permute.xlu0 %579  ;;  %1098 = vmatprep.mubr.bf16.mxu1 %v7717_v4  ;;  %7332 = vset.pattern.permute.xlu0 %v7717_v4 }
 0x54b   :  { %v601_v20 = vsel %vm197_vm1, %v538_v6, %v580_v17  ;;  %v6011_v6 = vcombine.low %v762_v1, %v770_v3  ;;  %7331 = vset.pattern.permute.xlu1 %v7717_v4  ;;  %v7333_v1 = vld [vmem:[%s9592_s13 + $0x78] sm:$0xff]  }
 0x54c   :  { %v590_v18 = vpop.permute.xlu1 %589  ;;  %v7335_v3 = vld [vmem:[%s9592_s13 + $0x38] sm:$0xff]  }
 0x54d   :  { %v605_v25 = vsel %vm603_vm3, %v602_v22, %v590_v18  ;;  %v5986_v18 = vld [vmem:[%s9586_s7] ss:$0 sm:$0xff] }
 0x54e   :  { %v588_v19 = vpop.permute.xlu0 %587  ;;  %v5987_v22 = vld [vmem:[%s9587_s8] ss:$0 sm:$0xff] }
 0x54f   :  { %v604_v23 = vsel %vm603_vm3, %v601_v20, %v588_v19 }
 0x550   :  { %v598_v21 = vpop.permute.xlu1 %597 }
 0x551   :  { %v608_v27 = vsel %vm606_vm4, %v605_v25, %v598_v21  ;;  %v753_v25 = vld [vmem:[%s9590_s11 + $0x50] sm:$0xff] }
 0x552   :  { %v596_v24 = vpop.permute.xlu0 %595 }
 0x553   :  { %v607_v26 = vsel %vm606_vm4, %v604_v23, %v596_v24  ;;  %v745_v24 = vld [vmem:[%s9590_s11 + $0x10] sm:$0xff] }
 0x554   :  { %7202 = vmatprep.mubr.msk.f32.mxu0 %vm85_vm0, %v607_v26  ;;  %v746_v26 = vld [vmem:[%s9590_s11 + $0x18] sm:$0xff] }
 0x555   :  { %7203 = vmatmul.mubr.msk.f32.vlgmr.msra.gmra.mxu0 %vm85_vm0, %v608_v27  ;;  %v754_v27 = vld [vmem:[%s9590_s11 + $0x58] sm:$0xff] }
 0x556   :  { %1036 = vmatpush1.bf16.msra.mxu0 %v6005_v53  ;;  %1055 = vmatprep.mubr.bf16.mxu0 %v7717_v4  ;;  %v6018_v53 = vcombine.high %v765_v48, %v773_v49 }
 0x557   :  { %1037 = vmatprep.subr.bf16.mxu0 %v5990_v58  ;;  %v758_v58 = vld [vmem:[%s9590_s11 + $0x78] sm:$0xff] }
 0x558   :  { %v6004_v62 = vcombine.high %v750_v57, %v758_v58  ;;  %v6003_v0 = vcombine.low %v750_v57, %v758_v58 }
 0x55a   :  { %1038 = vmatpush1.bf16.msra.mxu0 %v5989_v60  ;;  %v6019_v60 = vcombine.low %v766_v50, %v774_v11 }
 0x55b   :  { %1121 = vmatprep.subr.bf16.mxu0 %v6010_v2  ;;  %v7334_v2 = vld [vmem:[%s9592_s13 + $0xf8] sm:$0xff]  }
 0x615   :  { %v7204_v29 = vpop.f32.mrf.mxu0 }
 0x616   :  { %v696_v30 = vadd.f32 %v7204_v29, %v5983_v28 }
 0x617   :  { %v690_v31 = vpop.f32.mrf.mxu0 }
 0x618   :  { %v691_v32 = vadd.f32 %v5983_v28, %v690_v31  ;;  %v700_v34 = vadd.f32 %v7677_v33, %v696_v30  ;;  %v5994_v31 = vcombine.high %v745_v24, %v753_v25  ;;  %v763_v33 = vld [vmem:[%s9590_s11 + $0xa0] sm:$0xff] }
 0x61a   :  { %v706_v35 = vsel %vm85_vm0, %v700_v34, 0.0  ;;  %v699_v37 = vadd.f32 %v7678_v36, %v691_v32  ;;  %v5996_v32 = vcombine.high %v746_v26, %v754_v27  ;;  %v772_v36 = vld [vmem:[%s9590_s11 + $0xe8] sm:$0xff] }
 0x61b   :  { %707 = vadd.xlane.f32.xlu1 %v706_v35  ;;  %v764_v35 = vld [vmem:[%s9590_s11 + $0xa8] sm:$0xff] }
 0x61c   :  { %v703_v38 = vsel %vm85_vm0, %v699_v37, 0.0 }
 0x61d   :  { %704 = vadd.xlane.f32.xlu0 %v703_v38  ;;  %v5995_v38 = vcombine.low %v746_v26, %v754_v27  ;;  %v7355_v26 = vld [vmem:[%s9592_s13 + $0x10] sm:$0xff]  }
 0x61e   :  { %v7356_v27 = vld [vmem:[%s9592_s13 + $0x90] sm:$0xff]  }
 0x6a4   :  { %v708_v39 = vpop.xlane.xlu1 %707 }
 0x6a5   :  { %v711_v40 = vmul.f32 0.03125, %v708_v39 }
 0x6a6   :  { %v705_v41 = vpop.xlane.xlu0 %704 }
 0x6a7   :  { %v710_v9 = vmul.f32 0.03125, %v705_v41  ;;  %v713_v42 = vsub.f32 %v700_v34, %v711_v40  ;;  %v771_v34 = vld [vmem:[%s9590_s11 + $0xe0] sm:$0xff]  ;;  %v6016_v40 = vcombine.high %v764_v35, %v772_v36 }
 0x6a8   :  { %v6014_v39 = vcombine.high %v763_v33, %v771_v34  ;;  %v747_v41 = vld [vmem:[%s9590_s11 + $0x20] sm:$0xff] }
 0x6a9   :  { %v712_v43 = vsub.f32 %v699_v37, %v710_v9  ;;  %v715_v46 = vmul.f32 %v713_v42, %v713_v42  ;;  %v5993_v37 = vcombine.low %v745_v24, %v753_v25  ;;  %v755_v9 = vld [vmem:[%s9590_s11 + $0x60] sm:$0xff]  ;;  %v7353_v24 = vld [vmem:[%s9592_s13 + $0x50] sm:$0xff]  }
 0x6aa   :  { %v5997_v51 = vcombine.low %v747_v41, %v755_v9  ;;  %v7354_v25 = vld [vmem:[%s9592_s13 + $0xd0] sm:$0xff]  }
 0x6ab   :  { %v714_v44 = vmul.f32 %v712_v43, %v712_v43  ;;  %v719_v47 = vsel %vm85_vm0, %v715_v46, 0.0  ;;  %v5998_v46 = vcombine.high %v747_v41, %v755_v9 }
 0x6ad   :  { %v716_v45 = vsel %vm85_vm0, %v714_v44, 0.0  ;;  %v6013_v44 = vcombine.low %v763_v33, %v771_v34  ;;  %v7360_v33 = vld [vmem:[%s9592_s13 + $0x88] sm:$0xff]   ;;  %v7361_v34 = vld [vmem:[%s9592_s13 + $0x40] sm:$0xff]  }
 0x6ae   :  { %717 = vadd.xlane.f32.xlu0 %v716_v45  ;;  %v6015_v45 = vcombine.low %v764_v35, %v772_v36  ;;  %v7362_v35 = vld [vmem:[%s9592_s13 + $0xc0] sm:$0xff]  }
 0x6af   :  { %v7363_v36 = vld [vmem:[%s9592_s13] sm:$0xff]  }
 0x6b2   :  { %720 = vadd.xlane.f32.xlu0 %v719_v47 }
 0x737   :  { %v718_v8 = vpop.xlane.xlu0 %717 }
 0x738   :  { %v722_v10 = vmul.f32 0.03125, %v718_v8  ;;  %v7339_v8 = vld [vmem:[%s9592_s13 + $0x30] sm:$0xff]  }
 0x73a   :  { %v724_v12 = vadd.f32 1e-05, %v722_v10  ;;  %v7340_v10 = vld [vmem:[%s9592_s13 + $0xb0] sm:$0xff]  }
 0x73b   :  { %v721_v13 = vpop.xlane.xlu0 %720 }
 0x73c   :  { %7621 = vrsqrt.f32 %v724_v12  ;;  %v723_v14 = vmul.f32 0.03125, %v721_v13  ;;  %v7341_v12 = vld [vmem:[%s9592_s13 + $0x68] sm:$0xff]  }
 0x73d   :  { %v7342_v13 = vld [vmem:[%s9592_s13 + $0xe8] sm:$0xff]  }
 0x73e   :  { %v725_v15 = vadd.f32 1e-05, %v723_v14  ;;  %v7343_v14 = vld [vmem:[%s9592_s13 + $0x28] sm:$0xff]  }
 0x740   :  { %7623 = vrsqrt.f32 %v725_v15  ;;  %v7344_v15 = vld [vmem:[%s9592_s13 + $0xa8] sm:$0xff]  }
 0x749   :  { %v7622_v16 = vpop.eup %7621 }
 0x74a   :  { %v728_v17 = vmul.f32 %v7622_v16, %v712_v43  ;;  %v756_v43 = vld [vmem:[%s9590_s11 + $0x68] sm:$0xff]  ;;  %v7345_v16 = vld [vmem:[%s9592_s13 + $0x60] sm:$0xff]  }
 0x74c   :  { %v734_v20 = vmul.f32 %v5986_v18, %v728_v17  ;;  %v7346_v17 = vld [vmem:[%s9592_s13 + $0xe0] sm:$0xff]  }
 0x74d   :  { %v7624_v19 = vpop.eup %7623 }
 0x74e   :  { %v729_v21 = vmul.f32 %v7624_v19, %v713_v42  ;;  %v8108_v28 = vadd.f32 %v5987_v22, %v734_v20  ;;  %v748_v42 = vld [vmem:[%s9590_s11 + $0x28] sm:$0xff]  ;;  %v7348_v19 = vld [vmem:[%s9592_s13 + $0xa0] sm:$0xff]   ;;  %v7349_v20 = vld [vmem:[%s9592_s13 + $0x58] sm:$0xff]  }
 0x74f   :  { %v6000_v47 = vcombine.high %v748_v42, %v756_v43  ;;  %v5999_v52 = vcombine.low %v748_v42, %v756_v43 }
 0x750   :  { %v735_v23 = vmul.f32 %v5986_v18, %v729_v21  ;;  %v7347_v18 = vld [vmem:[%s9592_s13 + $0x20] sm:$0xff]   ;;  %v7350_v21 = vld [vmem:[%s9592_s13 + $0xd8] sm:$0xff]  }
 0x752   :  { %v8110_v29 = vadd.f32 %v5987_v22, %v735_v23  ;;  %v7351_v22 = vld [vmem:[%s9592_s13 + $0x18] sm:$0xff]  }
 0x753   :  { %v7352_v23 = vld [vmem:[%s9592_s13 + $0x98] sm:$0xff]  }
 0x754   :  { %v8114_v30 = vpack.c.bf16 %v8110_v29, %v8108_v28 }
 0x756   :  { %6021 = vmatmul.mubr.msk.bf16.vlgmr.msra.gmra.mxu0 %vm85_vm0, %v8114_v30  ;;  %6022 = vmatmul.mubr.msk.bf16.vlgmr.msra.gmra.mxu1 %vm85_vm0, %v8114_v30 }
 0x757   :  { %1122 = vmatpush1.bf16.msra.mxu0 %v6009_v5  ;;  %1165 = vmatpush1.bf16.msra.mxu1 %v6011_v6  ;;  %v7336_v5 = vld [vmem:[%s9592_s13 + $0xb8] sm:$0xff]   ;;  %v7337_v6 = vld [vmem:[%s9592_s13 + $0x70] sm:$0xff]  }
 0x758   :  { %1123 = vmatprep.subr.bf16.mxu0 %v5994_v31  ;;  %1166 = vmatprep.subr.bf16.mxu1 %v5996_v32  ;;  %v7358_v31 = vld [vmem:[%s9592_s13 + $0xc8] sm:$0xff]  }
 0x759   :  { %1141 = vmatprep.mubr.bf16.mxu0 %v7717_v4  ;;  %1184 = vmatprep.mubr.bf16.mxu1 %v7717_v4  ;;  %v7359_v32 = vld [vmem:[%s9592_s13 + $0x8] sm:$0xff]  }
 0x75b   :  { %1124 = vmatpush1.bf16.msra.mxu0 %v5993_v37  ;;  %1167 = vmatpush1.bf16.msra.mxu1 %v5995_v38  ;;  %v7364_v37 = vld [vmem:[%s9592_s13 + $0x80] sm:$0xff]   ;;  %v7365_v38 = vld [vmem:[%s9592_s13 + $0x178] sm:$0xff]  }
 0x75c   :  { %1207 = vmatprep.subr.bf16.mxu0 %v6014_v39  ;;  %1250 = vmatprep.subr.bf16.mxu1 %v6016_v40  ;;  %v7366_v39 = vld [vmem:[%s9592_s13 + $0x1f8] sm:$0xff]   ;;  %v780_v40 = vlaneseq }
 0x75e   :  { %6023 = vmatmul.mubr.msk.bf16.vlgmr.msra.gmra.mxu0 %vm85_vm0, %v8114_v30  ;;  %6024 = vmatmul.mubr.msk.bf16.vlgmr.msra.gmra.mxu1 %vm85_vm0, %v8114_v30  ;;  %v8289_v41 = vshrl.u32 %v780_v40, 7 }
 0x75f   :  { %1208 = vmatpush1.bf16.msra.mxu0 %v6013_v44  ;;  %1251 = vmatpush1.bf16.msra.mxu1 %v6015_v45  ;;  %v8306_v45 = vld [vmem:[%s9591_s12] ss:$2 sm:$0xff] }
 0x760   :  { %1209 = vmatprep.subr.bf16.mxu0 %v5998_v46  ;;  %1252 = vmatprep.subr.bf16.mxu1 %v6000_v47  ;;  %v8292_v9 = vsub.s32 1, %v8289_v41  ;;  %v8295_v42 = vsub.s32 3, %v8289_v41  ;;  %v8298_v43 = vsub.s32 0, %v8289_v41  ;;  %v8301_v44 = vsub.s32 2, %v8289_v41 }
 0x761   :  { %1227 = vmatprep.mubr.bf16.mxu0 %v7717_v4  ;;  %1270 = vmatprep.mubr.bf16.mxu1 %v7717_v4  ;;  %v8317_v55 = vsub.s32 5, %v8289_v41  ;;  %v8320_v56 = vsub.s32 7, %v8289_v41 }
 0x762   :  { %v787_v48 = vrot.slane %v8306_v45, %v8292_v9  ;;  %v795_v49 = vrot.slane %v8306_v45, %v8295_v42  ;;  %v783_v50 = vrot.slane %v8306_v45, %v8298_v43  ;;  %v791_v11 = vrot.slane %v8306_v45, %v8301_v44 }
 0x763   :  { %1210 = vmatpush1.bf16.msra.mxu0 %v5997_v51  ;;  %1253 = vmatpush1.bf16.msra.mxu1 %v5999_v52 }
 0x764   :  { %1293 = vmatprep.subr.bf16.mxu0 %v6018_v53  ;;  %1336 = vmatprep.subr.bf16.mxu1 %v6020_v54 }
 0x766   :  { %6025 = vmatmul.mubr.msk.bf16.vlgmr.msra.gmra.mxu0 %vm85_vm0, %v8114_v30  ;;  %6026 = vmatmul.mubr.msk.bf16.vlgmr.msra.gmra.mxu1 %vm85_vm0, %v8114_v30 }
 0x767   :  { %1294 = vmatpush1.bf16.msra.mxu0 %v6017_v59  ;;  %1337 = vmatpush1.bf16.msra.mxu1 %v6019_v60 }
 0x768   :  { %1295 = vmatprep.subr.bf16.mxu0 %v6002_v61  ;;  %1338 = vmatprep.subr.bf16.mxu1 %v6004_v62 }
 0x769   :  { %1313 = vmatprep.mubr.bf16.mxu0 %v7717_v4  ;;  %1356 = vmatprep.mubr.bf16.mxu1 %v7717_v4 }
 0x76b   :  { %1296 = vmatpush1.bf16.msra.mxu0 %v6001_v63  ;;  %1339 = vmatpush1.bf16.msra.mxu1 %v6003_v0 }
 0x76c   :  { %6714 = vmatprep.subr.bf16.mxu0 %v7333_v1  ;;  %6736 = vmatprep.subr.bf16.mxu1 %v7334_v2 }
 0x76e   :  { %6027 = vmatmul.mubr.msk.bf16.vlgmr.msra.gmra.mxu0 %vm85_vm0, %v8114_v30  ;;  %6028 = vmatmul.mubr.msk.bf16.vlgmr.msra.gmra.mxu1 %vm85_vm0, %v8114_v30  ;;  %v7357_v30 = vld [vmem:[%s9592_s13 + $0x48] sm:$0xff]  }
 0x76f   :  { %6715 = vmatpush3.bf16.msra.mxu0 %v7335_v3  ;;  %6737 = vmatpush3.bf16.msra.mxu1 %v7336_v5 }
 0x770   :  { %6716 = vmatprep.subr.bf16.mxu0 %v7337_v6  ;;  %6738 = vmatprep.subr.bf16.mxu1 %v7338_v7 }
 0x773   :  { %6717 = vmatpush3.bf16.msra.mxu0 %v7339_v8  ;;  %6739 = vmatpush3.bf16.msra.mxu1 %v7340_v10  ;;  %v803_v8 = vrot.slane %v8306_v45, %v8317_v55  ;;  %v811_v10 = vrot.slane %v8306_v45, %v8320_v56 }
 0x774   :  { %6718 = vmatprep.subr.bf16.mxu0 %v7341_v12  ;;  %6740 = vmatprep.subr.bf16.mxu1 %v7342_v13 }
 0x777   :  { %6719 = vmatpush3.bf16.msra.mxu0 %v7343_v14  ;;  %6741 = vmatpush3.bf16.msra.mxu1 %v7344_v15 }
 0x778   :  { %6720 = vmatprep.subr.bf16.mxu0 %v7345_v16  ;;  %6742 = vmatprep.subr.bf16.mxu1 %v7346_v17 }
 0x77b   :  { %6721 = vmatpush3.bf16.msra.mxu0 %v7347_v18  ;;  %6743 = vmatpush3.bf16.msra.mxu1 %v7348_v19 }
 0x77c   :  { %6722 = vmatprep.subr.bf16.mxu0 %v7349_v20  ;;  %6744 = vmatprep.subr.bf16.mxu1 %v7350_v21 }
 0x77f   :  { %6723 = vmatpush3.bf16.msra.mxu0 %v7351_v22  ;;  %6745 = vmatpush3.bf16.msra.mxu1 %v7352_v23  ;;  %v7367_v22 = vld [vmem:[%s9592_s13 + $0x138] sm:$0xff]  }
 0x780   :  { %6724 = vmatprep.subr.bf16.mxu0 %v7353_v24  ;;  %6746 = vmatprep.subr.bf16.mxu1 %v7354_v25  ;;  %v7368_v23 = vld [vmem:[%s9592_s13 + $0x1b8] sm:$0xff]  }
 0x783   :  { %6725 = vmatpush3.bf16.msra.mxu0 %v7355_v26  ;;  %6747 = vmatpush3.bf16.msra.mxu1 %v7356_v27 }
 0x784   :  { %6726 = vmatprep.subr.bf16.mxu0 %v7357_v30  ;;  %6748 = vmatprep.subr.bf16.mxu1 %v7358_v31  ;;  %v7369_v30 = vld [vmem:[%s9592_s13 + $0x170] sm:$0xff]  }
 0x785   :  { %v7370_v31 = vld [vmem:[%s9592_s13 + $0x1f0] sm:$0xff]  }
 0x787   :  { %6727 = vmatpush3.bf16.msra.mxu0 %v7359_v32  ;;  %6749 = vmatpush3.bf16.msra.mxu1 %v7360_v33 }
 0x788   :  { %6728 = vmatprep.subr.bf16.mxu0 %v7361_v34  ;;  %6750 = vmatprep.subr.bf16.mxu1 %v7362_v35 }
 0x78b   :  { %6729 = vmatpush3.bf16.msra.mxu0 %v7363_v36  ;;  %6751 = vmatpush3.bf16.msra.mxu1 %v7364_v37 }
 0x78c   :  { %6758 = vmatprep.subr.bf16.mxu0 %v7365_v38  ;;  %6780 = vmatprep.subr.bf16.mxu1 %v7366_v39  ;;  %v7371_v38 = vld [vmem:[%s9592_s13 + $0x130] sm:$0xff]  }
 0x78d   :  { %v7372_v39 = vld [vmem:[%s9592_s13 + $0x1b0] sm:$0xff]  }
 0x816   :  { %v1057_v46 = vpop.f32.mrf.mxu0  ;;  %v1100_v47 = vpop.f32.mrf.mxu1 }
 0x817   :  { %v1058_v61 = vadd.f32 %v1057_v46, %v783_v50  ;;  %v1101_v62 = vadd.f32 %v1100_v47, %v791_v11  ;;  %v7373_v46 = vld [vmem:[%s9592_s13 + $0x168] sm:$0xff]  }
 0x818   :  { %v1059_v51 = vpop.f32.mrf.mxu0  ;;  %v1102_v52 = vpop.f32.mrf.mxu1 }
 0x819   :  { %v1060_v57 = vadd.f32 %v1059_v51, %v787_v48  ;;  %v1103_v58 = vadd.f32 %v1102_v52, %v795_v49  ;;  %v1367_v16 = vmax.f32 %v1058_v61, 0.0  ;;  %v1369_v17 = vmax.f32 %v1101_v62, 0.0  ;;  %v7380_v62 = vld [vmem:[%s9592_s13 + $0x1a0] sm:$0xff]  }
 0x81a   :  { %v1061_v53 = vpop.f32.mrf.mxu0  ;;  %v1104_v54 = vpop.f32.mrf.mxu1 }
 0x81b   :  { %v1062_v59 = vadd.f32 %v1061_v53, %v783_v50  ;;  %v1105_v60 = vadd.f32 %v1104_v54, %v791_v11  ;;  %v1368_v12 = vmax.f32 %v1060_v57, 0.0  ;;  %v1370_v13 = vmax.f32 %v1103_v58, 0.0  ;;  %v7374_v11 = vld [vmem:[%s9592_s13 + $0x1e8] sm:$0xff]   ;;  %v7377_v57 = vld [vmem:[%s9592_s13 + $0x160] sm:$0xff]  }
 0x81c   :  { %v1063_v63 = vpop.f32.mrf.mxu0  ;;  %v1106_v0 = vpop.f32.mrf.mxu1  ;;  %v7375_v53 = vld [vmem:[%s9592_s13 + $0x128] sm:$0xff]   ;;  %v7378_v58 = vld [vmem:[%s9592_s13 + $0x1e0] sm:$0xff]  }
 0x81d   :  { %v1064_v1 = vadd.f32 %v1063_v63, %v787_v48  ;;  %v1107_v2 = vadd.f32 %v1106_v0, %v795_v49  ;;  %v1383_v3 = vmax.f32 %v1062_v59, 0.0  ;;  %v1385_v5 = vmax.f32 %v1105_v60, 0.0  ;;  %v7376_v54 = vld [vmem:[%s9592_s13 + $0x1a8] sm:$0xff]   ;;  %v7379_v60 = vld [vmem:[%s9592_s13 + $0x120] sm:$0xff]   ;;  %v7381_v63 = vld [vmem:[%s9592_s13 + $0x158] sm:$0xff]  }
 0x81e   :  { %v8322_v6 = vpop.f32.mrf.mxu0  ;;  %v8324_v7 = vpop.f32.mrf.mxu1  ;;  %v7382_v0 = vld [vmem:[%s9592_s13 + $0x1d8] sm:$0xff]  }
 0x81f   :  { %v1384_v14 = vmax.f32 %v1064_v1, 0.0  ;;  %v1386_v15 = vmax.f32 %v1107_v2, 0.0  ;;  %v1399_v24 = vpack.c.bf16 %v1383_v3, %v1367_v16  ;;  %v1401_v25 = vpack.c.bf16 %v1385_v5, %v1369_v17  ;;  %v7383_v2 = vld [vmem:[%s9592_s13 + $0x118] sm:$0xff]   ;;  %v7388_v17 = vld [vmem:[%s9592_s13 + $0x190] sm:$0xff]  }
 0x820   :  { %v1145_v18 = vpop.f32.mrf.mxu0  ;;  %v1188_v19 = vpop.f32.mrf.mxu1  ;;  %v7384_v5 = vld [vmem:[%s9592_s13 + $0x198] sm:$0xff]  }
 0x821   :  { %v1400_v20 = vpack.c.bf16 %v1384_v14, %v1368_v12  ;;  %v1402_v21 = vpack.c.bf16 %v1386_v15, %v1370_v13  ;;  %v1146_v32 = vadd.f32 %v1145_v18, %v803_v8  ;;  %v1189_v33 = vadd.f32 %v1188_v19, %v811_v10  ;;  %v7387_v15 = vld [vmem:[%s9592_s13 + $0x110] sm:$0xff]   ;;  %v7389_v18 = vld [vmem:[%s9592_s13 + $0x148] sm:$0xff]  }
 0x822   :  { %v8336_v26 = vpop.f32.mrf.mxu0  ;;  %v8338_v27 = vpop.f32.mrf.mxu1  ;;  %v8399_v12 = vsub.s32 4, %v8289_v41  ;;  %v8402_v13 = vsub.s32 6, %v8289_v41  ;;  %v7390_v19 = vld [vmem:[%s9592_s13 + $0x1c8] sm:$0xff]  }
 0x823   :  { %2476 = vmatprep.mubr.bf16.mxu0 %v1400_v20  ;;  %2517 = vmatprep.mubr.bf16.mxu1 %v1402_v21  ;;  %v1372_v47 = vmax.f32 %v1146_v32, 0.0  ;;  %v1374_v48 = vmax.f32 %v1189_v33, 0.0  ;;  %v7393_v32 = vld [vmem:[%s9592_s13 + $0x140] sm:$0xff]  }
 0x824   :  { %v1149_v34 = vpop.f32.mrf.mxu0  ;;  %v1192_v35 = vpop.f32.mrf.mxu1  ;;  %2477 = vmatmul.mubr.bf16.vlgmr.msra.gmra.mxu0 %v1399_v24  ;;  %2518 = vmatmul.mubr.bf16.vlgmr.msra.gmra.mxu1 %v1401_v25  ;;  %v799_v20 = vrot.slane %v8306_v45, %v8399_v12  ;;  %v807_v21 = vrot.slane %v8306_v45, %v8402_v13  ;;  %v7391_v24 = vld [vmem:[%s9592_s13 + $0x108] sm:$0xff]  }
 0x825   :  { %v1150_v36 = vadd.f32 %v1149_v34, %v803_v8  ;;  %v1193_v37 = vadd.f32 %v1192_v35, %v811_v10  ;;  %6759 = vmatpush3.bf16.msra.mxu0 %v7367_v22  ;;  %6781 = vmatpush3.bf16.msra.mxu1 %v7368_v23  ;;  %v7385_v8 = vld [vmem:[%s9592_s13 + $0x150] sm:$0xff]   ;;  %v7392_v45 = vld [vmem:[%s9592_s13 + $0x188] sm:$0xff]  }
 0x826   :  { %6760 = vmatprep.subr.bf16.mxu0 %v7369_v30  ;;  %6782 = vmatprep.subr.bf16.mxu1 %v7370_v31  ;;  %v8370_v59 = vpop.f32.mrf.mxu0  ;;  %v8375_v61 = vpop.f32.mrf.mxu1  ;;  %v7386_v10 = vld [vmem:[%s9592_s13 + $0x1d0] sm:$0xff]   ;;  %v1148_v25 = vadd.f32 %v8336_v26, %v799_v20  ;;  %v1191_v33 = vadd.f32 %v8338_v27, %v807_v21  ;;  %v7394_v26 = vld [vmem:[%s9592_s13 + $0x1c0] sm:$0xff]   ;;  %v1144_v35 = vadd.f32 %v8322_v6, %v799_v20  ;;  %v7397_v6 = vld [vmem:[%s9592_s13 + $0x278] sm:$0xff]  }
 0x827   :  { %v1388_v49 = vmax.f32 %v1150_v36, 0.0  ;;  %v1390_v50 = vmax.f32 %v1193_v37, 0.0  ;;  %v8427_v22 = vld [vmem:[%s9591_s12 + $0x10] ss:$2 sm:$0xff]  ;;  %v1187_v37 = vadd.f32 %v8324_v7, %v807_v21  ;;  %v7411_v21 = vld [vmem:[%s9592_s13 + $0x220] sm:$0xff]  }
 0x828   :  { %v1231_v1 = vpop.f32.mrf.mxu0  ;;  %v1274_v3 = vpop.f32.mrf.mxu1  ;;  %v819_v30 = vrot.slane %v8427_v22, %v8292_v9  ;;  %v827_v34 = vrot.slane %v8427_v22, %v8295_v42  ;;  %v1387_v27 = vmax.f32 %v1148_v25, 0.0  ;;  %v7413_v25 = vld [vmem:[%s9592_s13 + $0x258] sm:$0xff]  }
 0x829   :  { %v1404_v51 = vpack.c.bf16 %v1388_v49, %v1372_v47  ;;  %v1406_v52 = vpack.c.bf16 %v1390_v50, %v1374_v48  ;;  %6761 = vmatpush3.bf16.msra.mxu0 %v7371_v38  ;;  %6783 = vmatpush3.bf16.msra.mxu1 %v7372_v39  ;;  %v7395_v39 = vld [vmem:[%s9592_s13 + $0x100] sm:$0xff]   ;;  %v1389_v48 = vmax.f32 %v1191_v33, 0.0  ;;  %v7398_v49 = vld [vmem:[%s9592_s13 + $0x2f8] sm:$0xff]   ;;  %v1371_v50 = vmax.f32 %v1144_v35, 0.0 }
 0x82a   :  { %6762 = vmatprep.subr.bf16.mxu0 %v7373_v46  ;;  %6784 = vmatprep.subr.bf16.mxu1 %v7374_v11  ;;  %v8404_v14 = vpop.f32.mrf.mxu0  ;;  %v8409_v16 = vpop.f32.mrf.mxu1  ;;  %v1232_v46 = vadd.f32 %v1231_v1, %v819_v30  ;;  %v7396_v47 = vld [vmem:[%s9592_s13 + $0x180] sm:$0xff]   ;;  %v1275_v7 = vadd.f32 %v1274_v3, %v827_v34  ;;  %v7402_v1 = vld [vmem:[%s9592_s13 + $0x2f0] sm:$0xff]   ;;  %v7416_v33 = vld [vmem:[%s9592_s13 + $0x298] sm:$0xff]  }
 0x82b   :  { %2558 = vmatprep.mubr.bf16.mxu0 %v1404_v51  ;;  %2599 = vmatprep.mubr.bf16.mxu1 %v1406_v52  ;;  %v1373_v51 = vmax.f32 %v1187_v37, 0.0  ;;  %v7403_v3 = vld [vmem:[%s9592_s13 + $0x230] sm:$0xff]  }
 0x82c   :  { %v1235_v23 = vpop.f32.mrf.mxu0  ;;  %v1278_v31 = vpop.f32.mrf.mxu1 }
 0x82d   :  { %6763 = vmatpush3.bf16.msra.mxu0 %v7375_v53  ;;  %6785 = vmatpush3.bf16.msra.mxu1 %v7376_v54  ;;  %v1236_v36 = vadd.f32 %v1235_v23, %v819_v30  ;;  %v1279_v38 = vadd.f32 %v1278_v31, %v827_v34  ;;  %v7399_v53 = vld [vmem:[%s9592_s13 + $0x238] sm:$0xff]   ;;  %v1403_v54 = vpack.c.bf16 %v1387_v27, %v1371_v50  ;;  %v7417_v34 = vld [vmem:[%s9592_s13 + $0x250] sm:$0xff]   ;;  %v7422_v27 = vld [vmem:[%s9592_s13 + $0x2c8] sm:$0xff]  }
 0x82e   :  { %6764 = vmatprep.subr.bf16.mxu0 %v7377_v57  ;;  %6786 = vmatprep.subr.bf16.mxu1 %v7378_v58  ;;  %v1376_v57 = vmax.f32 %v1232_v46, 0.0  ;;  %v7400_v58 = vld [vmem:[%s9592_s13 + $0x2b8] sm:$0xff]   ;;  %v8497_v20 = vpop.f32.mrf.mxu0  ;;  %v8502_v23 = vpop.f32.mrf.mxu1  ;;  %v815_v46 = vrot.slane %v8427_v22, %v8298_v43 }
 0x82f   :  { %v1392_v11 = vmax.f32 %v1236_v36, 0.0  ;;  %v1394_v52 = vmax.f32 %v1279_v38, 0.0  ;;  %v7414_v30 = vld [vmem:[%s9592_s13 + $0x2d8] sm:$0xff]   ;;  %v7419_v36 = vld [vmem:[%s9592_s13 + $0x210] sm:$0xff]  }
 0x830   :  { %v1317_v31 = vpop.f32.mrf.mxu0  ;;  %v7420_v38 = vld [vmem:[%s9592_s13 + $0x290] sm:$0xff]  }
 0x831   :  { %6765 = vmatpush3.bf16.msra.mxu0 %v7379_v60  ;;  %6787 = vmatpush3.bf16.msra.mxu1 %v7380_v62  ;;  %v1405_v60 = vpack.c.bf16 %v1389_v48, %v1373_v51  ;;  %v1378_v62 = vmax.f32 %v1275_v7, 0.0  ;;  %v7423_v48 = vld [vmem:[%s9592_s13 + $0x208] sm:$0xff]   ;;  %v1234_v7 = vadd.f32 %v8404_v14, %v815_v46  ;;  %v7425_v51 = vld [vmem:[%s9592_s13 + $0x240] sm:$0xff]  }
 0x832   :  { %6766 = vmatprep.subr.bf16.mxu0 %v7381_v63  ;;  %6788 = vmatprep.subr.bf16.mxu1 %v7382_v0  ;;  %v7401_v63 = vld [vmem:[%s9592_s13 + $0x270] sm:$0xff]   ;;  %v1408_v0 = vpack.c.bf16 %v1392_v11, %v1376_v57  ;;  %v8525_v35 = vpop.f32.mrf.mxu0  ;;  %v7424_v11 = vld [vmem:[%s9592_s13 + $0x288] sm:$0xff]   ;;  %v7426_v14 = vld [vmem:[%s9592_s13 + $0x2c0] sm:$0xff]  }
 0x835   :  { %6767 = vmatpush3.bf16.msra.mxu0 %v7383_v2  ;;  %6789 = vmatpush3.bf16.msra.mxu1 %v7384_v5  ;;  %v1410_v2 = vpack.c.bf16 %v1394_v52, %v1378_v62  ;;  %v7404_v5 = vld [vmem:[%s9592_s13 + $0x2b0] sm:$0xff]   ;;  %v7427_v62 = vld [vmem:[%s9592_s13 + $0x200] sm:$0xff]  }
 0x836   :  { %6768 = vmatprep.subr.bf16.mxu0 %v7385_v8  ;;  %6790 = vmatprep.subr.bf16.mxu1 %v7386_v10  ;;  %v7405_v8 = vld [vmem:[%s9592_s13 + $0x268] sm:$0xff]  }
 0x837   :  { %v7406_v10 = vld [vmem:[%s9592_s13 + $0x2e8] sm:$0xff]  }
 0x839   :  { %6769 = vmatpush3.bf16.msra.mxu0 %v7387_v15  ;;  %6791 = vmatpush3.bf16.msra.mxu1 %v7388_v17  ;;  %v7407_v15 = vld [vmem:[%s9592_s13 + $0x228] sm:$0xff]  }
 0x83a   :  { %6770 = vmatprep.subr.bf16.mxu0 %v7389_v18  ;;  %6792 = vmatprep.subr.bf16.mxu1 %v7390_v19  ;;  %v7408_v17 = vld [vmem:[%s9592_s13 + $0x2a8] sm:$0xff]   ;;  %v7409_v18 = vld [vmem:[%s9592_s13 + $0x260] sm:$0xff]  }
 0x83b   :  { %v7410_v19 = vld [vmem:[%s9592_s13 + $0x2e0] sm:$0xff]  }
 0x83d   :  { %6771 = vmatpush3.bf16.msra.mxu0 %v7391_v24  ;;  %6793 = vmatpush3.bf16.msra.mxu1 %v7392_v45  ;;  %v7412_v24 = vld [vmem:[%s9592_s13 + $0x2a0] sm:$0xff]   ;;  %v7415_v45 = vld [vmem:[%s9592_s13 + $0x218] sm:$0xff]  }
 0x83e   :  { %6772 = vmatprep.subr.bf16.mxu0 %v7393_v32  ;;  %6794 = vmatprep.subr.bf16.mxu1 %v7394_v26  ;;  %v1360_v32 = vpop.f32.mrf.mxu1  ;;  %v7418_v26 = vld [vmem:[%s9592_s13 + $0x2d0] sm:$0xff]  }
 0x840   :  { %v8530_v37 = vpop.f32.mrf.mxu1 }
 0x841   :  { %6773 = vmatpush3.bf16.msra.mxu0 %v7395_v39  ;;  %6795 = vmatpush3.bf16.msra.mxu1 %v7396_v47  ;;  %v7421_v39 = vld [vmem:[%s9592_s13 + $0x248] sm:$0xff]   ;;  %v823_v47 = vrot.slane %v8427_v22, %v8301_v44 }
 0x842   :  { %6802 = vmatprep.subr.bf16.mxu0 %v7397_v6  ;;  %6824 = vmatprep.subr.bf16.mxu1 %v7398_v49  ;;  %v1321_v6 = vpop.f32.mrf.mxu0  ;;  %v835_v49 = vrot.slane %v8427_v22, %v8317_v55  ;;  %v1364_v50 = vpop.f32.mrf.mxu1 }
 0x843   :  { %v1277_v52 = vadd.f32 %v8409_v16, %v823_v47  ;;  %v1391_v16 = vmax.f32 %v1234_v7, 0.0  ;;  %v7447_v7 = vld [vmem:[%s9592_s13 + $0x318] sm:$0xff]  }
 0x844   :  { %2559 = vmatmul.mubr.bf16.vlgmr.msra.gmra.mxu0 %v1403_v54  ;;  %2600 = vmatmul.mubr.bf16.vlgmr.msra.gmra.mxu1 %v1405_v60  ;;  %v1230_v54 = vadd.f32 %v8370_v59, %v815_v46  ;;  %v1322_v57 = vadd.f32 %v1321_v6, %v835_v49  ;;  %v7429_v59 = vld [vmem:[%s9592_s13 + $0x378] sm:$0xff]   ;;  %v7443_v46 = vld [vmem:[%s9592_s13 + $0x320] sm:$0xff]  }
 0x845   :  { %6803 = vmatpush3.bf16.msra.mxu0 %v7399_v53  ;;  %2640 = vmatprep.mubr.bf16.mxu0 %v1408_v0  ;;  %v843_v53 = vrot.slane %v8427_v22, %v8320_v56  ;;  %v7428_v0 = vld [vmem:[%s9592_s13 + $0x280] sm:$0xff]   ;;  %v7445_v6 = vld [vmem:[%s9592_s13 + $0x358] sm:$0xff]  }
 0x846   :  { %6825 = vmatpush3.bf16.msra.mxu1 %v7400_v58  ;;  %2681 = vmatprep.mubr.bf16.mxu1 %v1410_v2  ;;  %v1273_v58 = vadd.f32 %v8375_v61, %v823_v47  ;;  %v7430_v2 = vld [vmem:[%s9592_s13 + $0x3f8] sm:$0xff]   ;;  %v7444_v47 = vld [vmem:[%s9592_s13 + $0x3a0] sm:$0xff]  }
 0x847   :  { %6804 = vmatprep.subr.bf16.mxu0 %v7401_v63  ;;  %6826 = vmatprep.subr.bf16.mxu1 %v7402_v1  ;;  %v1365_v60 = vadd.f32 %v1364_v50, %v843_v53  ;;  %v1318_v63 = vadd.f32 %v1317_v31, %v835_v49  ;;  %v1393_v1 = vmax.f32 %v1277_v52, 0.0  ;;  %v1361_v61 = vadd.f32 %v1360_v32, %v843_v53  ;;  %v7434_v31 = vld [vmem:[%s9592_s13 + $0x3f0] sm:$0xff]   ;;  %v7448_v49 = vld [vmem:[%s9592_s13 + $0x398] sm:$0xff]   ;;  %v7453_v53 = vld [vmem:[%s9592_s13 + $0x348] sm:$0xff]  }
 0x848   :  { %v7435_v32 = vld [vmem:[%s9592_s13 + $0x330] sm:$0xff]  }
 0x849   :  { %6805 = vmatpush3.bf16.msra.mxu0 %v7403_v3  ;;  %v1375_v3 = vmax.f32 %v1230_v54, 0.0  ;;  %v7449_v50 = vld [vmem:[%s9592_s13 + $0x350] sm:$0xff]   ;;  %v831_v54 = vrot.slane %v8427_v22, %v8399_v12 }
 0x84a   :  { %6827 = vmatpush3.bf16.msra.mxu1 %v7404_v5  ;;  %6806 = vmatprep.subr.bf16.mxu0 %v7405_v8  ;;  %v1396_v5 = vmax.f32 %v1322_v57, 0.0  ;;  %v1377_v8 = vmax.f32 %v1273_v58, 0.0  ;;  %v7452_v52 = vld [vmem:[%s9592_s13 + $0x390] sm:$0xff]   ;;  %v839_v57 = vrot.slane %v8427_v22, %v8402_v13  ;;  %v7455_v58 = vld [vmem:[%s9592_s13 + $0x308] sm:$0xff]   ;;  %v7458_v22 = vld [vmem:[%s9592_s13 + $0x3c0] sm:$0xff]  }
 0x84b   :  { %6828 = vmatprep.subr.bf16.mxu1 %v7406_v10  ;;  %v1398_v10 = vmax.f32 %v1365_v60, 0.0  ;;  %v1320_v60 = vadd.f32 %v8525_v35, %v831_v54 }
 0x84c   :  { %v1359_v35 = vadd.f32 %v8502_v23, %v839_v57 }
 0x84d   :  { %6807 = vmatpush3.bf16.msra.mxu0 %v7407_v15  ;;  %v7431_v15 = vld [vmem:[%s9592_s13 + $0x338] sm:$0xff]  }
 0x84e   :  { %6829 = vmatpush3.bf16.msra.mxu1 %v7408_v17  ;;  %6808 = vmatprep.subr.bf16.mxu0 %v7409_v18  ;;  %v1407_v17 = vpack.c.bf16 %v1391_v16, %v1375_v3  ;;  %v1380_v18 = vmax.f32 %v1318_v63, 0.0  ;;  %v7457_v16 = vld [vmem:[%s9592_s13 + $0x340] sm:$0xff]   ;;  %v1363_v63 = vadd.f32 %v8530_v37, %v839_v57  ;;  %v1381_v3 = vmax.f32 %v1359_v35, 0.0 }
 0x84f   :  { %6830 = vmatprep.subr.bf16.mxu1 %v7410_v19  ;;  %v7432_v19 = vld [vmem:[%s9592_s13 + $0x3b8] sm:$0xff]   ;;  %v7460_v37 = vld [vmem:[%s9592_s13 + $0x380] sm:$0xff]  }
 0x851   :  { %6809 = vmatpush3.bf16.msra.mxu0 %v7411_v21  ;;  %v1409_v21 = vpack.c.bf16 %v1393_v1, %v1377_v8  ;;  %v1395_v1 = vmax.f32 %v1320_v60, 0.0 }
 0x852   :  { %6831 = vmatpush3.bf16.msra.mxu1 %v7412_v24  ;;  %6810 = vmatprep.subr.bf16.mxu0 %v7413_v25  ;;  %v1382_v24 = vmax.f32 %v1361_v61, 0.0  ;;  %v7433_v25 = vld [vmem:[%s9592_s13 + $0x370] sm:$0xff]   ;;  %v1397_v61 = vmax.f32 %v1363_v63, 0.0 }
 0x853   :  { %6832 = vmatprep.subr.bf16.mxu1 %v7414_v30  ;;  %v1412_v30 = vpack.c.bf16 %v1396_v5, %v1380_v18 }
 0x854   :  { %v1413_v23 = vpack.c.bf16 %v1397_v61, %v1381_v3 }
 0x855   :  { %6811 = vmatpush3.bf16.msra.mxu0 %v7415_v45  ;;  %v1414_v45 = vpack.c.bf16 %v1398_v10, %v1382_v24 }
 0x856   :  { %6833 = vmatpush3.bf16.msra.mxu1 %v7416_v33  ;;  %6812 = vmatprep.subr.bf16.mxu0 %v7417_v34  ;;  %v7436_v33 = vld [vmem:[%s9592_s13 + $0x3b0] sm:$0xff]   ;;  %v7437_v34 = vld [vmem:[%s9592_s13 + $0x368] sm:$0xff]  }
 0x857   :  { %6834 = vmatprep.subr.bf16.mxu1 %v7418_v26  ;;  %v7438_v26 = vld [vmem:[%s9592_s13 + $0x3e8] sm:$0xff]  }
 0x859   :  { %6813 = vmatpush3.bf16.msra.mxu0 %v7419_v36  ;;  %v7439_v36 = vld [vmem:[%s9592_s13 + $0x328] sm:$0xff]  }
 0x85a   :  { %6835 = vmatpush3.bf16.msra.mxu1 %v7420_v38  ;;  %6814 = vmatprep.subr.bf16.mxu0 %v7421_v39  ;;  %v7440_v38 = vld [vmem:[%s9592_s13 + $0x3a8] sm:$0xff]   ;;  %v7441_v39 = vld [vmem:[%s9592_s13 + $0x360] sm:$0xff]  }
 0x85b   :  { %6836 = vmatprep.subr.bf16.mxu1 %v7422_v27  ;;  %v7442_v27 = vld [vmem:[%s9592_s13 + $0x3e0] sm:$0xff]  }
 0x85d   :  { %6815 = vmatpush3.bf16.msra.mxu0 %v7423_v48  ;;  %v7446_v48 = vld [vmem:[%s9592_s13 + $0x3d8] sm:$0xff]  }
 0x85e   :  { %6837 = vmatpush3.bf16.msra.mxu1 %v7424_v11  ;;  %6816 = vmatprep.subr.bf16.mxu0 %v7425_v51  ;;  %v7450_v11 = vld [vmem:[%s9592_s13 + $0x3d0] sm:$0xff]  }
 0x85f   :  { %6838 = vmatprep.subr.bf16.mxu1 %v7426_v14  ;;  %v7451_v51 = vld [vmem:[%s9592_s13 + $0x310] sm:$0xff]   ;;  %v7454_v14 = vld [vmem:[%s9592_s13 + $0x3c8] sm:$0xff]  }
 0x861   :  { %6817 = vmatpush3.bf16.msra.mxu0 %v7427_v62  ;;  %v7456_v62 = vld [vmem:[%s9592_s13 + $0x388] sm:$0xff]  }
 0x862   :  { %6839 = vmatpush3.bf16.msra.mxu1 %v7428_v0  ;;  %6846 = vmatprep.subr.bf16.mxu0 %v7429_v59  ;;  %v1316_v0 = vadd.f32 %v8497_v20, %v831_v54  ;;  %v7459_v59 = vld [vmem:[%s9592_s13 + $0x300] sm:$0xff]  }
 0x863   :  { %6868 = vmatprep.subr.bf16.mxu1 %v7430_v2 }
 0x864   :  { %2641 = vmatmul.mubr.bf16.vlgmr.msra.gmra.mxu0 %v1407_v17  ;;  %v1379_v2 = vmax.f32 %v1316_v0, 0.0 }
 0x865   :  { %2682 = vmatmul.mubr.bf16.vlgmr.msra.gmra.mxu1 %v1409_v21  ;;  %6847 = vmatpush3.bf16.msra.mxu0 %v7431_v15 }
 0x866   :  { %2722 = vmatprep.mubr.bf16.mxu0 %v1412_v30  ;;  %6869 = vmatpush3.bf16.msra.mxu1 %v7432_v19  ;;  %v1411_v20 = vpack.c.bf16 %v1395_v1, %v1379_v2 }
 0x867   :  { %2763 = vmatprep.mubr.bf16.mxu1 %v1414_v45  ;;  %6848 = vmatprep.subr.bf16.mxu0 %v7433_v25 }
 0x868   :  { %6870 = vmatprep.subr.bf16.mxu1 %v7434_v31 }
 0x869   :  { %6849 = vmatpush3.bf16.msra.mxu0 %v7435_v32 }
 0x86a   :  { %6871 = vmatpush3.bf16.msra.mxu1 %v7436_v33  ;;  %6850 = vmatprep.subr.bf16.mxu0 %v7437_v34 }
 0x86b   :  { %6872 = vmatprep.subr.bf16.mxu1 %v7438_v26  ;;  %v6029_v26 = vld [vmem:[%s9593_s14] ss:$0 sm:$0xff] }
 0x86d   :  { %6851 = vmatpush3.bf16.msra.mxu0 %v7439_v36 }
 0x86e   :  { %6873 = vmatpush3.bf16.msra.mxu1 %v7440_v38  ;;  %6852 = vmatprep.subr.bf16.mxu0 %v7441_v39 }
 0x86f   :  { %6874 = vmatprep.subr.bf16.mxu1 %v7442_v27 }
 0x871   :  { %6853 = vmatpush3.bf16.msra.mxu0 %v7443_v46 }
 0x872   :  { %6875 = vmatpush3.bf16.msra.mxu1 %v7444_v47  ;;  %6854 = vmatprep.subr.bf16.mxu0 %v7445_v6 }
 0x873   :  { %6876 = vmatprep.subr.bf16.mxu1 %v7446_v48 }
 0x875   :  { %6855 = vmatpush3.bf16.msra.mxu0 %v7447_v7 }
 0x876   :  { %6877 = vmatpush3.bf16.msra.mxu1 %v7448_v49  ;;  %6856 = vmatprep.subr.bf16.mxu0 %v7449_v50 }
 0x877   :  { %6878 = vmatprep.subr.bf16.mxu1 %v7450_v11 }
 0x879   :  { %6857 = vmatpush3.bf16.msra.mxu0 %v7451_v51 }
 0x87a   :  { %6879 = vmatpush3.bf16.msra.mxu1 %v7452_v52  ;;  %6858 = vmatprep.subr.bf16.mxu0 %v7453_v53 }
 0x87b   :  { %6880 = vmatprep.subr.bf16.mxu1 %v7454_v14 }
 0x87d   :  { %6859 = vmatpush3.bf16.msra.mxu0 %v7455_v58 }
 0x87e   :  { %6881 = vmatpush3.bf16.msra.mxu1 %v7456_v62  ;;  %6860 = vmatprep.subr.bf16.mxu0 %v7457_v16 }
 0x87f   :  { %6882 = vmatprep.subr.bf16.mxu1 %v7458_v22 }
 0x881   :  { %6861 = vmatpush3.bf16.msra.mxu0 %v7459_v59 }
 0x882   :  { %6883 = vmatpush3.bf16.msra.mxu1 %v7460_v37 }
 0x884   :  { %2723 = vmatmul.mubr.bf16.vlgmr.msra.gmra.mxu0 %v1411_v20 }
 0x885   :  { %2764 = vmatmul.mubr.bf16.vlgmr.msra.gmra.mxu1 %v1413_v23 }
 0x8e4   :  { %v6730_v5 = vpop.f32.mrf.mxu0  ;;  %v6752_v8 = vpop.f32.mrf.mxu1 }
 0x8e6   :  { %v6731_v10 = vpop.f32.mrf.mxu0  ;;  %v6753_v15 = vpop.f32.mrf.mxu1 }
 0x8e7   :  { %v6732_v34 = vadd.f32 %v6731_v10, %v6730_v5  ;;  %v6754_v6 = vadd.f32 %v6753_v15, %v6752_v8 }
 0x8e8   :  { %v6733_v17 = vpop.f32.mrf.mxu0  ;;  %v6755_v18 = vpop.f32.mrf.mxu1 }
 0x8e9   :  { %v2479_v39 = vadd.f32 %v6732_v34, %v6029_v26 }
 0x8ea   :  { %v6734_v19 = vpop.f32.mrf.mxu0  ;;  %v6756_v24 = vpop.f32.mrf.mxu1 }
 0x8eb   :  { %v6735_v27 = vadd.f32 %v6734_v19, %v6733_v17  ;;  %v2520_v7 = vadd.f32 %v6754_v6, %v2479_v39  ;;  %v6757_v51 = vadd.f32 %v6756_v24, %v6755_v18 }
 0x8ed   :  { %v2482_v49 = vadd.f32 %v6735_v27, %v6029_v26 }
 0x8ef   :  { %v2523_v14 = vadd.f32 %v6757_v51, %v2482_v49  ;;  %v6160_v51 = vld [vmem:[%s9615_s1 + $0x20] sm:$0xff] }
 0x904   :  { %v6774_v21 = vpop.f32.mrf.mxu0  ;;  %v6796_v25 = vpop.f32.mrf.mxu1 }
 0x906   :  { %v6775_v30 = vpop.f32.mrf.mxu0  ;;  %v6797_v31 = vpop.f32.mrf.mxu1 }
 0x907   :  { %v6776_v48 = vadd.f32 %v6775_v30, %v6774_v21  ;;  %v6798_v54 = vadd.f32 %v6797_v31, %v6796_v25 }
 0x908   :  { %v6777_v45 = vpop.f32.mrf.mxu0  ;;  %v6799_v32 = vpop.f32.mrf.mxu1 }
 0x909   :  { %v2561_v52 = vadd.f32 %v6776_v48, %v2520_v7 }
 0x90a   :  { %v6778_v33 = vpop.f32.mrf.mxu0  ;;  %v6800_v38 = vpop.f32.mrf.mxu1 }
 0x90b   :  { %v6779_v53 = vadd.f32 %v6778_v33, %v6777_v45  ;;  %v2602_v62 = vadd.f32 %v6798_v54, %v2561_v52  ;;  %v6801_v63 = vadd.f32 %v6800_v38, %v6799_v32 }
 0x90d   :  { %v2564_v16 = vadd.f32 %v6779_v53, %v2523_v14 }
 0x90f   :  { %v2605_v1 = vadd.f32 %v6801_v63, %v2564_v16  ;;  %v6159_v63 = vld [vmem:[%s9589_s10] ss:$0 sm:$0xff] }
 0x924   :  { %v6818_v36 = vpop.f32.mrf.mxu0 }
 0x925   :  { %v6840_v46 = vpop.f32.mrf.mxu1 }
 0x926   :  { %v6819_v47 = vpop.f32.mrf.mxu0 }
 0x927   :  { %v6841_v50 = vpop.f32.mrf.mxu1  ;;  %v6820_v57 = vadd.f32 %v6819_v47, %v6818_v36 }
 0x928   :  { %v6821_v11 = vpop.f32.mrf.mxu0  ;;  %v6842_v37 = vadd.f32 %v6841_v50, %v6840_v46  ;;  %v6162_v50 = vld [vmem:[%s9615_s1 + $0x30] sm:$0xff] }
 0x929   :  { %v6843_v58 = vpop.f32.mrf.mxu1  ;;  %v2643_v22 = vadd.f32 %v6820_v57, %v2602_v62  ;;  %v6158_v62 = vld [vmem:[%s9588_s9] ss:$0 sm:$0xff] }
 0x92a   :  { %v6822_v60 = vpop.f32.mrf.mxu0 }
 0x92b   :  { %v6823_v0 = vadd.f32 %v6822_v60, %v6821_v11  ;;  %v6844_v35 = vpop.f32.mrf.mxu1  ;;  %v2684_v3 = vadd.f32 %v6842_v37, %v2643_v22  ;;  %v6161_v11 = vld [vmem:[%s9615_s1 + $0x28] sm:$0xff] }
 0x92c   :  { %v6845_v10 = vadd.f32 %v6844_v35, %v6843_v58 }
 0x92d   :  { %v2646_v20 = vadd.f32 %v6823_v0, %v2605_v1 }
 0x92f   :  { %v2687_v21 = vadd.f32 %v6845_v10, %v2646_v20 }
 0x944   :  { %v6862_v59 = vpop.f32.mrf.mxu0 }
 0x945   :  { %v6884_v61 = vpop.f32.mrf.mxu1 }
 0x946   :  { %v6863_v2 = vpop.f32.mrf.mxu0 }
 0x947   :  { %v6864_v23 = vadd.f32 %v6863_v2, %v6862_v59  ;;  %v6885_v5 = vpop.f32.mrf.mxu1 }
 0x948   :  { %v6865_v8 = vpop.f32.mrf.mxu0  ;;  %v6886_v17 = vadd.f32 %v6885_v5, %v6884_v61  ;;  %v6164_v61 = vld [vmem:[%s9583_s4 + $0x1] ss:$0 sm:$0xff] }
 0x949   :  { %v2725_v15 = vadd.f32 %v6864_v23, %v2684_v3  ;;  %v6887_v18 = vpop.f32.mrf.mxu1 }
 0x94a   :  { %v6866_v19 = vpop.f32.mrf.mxu0 }
 0x94b   :  { %v2766_v24 = vadd.f32 %v6886_v17, %v2725_v15  ;;  %v6867_v25 = vadd.f32 %v6866_v19, %v6865_v8  ;;  %v6888_v30 = vpop.f32.mrf.mxu1 }
 0x94c   :  { %v6889_v45 = vadd.f32 %v6888_v30, %v6887_v18 }
 0x94d   :  { %v2728_v31 = vadd.f32 %v6867_v25, %v2687_v21  ;;  %v2772_v32 = vadd.f32 %v2766_v24, %v8108_v28 }
 0x94f   :  { %v2769_v33 = vadd.f32 %v6889_v45, %v2728_v31  ;;  %v2776_v34 = vsel %vm85_vm0, %v2772_v32, 0.0 }
 0x950   :  { %2777 = vadd.xlane.f32.xlu1 %v2776_v34  ;;  %v7679_v34 = vld [vmem:[%s9617_s25 + $0x8] sm:$0xff] }
 0x951   :  { %v2773_v26 = vadd.f32 %v2769_v33, %v8110_v29  ;;  %v6163_v29 = vld [vmem:[%s9615_s1 + $0x38] sm:$0xff]  ;;  %s9618_s1 = smov 64  }
 0x952   :  { %7205 = vmatprep.subr.mxu0 %v6163_v29 }
 0x953   :  { %v2779_v36 = vsel %vm85_vm0, %v2773_v26, 0.0  ;;  %7206 = vmatpush3.msra.mxu0 %v6163_v29 }
 0x954   :  { %2780 = vadd.xlane.f32.xlu0 %v2779_v36  ;;  %7207 = vmatprep.subr.mxu0 %v6162_v50 }
 0x955   :  { %7208 = vmatpush3.msra.mxu0 %v6162_v50 }
 0x956   :  { %7209 = vmatprep.subr.mxu0 %v6161_v11 }
 0x957   :  { %7210 = vmatpush3.msra.mxu0 %v6161_v11 }
 0x958   :  { %7211 = vmatprep.subr.mxu0 %v6160_v51 }
 0x959   :  { %7212 = vmatpush3.msra.mxu0 %v6160_v51  ;;  %v7683_v51 = vld [vmem:[%s9617_s25 + $0x20] sm:$0xff] }
 0x9d9   :  { %v2778_v38 = vpop.xlane.xlu1 %2777 }
 0x9da   :  { %v2782_v39 = vmul.f32 0.03125, %v2778_v38  ;;  %v7680_v38 = vld [vmem:[%s9617_s25] sm:$0xff] }
 0x9dc   :  { %v2784_v27 = vsub.f32 %v2772_v32, %v2782_v39 }
 0x9dd   :  { %v2781_v46 = vpop.xlane.xlu0 %2780 }
 0x9de   :  { %v2783_v47 = vmul.f32 0.03125, %v2781_v46  ;;  %v2786_v6 = vmul.f32 %v2784_v27, %v2784_v27 }
 0x9e0   :  { %v2785_v48 = vsub.f32 %v2773_v26, %v2783_v47  ;;  %v2788_v7 = vsel %vm85_vm0, %v2786_v6, 0.0 }
 0x9e1   :  { %2789 = vadd.xlane.f32.xlu1 %v2788_v7 }
 0x9e2   :  { %v2787_v28 = vmul.f32 %v2785_v48, %v2785_v48 }
 0x9e4   :  { %v2791_v49 = vsel %vm85_vm0, %v2787_v28, 0.0 }
 0x9e5   :  { %2792 = vadd.xlane.f32.xlu0 %v2791_v49  ;;  %v7682_v49 = vld [vmem:[%s9617_s25 + $0x18] sm:$0xff] }
 0xa6a   :  { %v2790_v52 = vpop.xlane.xlu1 %2789 }
 0xa6b   :  { %v2794_v53 = vmul.f32 0.03125, %v2790_v52 }
 0xa6d   :  { %v2796_v14 = vadd.f32 1e-05, %v2794_v53  ;;  %v7684_v53 = vld [vmem:[%s9617_s25 + $0x28] sm:$0xff] }
 0xa6e   :  { %v2793_v54 = vpop.xlane.xlu0 %2792 }
 0xa6f   :  { %7625 = vrsqrt.f32 %v2796_v14  ;;  %v2795_v57 = vmul.f32 0.03125, %v2793_v54 }
 0xa71   :  { %v2797_v58 = vadd.f32 1e-05, %v2795_v57 }
 0xa73   :  { %7627 = vrsqrt.f32 %v2797_v58 }
 0xa7c   :  { %v7626_v60 = vpop.eup %7625 }
 0xa7d   :  { %v2800_v16 = vmul.f32 %v7626_v60, %v2784_v27  ;;  %v7685_v60 = vld [vmem:[%s9617_s25 + $0x38] sm:$0xff] }
 0xa7f   :  { %v2806_v22 = vmul.f32 %v6158_v62, %v2800_v16 }
 0xa80   :  { %v7628_v0 = vpop.eup %7627 }
 0xa81   :  { %v2801_v35 = vmul.f32 %v7628_v0, %v2785_v48  ;;  %v8702_v59 = vadd.f32 %v6159_v63, %v2806_v22  ;;  %v7681_v48 = vld [vmem:[%s9617_s25 + $0x10] sm:$0xff] }
 0xa82   :  { %v7686_v0 = vld [vmem:[%s9617_s25 + $0x30] sm:$0xff] }
 0xa83   :  { %v2807_v1 = vmul.f32 %v6158_v62, %v2801_v35  ;;  %7213 = vmatprep.mubr.msk.f32.mxu0 %vm85_vm0, %v8702_v59 }
 0xa85   :  { %v8706_v37 = vadd.f32 %v6159_v63, %v2807_v1 }
 0xa87   :  { %7214 = vmatmul.mubr.msk.f32.vlgmr.msra.gmra.mxu0 %vm85_vm0, %v8706_v37 }
 0xb47   :  { %v7215_v2 = vpop.f32.mrf.mxu0 }
 0xb48   :  { %v8713_v3 = vadd.f32 %v7215_v2, %v6164_v61 }
 0xb49   :  { %v2896_v20 = vpop.f32.mrf.mxu0 }
 0xb4a   :  { %v8715_v23 = vadd.f32 %v6164_v61, %v2896_v20  ;;  %2917 = vrot.lane.b32.xlu1 %v8713_v3, %s7710_s21 }
 0xb4c   :  { %2915 = vrot.lane.b32.xlu0 %v8715_v23, %s7710_s21  ;;  %7232 = vmatprep.mubr.msk.f32.mxu1 %vm197_vm1, %v8715_v23 }
 0xb4e   :  { %2913 = vrot.lane.b32.xlu1 %v8713_v3, %s7709_s20 }
 0xb50   :  { %2909 = vrot.lane.b32.xlu0 %v8713_v3, %s7711_s22 }
 0xb52   :  { %2911 = vrot.lane.b32.xlu1 %v8715_v23, %s7709_s20 }
 0xb56   :  { %2907 = vrot.lane.b32.xlu1 %v8715_v23, %s7711_s22 }
 0xbbc   :  { %v8731_v5 = vpop.permute.xlu1 %2917 }
 0xbbd   :  { %2933 = vrot.lane.b32.xlu0 %v8731_v5, %s7712_s2 }
 0xbbe   :  { %v8735_v8 = vpop.permute.xlu0 %2915 }
 0xbbf   :  { %2931 = vrot.lane.b32.xlu1 %v8735_v8, %s7712_s2 }
 0xbc0   :  { %v8739_v10 = vpop.permute.xlu1 %2913 }
 0xbc1   :  { %2929 = vrot.lane.b32.xlu0 %v8739_v10, %s7712_s2 }
 0xbc2   :  { %v8743_v15 = vpop.permute.xlu0 %2909 }
 0xbc4   :  { %v8745_v17 = vpop.permute.xlu1 %2911 }
 0xbc5   :  { %2927 = vrot.lane.b32.xlu1 %v8745_v17, %s7712_s2  ;;  %2925 = vrot.lane.b32.xlu0 %v8743_v15, %s7712_s2 }
 0xbc8   :  { %v8751_v18 = vpop.permute.xlu1 %2907 }
 0xbc9   :  { %2923 = vrot.lane.b32.xlu1 %v8751_v18, %s7712_s2  ;;  %2921 = vrot.lane.b32.xlu0 %v8713_v3, %s7712_s2 }
 0xbcd   :  { %2919 = vrot.lane.b32.xlu1 %v8715_v23, %s7712_s2 }
 0xc2f   :  { %v2934_v19 = vpop.permute.xlu0 %2933 }
 0xc30   :  { %7216 = vmatprep.subr.msk.mxu1 %vm197_vm1, %v2934_v19 }
 0xc31   :  { %v2932_v21 = vpop.permute.xlu1 %2931  ;;  %7217 = vmatpush3.xpose.msk.msra.mxu1 %vm197_vm1, %v2934_v19 }
 0xc32   :  { %7218 = vmatprep.subr.msk.mxu1 %vm197_vm1, %v2932_v21 }
 0xc33   :  { %v2930_v24 = vpop.permute.xlu0 %2929 }
 0xc35   :  { %7219 = vmatpush3.xpose.msk.msra.mxu1 %vm197_vm1, %v2932_v21 }
 0xc36   :  { %7220 = vmatprep.subr.msk.mxu1 %vm197_vm1, %v2930_v24 }
 0xc37   :  { %v2928_v25 = vpop.permute.xlu1 %2927  ;;  %v2926_v30 = vpop.permute.xlu0 %2925 }
 0xc39   :  { %7221 = vmatpush3.xpose.msk.msra.mxu1 %vm197_vm1, %v2930_v24 }
 0xc3a   :  { %7222 = vmatprep.subr.msk.mxu1 %vm197_vm1, %v2928_v25 }
 0xc3b   :  { %v2924_v31 = vpop.permute.xlu1 %2923  ;;  %v2922_v45 = vpop.permute.xlu0 %2921 }
 0xc3d   :  { %7223 = vmatpush3.xpose.msk.msra.mxu1 %vm197_vm1, %v2928_v25 }
 0xc3e   :  { %7224 = vmatprep.subr.msk.mxu1 %vm197_vm1, %v2926_v30 }
 0xc3f   :  { %v2920_v32 = vpop.permute.xlu1 %2919 }
 0xc41   :  { %7225 = vmatpush3.xpose.msk.msra.mxu1 %vm197_vm1, %v2926_v30 }
 0xc42   :  { %7226 = vmatprep.subr.msk.mxu1 %vm197_vm1, %v2924_v31 }
 0xc45   :  { %7227 = vmatpush3.xpose.msk.msra.mxu1 %vm197_vm1, %v2924_v31 }
 0xc46   :  { %7228 = vmatprep.subr.msk.mxu1 %vm197_vm1, %v2922_v45 }
 0xc49   :  { %7229 = vmatpush3.xpose.msk.msra.mxu1 %vm197_vm1, %v2922_v45 }
 0xc4a   :  { %7230 = vmatprep.subr.msk.mxu1 %vm197_vm1, %v2920_v32 }
 0xc4d   :  { %7231 = vmatpush3.xpose.msk.msra.mxu1 %vm197_vm1, %v2920_v32 }
 0xc50   :  { %7233 = vmatmul.mubr.msk.f32.vlgmr.msra.gmra.mxu1 %vm197_vm1, %v8713_v3 }
 0xc51   :  { %7235 = vmatprep.mubr.msk.f32.mxu1 %vm197_vm1, %v8751_v18 }
 0xc54   :  { %7236 = vmatmul.mubr.msk.f32.gmra.mxu1 %vm197_vm1, %v8743_v15 }
 0xc55   :  { %7238 = vmatprep.mubr.msk.f32.mxu1 %vm197_vm1, %v8745_v17 }
 0xc58   :  { %7239 = vmatmul.mubr.msk.f32.gmra.mxu1 %vm197_vm1, %v8739_v10 }
 0xc59   :  { %7241 = vmatprep.mubr.msk.f32.mxu1 %vm197_vm1, %v8735_v8 }
 0xc5c   :  { %7242 = vmatmul.mubr.msk.f32.gmra.mxu1 %vm197_vm1, %v8731_v5 }
 0xc5d   :  { %3834 = vmatprep.mubr.bf16.mxu1 %v7717_v4 }
 0xd10   :  { %v7234_v33 = vpop.f32.mrf.mxu1 }
 0xd11   :  { %v3039_v26 = vadd.f32 %v7679_v34, %v7234_v33 }
 0xd12   :  { %v3033_v36 = vpop.f32.mrf.mxu1 }
 0xd13   :  { %v3034_v39 = vadd.f32 %v7680_v38, %v3033_v36  ;;  %v3075_v27 = vsel %vm335_vm2, %v3039_v26, -inf }
 0xd14   :  { %3076 = vmax.xlane.f32.xlu1 %v3075_v27  ;;  %v7237_v46 = vpop.f32.mrf.mxu1 }
 0xd15   :  { %v3072_v47 = vsel %vm335_vm2, %v3034_v39, -inf  ;;  %v3049_v29 = vadd.f32 %v7682_v49, %v7237_v46 }
 0xd16   :  { %v3043_v6 = vpop.f32.mrf.mxu1  ;;  %3073 = vmax.xlane.f32.xlu0 %v3072_v47 }
 0xd17   :  { %v3044_v7 = vadd.f32 %v7681_v48, %v3043_v6  ;;  %v3081_v57 = vsel %vm335_vm2, %v3049_v29, -inf }
 0xd18   :  { %v7240_v28 = vpop.f32.mrf.mxu1 }
 0xd19   :  { %v3078_v50 = vsel %vm335_vm2, %v3044_v7, -inf  ;;  %v3059_v14 = vadd.f32 %v7684_v53, %v7240_v28 }
 0xd1a   :  { %v3053_v11 = vpop.f32.mrf.mxu1  ;;  %3079 = vmax.xlane.f32.xlu0 %v3078_v50 }
 0xd1b   :  { %v3054_v52 = vadd.f32 %v7683_v51, %v3053_v11  ;;  %v3087_v16 = vsel %vm335_vm2, %v3059_v14, -inf }
 0xd1c   :  { %v7243_v58 = vpop.f32.mrf.mxu1 }
 0xd1d   :  { %v3084_v54 = vsel %vm335_vm2, %v3054_v52, -inf  ;;  %v3069_v62 = vadd.f32 %v7685_v60, %v7243_v58 }
 0xd1e   :  { %3085 = vmax.xlane.f32.xlu1 %v3084_v54  ;;  %3082 = vmax.xlane.f32.xlu0 %v3081_v57  ;;  %v3063_v22 = vpop.f32.mrf.mxu1 }
 0xd1f   :  { %v3093_v63 = vsel %vm335_vm2, %v3069_v62, -inf  ;;  %v8829_v35 = vadd.f32 %v7686_v0, %v3063_v22 }
 0xd21   :  { %v3090_v1 = vsel %vm335_vm2, %v8829_v35, -inf }
 0xd22   :  { %3088 = vmax.xlane.f32.xlu0 %v3087_v16 }
 0xd26   :  { %3094 = vmax.xlane.f32.xlu0 %v3093_v63 }
 0xd2f   :  { %3174 = vrot.lane.b32.xlu1 %v8731_v5, %s9618_s1 }
 0xd33   :  { %3170 = vrot.lane.b32.xlu1 %v8739_v10, %s9618_s1 }
 0xd3c   :  { %3172 = vrot.lane.b32.xlu0 %v8735_v8, %s9618_s1 }
 0xd40   :  { %3166 = vrot.lane.b32.xlu0 %v8743_v15, %s9618_s1 }
 0xd57   :  { %3091 = vmax.xlane.f32.xlu1 %v3090_v1 }
 0xd68   :  { %3168 = vrot.lane.b32.xlu1 %v8745_v17, %s9618_s1 }
 0xd6c   :  { %3164 = vrot.lane.b32.xlu1 %v8751_v18, %s9618_s1 }
 0xd9d   :  { %v3077_v61 = vpop.xlane.xlu1 %3076 }
 0xd9e   :  { %v3097_v2 = vsub.f32 %v3039_v26, %v3077_v61 }
 0xd9f   :  { %v3074_v20 = vpop.xlane.xlu0 %3073 }
 0xda0   :  { %v3106_v5 = vmul.f32 1.442695, %v3097_v2  ;;  %v3096_v8 = vsub.f32 %v3034_v39, %v3074_v20 }
 0xda2   :  { %7629 = vpow2.f32 %v3106_v5  ;;  %v3104_v10 = vmul.f32 1.442695, %v3096_v8 }
 0xda3   :  { %v3080_v15 = vpop.xlane.xlu0 %3079 }
 0xda4   :  { %7631 = vpow2.f32 %v3104_v10  ;;  %v3098_v19 = vsub.f32 %v3044_v7, %v3080_v15 }
 0xda6   :  { %v3108_v21 = vmul.f32 1.442695, %v3098_v19 }
 0xda7   :  { %v3086_v24 = vpop.xlane.xlu1 %3085  ;;  %v3083_v25 = vpop.xlane.xlu0 %3082 }
 0xda8   :  { %7633 = vpow2.f32 %v3108_v21  ;;  %v3100_v30 = vsub.f32 %v3054_v52, %v3086_v24  ;;  %v3099_v31 = vsub.f32 %v3049_v29, %v3083_v25 }
 0xdaa   :  { %v3112_v17 = vmul.f32 1.442695, %v3100_v30  ;;  %v3110_v45 = vmul.f32 1.442695, %v3099_v31 }
 0xdab   :  { %v3175_v32 = vpop.permute.xlu1 %3174  ;;  %v3089_v18 = vpop.xlane.xlu0 %3088 }
 0xdac   :  { %7635 = vpow2.f32 %v3112_v17  ;;  %v3101_v33 = vsub.f32 %v3059_v14, %v3089_v18  ;;  %7244 = vmatprep.subr.mxu0 %v3175_v32 }
 0xdad   :  { %7637 = vpow2.f32 %v3110_v45  ;;  %7245 = vmatpush3.msra.mxu0 %v3175_v32 }
 0xdae   :  { %v3114_v34 = vmul.f32 1.442695, %v3101_v33 }
 0xdaf   :  { %v8837_v26 = vpop.eup %7629  ;;  %v3095_v36 = vpop.xlane.xlu0 %3094 }
 0xdb0   :  { %7639 = vpow2.f32 %v3114_v34  ;;  %v3103_v38 = vsub.f32 %v3069_v62, %v3095_v36  ;;  %v3123_v39 = vsel %vm335_vm2, %v8837_v26, 0.0  ;;  %v3171_v7 = vpop.permute.xlu1 %3170 }
 0xdb1   :  { %v7632_v27 = vpop.eup %7631  ;;  %3124 = vadd.xlane.f32.xlu0 %v3123_v39  ;;  %v6193_v39 = vld [vmem:[%s9584_s5 + $0x30] sm:$0xff] }
 0xdb2   :  { %v3118_v46 = vmul.f32 1.442695, %v3103_v38  ;;  %v3120_v47 = vsel %vm335_vm2, %v7632_v27, 0.0  ;;  %v6194_v38 = vld [vmem:[%s9584_s5 + $0x38] sm:$0xff] }
 0xdb3   :  { %3121 = vadd.xlane.f32.xlu1 %v3120_v47  ;;  %v3173_v6 = vpop.permute.xlu0 %3172 }
 0xdb4   :  { %7641 = vpow2.f32 %v3118_v46  ;;  %7246 = vmatprep.subr.mxu0 %v3173_v6  ;;  %v6192_v46 = vld [vmem:[%s9584_s5 + $0x28] sm:$0xff] }
 0xdb5   :  { %v8842_v48 = vpop.eup %7633  ;;  %7247 = vmatpush3.msra.mxu0 %v3173_v6  ;;  %v6191_v6 = vld [vmem:[%s9584_s5 + $0x20] sm:$0xff] }
 0xdb6   :  { %7248 = vmatprep.subr.mxu0 %v3171_v7  ;;  %v3126_v28 = vsel %vm335_vm2, %v8842_v48, 0.0 }
 0xdb7   :  { %3127 = vadd.xlane.f32.xlu1 %v3126_v28  ;;  %7249 = vmatpush3.msra.mxu0 %v3171_v7  ;;  %v3167_v62 = vpop.permute.xlu0 %3166 }
 0xdb9   :  { %v8846_v49 = vpop.eup %7635 }
 0xdba   :  { %v7638_v29 = vpop.eup %7637  ;;  %v3132_v50 = vsel %vm335_vm2, %v8846_v49, 0.0 }
 0xdbb   :  { %3133 = vadd.xlane.f32.xlu1 %v3132_v50  ;;  %v3129_v11 = vsel %vm335_vm2, %v7638_v29, 0.0 }
 0xdbc   :  { %3130 = vadd.xlane.f32.xlu0 %v3129_v11 }
 0xdbd   :  { %v8851_v51 = vpop.eup %7639 }
 0xdbe   :  { %v3135_v52 = vsel %vm335_vm2, %v8851_v51, 0.0 }
 0xdc0   :  { %3136 = vadd.xlane.f32.xlu0 %v3135_v52 }
 0xdc1   :  { %v8855_v53 = vpop.eup %7641 }
 0xdc2   :  { %v3141_v14 = vsel %vm335_vm2, %v8855_v53, 0.0 }
 0xdc4   :  { %3142 = vadd.xlane.f32.xlu0 %v3141_v14 }
 0xdda   :  { %3162 = vrot.lane.b32.xlu0 %v8713_v3, %s9618_s1 }
 0xde0   :  { %v3092_v54 = vpop.xlane.xlu1 %3091 }
 0xde1   :  { %v3102_v57 = vsub.f32 %v8829_v35, %v3092_v54 }
 0xde3   :  { %v3116_v58 = vmul.f32 1.442695, %v3102_v57 }
 0xde4   :  { %v3169_v60 = vpop.permute.xlu1 %3168 }
 0xde5   :  { %7643 = vpow2.f32 %v3116_v58  ;;  %7250 = vmatprep.subr.mxu0 %v3169_v60 }
 0xde6   :  { %7251 = vmatpush3.msra.mxu0 %v3169_v60 }
 0xde7   :  { %7252 = vmatprep.subr.mxu0 %v3167_v62 }
 0xde8   :  { %v3165_v16 = vpop.permute.xlu1 %3164  ;;  %7253 = vmatpush3.msra.mxu0 %v3167_v62 }
 0xde9   :  { %7254 = vmatprep.subr.mxu0 %v3165_v16 }
 0xdea   :  { %7255 = vmatpush3.msra.mxu0 %v3165_v16 }
 0xdf2   :  { %v7644_v63 = vpop.eup %7643 }
 0xdf3   :  { %v3138_v22 = vsel %vm335_vm2, %v7644_v63, 0.0 }
 0xdf4   :  { %3139 = vadd.xlane.f32.xlu1 %v3138_v22  ;;  %v6195_v22 = vld [vmem:[%s9585_s6 + $0x1] ss:$0 sm:$0xff] }
 0xe05   :  { %3160 = vrot.lane.b32.xlu1 %v8715_v23, %s9618_s1 }
 0xe3a   :  { %v3125_v0 = vpop.xlane.xlu0 %3124 }
 0xe3c   :  { %v3122_v3 = vpop.xlane.xlu1 %3121 }
 0xe3d   :  { %7645 = vrcp.f32 %v3122_v3 }
 0xe3e   :  { %7647 = vrcp.f32 %v3125_v0 }
 0xe40   :  { %v3128_v8 = vpop.xlane.xlu1 %3127 }
 0xe41   :  { %7649 = vrcp.f32 %v3128_v8 }
 0xe44   :  { %v3134_v10 = vpop.xlane.xlu1 %3133 }
 0xe45   :  { %v3131_v35 = vpop.xlane.xlu0 %3130 }
 0xe46   :  { %7651 = vrcp.f32 %v3131_v35 }
 0xe47   :  { %7653 = vrcp.f32 %v3134_v10 }
 0xe49   :  { %v3137_v1 = vpop.xlane.xlu0 %3136 }
 0xe4a   :  { %v7646_v61 = vpop.eup %7645  ;;  %7655 = vrcp.f32 %v3137_v1 }
 0xe4b   :  { %v3152_v2 = vmul.f32 %v7646_v61, %v7632_v27  ;;  %v7648_v15 = vpop.eup %7647 }
 0xe4c   :  { %v3153_v24 = vmul.f32 %v7648_v15, %v8837_v26 }
 0xe4d   :  { %v3143_v20 = vpop.xlane.xlu0 %3142  ;;  %7260 = vmatprep.mubr.msk.f32.mxu0 %vm335_vm2, %v3152_v2 }
 0xe4e   :  { %7657 = vrcp.f32 %v3143_v20  ;;  %v7650_v19 = vpop.eup %7649 }
 0xe4f   :  { %v3154_v30 = vmul.f32 %v7650_v19, %v8842_v48 }
 0xe51   :  { %v3163_v5 = vpop.permute.xlu0 %3162 }
 0xe52   :  { %7256 = vmatprep.subr.mxu0 %v3163_v5 }
 0xe53   :  { %7257 = vmatpush3.msra.mxu0 %v3163_v5  ;;  %v7652_v25 = vpop.eup %7651 }
 0xe54   :  { %v7654_v31 = vpop.eup %7653  ;;  %v3155_v17 = vmul.f32 %v7652_v25, %v7638_v29 }
 0xe55   :  { %v3156_v32 = vmul.f32 %v7654_v31, %v8846_v49  ;;  %v6225_v31 = vld [vmem:[%s9590_s11 + $0x1c8] sm:$0xff] }
 0xe57   :  { %v7656_v45 = vpop.eup %7655 }
 0xe58   :  { %v3157_v33 = vmul.f32 %v7656_v45, %v8851_v51 }
 0xe5b   :  { %v7658_v18 = vpop.eup %7657 }
 0xe5c   :  { %v3159_v36 = vmul.f32 %v7658_v18, %v8855_v53 }
 0xe7d   :  { %v3140_v23 = vpop.xlane.xlu1 %3139 }
 0xe7e   :  { %7659 = vrcp.f32 %v3140_v23 }
 0xe81   :  { %v3161_v21 = vpop.permute.xlu1 %3160 }
 0xe82   :  { %7258 = vmatprep.subr.mxu0 %v3161_v21 }
 0xe83   :  { %7259 = vmatpush3.msra.mxu0 %v3161_v21 }
 0xe84   :  { %7261 = vmatmul.mubr.msk.f32.vlgmr.msra.gmra.mxu0 %vm335_vm2, %v3153_v24  ;;  %7272 = vmatprep.subr.mxu0 %v6194_v38 }
 0xe85   :  { %7263 = vmatprep.mubr.msk.f32.mxu0 %vm335_vm2, %v3154_v30  ;;  %7273 = vmatpush3.msra.mxu0 %v6194_v38  ;;  %v6201_v38 = vld [vmem:[%s9590_s11 + $0x108] sm:$0xff] }
 0xe86   :  { %7274 = vmatprep.subr.mxu0 %v6193_v39 }
 0xe87   :  { %7275 = vmatpush3.msra.mxu0 %v6193_v39 }
 0xe88   :  { %7264 = vmatmul.mubr.msk.f32.gmra.mxu0 %vm335_vm2, %v3155_v17  ;;  %7276 = vmatprep.subr.mxu0 %v6192_v46  ;;  %v6216_v17 = vld [vmem:[%s9590_s11 + $0x180] sm:$0xff] }
 0xe89   :  { %7266 = vmatprep.mubr.msk.f32.mxu0 %vm335_vm2, %v3156_v32  ;;  %7277 = vmatpush3.msra.mxu0 %v6192_v46  ;;  %v6224_v32 = vld [vmem:[%s9590_s11 + $0x1c0] sm:$0xff] }
 0xe8a   :  { %7278 = vmatprep.subr.mxu0 %v6191_v6 }
 0xe8b   :  { %v7660_v34 = vpop.eup %7659  ;;  %7279 = vmatpush3.msra.mxu0 %v6191_v6 }
 0xe8c   :  { %7267 = vmatmul.mubr.msk.f32.gmra.mxu0 %vm335_vm2, %v3157_v33  ;;  %v3158_v26 = vmul.f32 %v7660_v34, %v7644_v63  ;;  %v6250_v33 = vcombine.low %v6216_v17, %v6224_v32  ;;  %v6251_v34 = vcombine.high %v6216_v17, %v6224_v32  ;;  %v6204_v17 = vld [vmem:[%s9590_s11 + $0x120] sm:$0xff]  ;;  %v6205_v32 = vld [vmem:[%s9590_s11 + $0x128] sm:$0xff] }
 0xe8e   :  { %7269 = vmatprep.mubr.msk.f32.mxu0 %vm335_vm2, %v3158_v26  ;;  %3771 = vmatprep.subr.bf16.mxu0 %v6251_v34  ;;  %v6200_v26 = vld [vmem:[%s9590_s11 + $0x100] sm:$0xff] }
 0xe90   :  { %7270 = vmatmul.mubr.msk.f32.gmra.mxu0 %vm335_vm2, %v3159_v36  ;;  %v6208_v36 = vld [vmem:[%s9590_s11 + $0x140] sm:$0xff] }
 0xe91   :  { %v6235_v39 = vcombine.high %v6200_v26, %v6208_v36  ;;  %v6234_v46 = vcombine.low %v6200_v26, %v6208_v36 }
 0xf44   :  { %v7262_v27 = vpop.f32.mrf.mxu0 }
 0xf46   :  { %v3274_v47 = vpop.f32.mrf.mxu0 }
 0xf48   :  { %v7265_v48 = vpop.f32.mrf.mxu0 }
 0xf49   :  { %3317 = vrot.lane.b32.xlu1 %v7265_v48, %s9619_s3  ;;  %v6218_v48 = vld [vmem:[%s9590_s11 + $0x190] sm:$0xff] }
 0xf4a   :  { %v3284_v7 = vpop.f32.mrf.mxu0 }
 0xf4b   :  { %3315 = vrot.lane.b32.xlu0 %v3284_v7, %s9619_s3  ;;  %v6226_v7 = vld [vmem:[%s9590_s11 + $0x1d0] sm:$0xff] }
 0xf4c   :  { %v7268_v28 = vpop.f32.mrf.mxu0 }
 0xf4d   :  { %3325 = vrot.lane.b32.xlu1 %v7268_v28, %s9620_s16  ;;  %v6219_v28 = vld [vmem:[%s9590_s11 + $0x198] sm:$0xff] }
 0xf4e   :  { %v3294_v49 = vpop.f32.mrf.mxu0 }
 0xf4f   :  { %3323 = vrot.lane.b32.xlu0 %v3294_v49, %s9620_s16  ;;  %v6254_v49 = vcombine.low %v6218_v48, %v6226_v7 }
 0xf50   :  { %v7271_v29 = vpop.f32.mrf.mxu0 }
 0xf51   :  { %3333 = vrot.lane.b32.xlu1 %v7271_v29, %s9621_s28  ;;  %v6255_v29 = vcombine.high %v6218_v48, %v6226_v7 }
 0xf52   :  { %v3304_v50 = vpop.f32.mrf.mxu0 }
 0xf53   :  { %3331 = vrot.lane.b32.xlu0 %v3304_v50, %s9621_s28  ;;  %v6227_v50 = vld [vmem:[%s9590_s11 + $0x1d8] sm:$0xff] }
 0xfbb   :  { %v3318_v11 = vpop.permute.xlu1 %3317 }
 0xfbc   :  { %v3338_v57 = vsel %vm197_vm1, %v7262_v27, %v3318_v11  ;;  %v6209_v27 = vld [vmem:[%s9590_s11 + $0x148] sm:$0xff]  ;;  %v6256_v11 = vcombine.low %v6219_v28, %v6227_v50 }
 0xfbd   :  { %v3316_v51 = vpop.permute.xlu0 %3315  ;;  %v6237_v6 = vcombine.high %v6201_v38, %v6209_v27 }
 0xfbe   :  { %v3337_v14 = vsel %vm197_vm1, %v3274_v47, %v3316_v51  ;;  %v6236_v47 = vcombine.low %v6201_v38, %v6209_v27  ;;  %v6257_v51 = vcombine.high %v6219_v28, %v6227_v50  ;;  %v6222_v38 = vld [vmem:[%s9590_s11 + $0x1b0] sm:$0xff]  ;;  %v6223_v27 = vld [vmem:[%s9590_s11 + $0x1b8] sm:$0xff] }
 0xfbf   :  { %v3326_v52 = vpop.permute.xlu1 %3325  ;;  %v6206_v28 = vld [vmem:[%s9590_s11 + $0x130] sm:$0xff]  ;;  %v6215_v50 = vld [vmem:[%s9590_s11 + $0x178] sm:$0xff] }
 0xfc0   :  { %v3340_v62 = vsel %vm603_vm3, %v3338_v57, %v3326_v52 }
 0xfc1   :  { %v3324_v53 = vpop.permute.xlu0 %3323 }
 0xfc2   :  { %v3339_v58 = vsel %vm603_vm3, %v3337_v14, %v3324_v53 }
 0xfc3   :  { %v3334_v54 = vpop.permute.xlu1 %3333 }
 0xfc4   :  { %v3342_v63 = vsel %vm606_vm4, %v3340_v62, %v3334_v54 }
 0xfc5   :  { %v3332_v60 = vpop.permute.xlu0 %3331 }
 0xfc6   :  { %v3341_v16 = vsel %vm606_vm4, %v3339_v58, %v3332_v60 }
 0xfc7   :  { %7280 = vmatprep.mubr.msk.f32.mxu0 %vm85_vm0, %v3341_v16  ;;  %v6198_v16 = vld [vmem:[%s9586_s7 + $0x1] ss:$0 sm:$0xff] }
 0xfc8   :  { %7281 = vmatmul.mubr.msk.f32.vlgmr.msra.gmra.mxu0 %vm85_vm0, %v3342_v63 }
 0xfc9   :  { %3791 = vmatprep.mubr.bf16.mxu0 %v7717_v4  ;;  %3772 = vmatpush1.bf16.msra.mxu0 %v6250_v33 }
 0xfca   :  { %3773 = vmatprep.subr.bf16.mxu0 %v6235_v39  ;;  %v6230_v39 = vld [vmem:[%s9590_s11 + $0x1f0] sm:$0xff] }
 0xfcb   :  { %v6263_v48 = vcombine.high %v6222_v38, %v6230_v39 }
 0xfcd   :  { %3774 = vmatpush1.bf16.msra.mxu0 %v6234_v46  ;;  %v6231_v46 = vld [vmem:[%s9590_s11 + $0x1f8] sm:$0xff] }
 0xfce   :  { %3857 = vmatprep.subr.bf16.mxu0 %v6255_v29  ;;  %v6265_v7 = vcombine.high %v6223_v27, %v6231_v46  ;;  %v6207_v29 = vld [vmem:[%s9590_s11 + $0x138] sm:$0xff] }
0x1088   :  { %v7282_v3 = vpop.f32.mrf.mxu0 }
0x1089   :  { %v3431_v0 = vadd.f32 %v7282_v3, %v6195_v22 }
0x108a   :  { %v3425_v35 = vpop.f32.mrf.mxu0 }
0x108b   :  { %v3426_v1 = vadd.f32 %v6195_v22, %v3425_v35  ;;  %v3435_v61 = vadd.f32 %v3431_v0, %v8706_v37  ;;  %v6199_v0 = vld [vmem:[%s9587_s8 + $0x1] ss:$0 sm:$0xff]  ;;  %s7720_s8 = smov [#allocation3]  }
0x108d   :  { %v3441_v2 = vsel %vm85_vm0, %v3435_v61, 0.0  ;;  %v3434_v20 = vadd.f32 %v3426_v1, %v8702_v59  ;;  %v6217_v59 = vld [vmem:[%s9590_s11 + $0x188] sm:$0xff]  ;;  %v6202_v1 = vld [vmem:[%s9590_s11 + $0x110] sm:$0xff] }
0x108e   :  { %3442 = vadd.xlane.f32.xlu1 %v3441_v2  ;;  %v6253_v45 = vcombine.high %v6217_v59, %v6225_v31  ;;  %v6252_v18 = vcombine.low %v6217_v59, %v6225_v31  ;;  %v6203_v2 = vld [vmem:[%s9590_s11 + $0x118] sm:$0xff] }
0x108f   :  { %v3438_v5 = vsel %vm85_vm0, %v3434_v20, 0.0 }
0x1090   :  { %3439 = vadd.xlane.f32.xlu0 %v3438_v5  ;;  %3814 = vmatprep.subr.bf16.mxu1 %v6253_v45  ;;  %v6212_v45 = vld [vmem:[%s9590_s11 + $0x160] sm:$0xff] }
0x1091   :  { %3815 = vmatpush1.bf16.msra.mxu1 %v6252_v18  ;;  %v6213_v18 = vld [vmem:[%s9590_s11 + $0x168] sm:$0xff]  ;;  %v6243_v26 = vcombine.high %v6204_v17, %v6212_v45 }
0x1092   :  { %3816 = vmatprep.subr.bf16.mxu1 %v6237_v6  ;;  %v6245_v36 = vcombine.high %v6205_v32, %v6213_v18  ;;  %v6244_v6 = vcombine.low %v6205_v32, %v6213_v18  ;;  %v7489_v32 = vld [vmem:[%s9592_s13 + $0x440] sm:$0xff]  }
0x1093   :  { %v7490_v18 = vld [vmem:[%s9592_s13 + $0x4c0] sm:$0xff]  }
0x1095   :  { %3817 = vmatpush1.bf16.msra.mxu1 %v6236_v47  ;;  %v6242_v47 = vcombine.low %v6204_v17, %v6212_v45  ;;  %v7487_v17 = vld [vmem:[%s9592_s13 + $0x408] sm:$0xff]  }
0x1096   :  { %3900 = vmatprep.subr.bf16.mxu1 %v6257_v51  ;;  %v6264_v51 = vcombine.low %v6223_v27, %v6231_v46  ;;  %v7488_v45 = vld [vmem:[%s9592_s13 + $0x488] sm:$0xff]  }
0x1117   :  { %v3443_v8 = vpop.xlane.xlu1 %3442 }
0x1118   :  { %v3445_v10 = vmul.f32 0.03125, %v3443_v8 }
0x1119   :  { %v3440_v23 = vpop.xlane.xlu0 %3439 }
0x111a   :  { %v3444_v15 = vmul.f32 0.03125, %v3440_v23  ;;  %v3447_v19 = vsub.f32 %v3435_v61, %v3445_v10  ;;  %v6210_v61 = vld [vmem:[%s9590_s11 + $0x150] sm:$0xff] }
0x111b   :  { %v6239_v23 = vcombine.high %v6202_v1, %v6210_v61 }
0x111c   :  { %v3446_v21 = vsub.f32 %v3434_v20, %v3444_v15  ;;  %v3449_v30 = vmul.f32 %v3447_v19, %v3447_v19  ;;  %v6211_v20 = vld [vmem:[%s9590_s11 + $0x158] sm:$0xff] }
0x111d   :  { %v6241_v15 = vcombine.high %v6203_v2, %v6211_v20 }
0x111e   :  { %v3448_v24 = vmul.f32 %v3446_v21, %v3446_v21  ;;  %v3453_v37 = vsel %vm85_vm0, %v3449_v30, 0.0  ;;  %v6238_v30 = vcombine.low %v6202_v1, %v6210_v61  ;;  %v7472_v1 = vld [vmem:[%s9592_s13 + $0x4a8] sm:$0xff]   ;;  %v7473_v61 = vld [vmem:[%s9592_s13 + $0x460] sm:$0xff]  }
0x1120   :  { %v3450_v25 = vsel %vm85_vm0, %v3448_v24, 0.0  ;;  %v6221_v24 = vld [vmem:[%s9590_s11 + $0x1a8] sm:$0xff] }
0x1121   :  { %3451 = vadd.xlane.f32.xlu0 %v3450_v25  ;;  %v6229_v25 = vld [vmem:[%s9590_s11 + $0x1e8] sm:$0xff] }
0x1122   :  { %v6261_v31 = vcombine.high %v6221_v24, %v6229_v25  ;;  %v6260_v34 = vcombine.low %v6221_v24, %v6229_v25  ;;  %v7481_v24 = vld [vmem:[%s9592_s13 + $0x450] sm:$0xff]  }
0x1123   :  { %v7482_v25 = vld [vmem:[%s9592_s13 + $0x4d0] sm:$0xff]  }
0x1125   :  { %3454 = vadd.xlane.f32.xlu0 %v3453_v37  ;;  %v6240_v37 = vcombine.low %v6203_v2, %v6211_v20  ;;  %v7474_v2 = vld [vmem:[%s9592_s13 + $0x4e0] sm:$0xff]  }
0x1126   :  { %v7475_v20 = vld [vmem:[%s9592_s13 + $0x420] sm:$0xff]  }
0x11aa   :  { %v3452_v52 = vpop.xlane.xlu0 %3451 }
0x11ab   :  { %v3456_v53 = vmul.f32 0.03125, %v3452_v52 }
0x11ad   :  { %v3458_v14 = vadd.f32 1e-05, %v3456_v53  ;;  %v6249_v53 = vcombine.high %v6207_v29, %v6215_v50 }
0x11ae   :  { %v3455_v54 = vpop.xlane.xlu0 %3454 }
0x11af   :  { %7661 = vrsqrt.f32 %v3458_v14  ;;  %v3457_v57 = vmul.f32 0.03125, %v3455_v54  ;;  %v6248_v54 = vcombine.low %v6207_v29, %v6215_v50 }
0x11b1   :  { %v3459_v58 = vadd.f32 1e-05, %v3457_v57  ;;  %v7461_v57 = vld [vmem:[%s9592_s13 + $0x478] sm:$0xff]  }
0x11b3   :  { %7663 = vrsqrt.f32 %v3459_v58  ;;  %v7462_v58 = vld [vmem:[%s9592_s13 + $0x4f8] sm:$0xff]  }
0x11bc   :  { %v7662_v60 = vpop.eup %7661 }
0x11bd   :  { %v3462_v62 = vmul.f32 %v7662_v60, %v3446_v21  ;;  %v6228_v21 = vld [vmem:[%s9590_s11 + $0x1e0] sm:$0xff]  ;;  %v7463_v60 = vld [vmem:[%s9592_s13 + $0x438] sm:$0xff]  }
0x11bf   :  { %v3468_v22 = vmul.f32 %v6198_v16, %v3462_v62  ;;  %v7464_v62 = vld [vmem:[%s9592_s13 + $0x4b8] sm:$0xff]  }
0x11c0   :  { %v7664_v63 = vpop.eup %7663 }
0x11c1   :  { %v3463_v3 = vmul.f32 %v7664_v63, %v3447_v19  ;;  %v8968_v5 = vadd.f32 %v6199_v0, %v3468_v22  ;;  %v6220_v19 = vld [vmem:[%s9590_s11 + $0x1a0] sm:$0xff]  ;;  %v7467_v63 = vld [vmem:[%s9592_s13 + $0x430] sm:$0xff]  }
0x11c2   :  { %v6259_v59 = vcombine.high %v6220_v19, %v6228_v21  ;;  %v6258_v33 = vcombine.low %v6220_v19, %v6228_v21  ;;  %v7468_v22 = vld [vmem:[%s9592_s13 + $0x4b0] sm:$0xff]   ;;  %v7479_v19 = vld [vmem:[%s9592_s13 + $0x418] sm:$0xff]  }
0x11c3   :  { %v3469_v35 = vmul.f32 %v6198_v16, %v3463_v3  ;;  %v7465_v16 = vld [vmem:[%s9592_s13 + $0x470] sm:$0xff]   ;;  %v7469_v3 = vld [vmem:[%s9592_s13 + $0x468] sm:$0xff]   ;;  %v7480_v21 = vld [vmem:[%s9592_s13 + $0x498] sm:$0xff]  }
0x11c5   :  { %v8970_v8 = vadd.f32 %v6199_v0, %v3469_v35  ;;  %v7470_v0 = vld [vmem:[%s9592_s13 + $0x4e8] sm:$0xff]  }
0x11c6   :  { %v7471_v35 = vld [vmem:[%s9592_s13 + $0x428] sm:$0xff]  }
0x11c7   :  { %v8974_v10 = vpack.c.bf16 %v8970_v8, %v8968_v5 }
0x11c9   :  { %6266 = vmatmul.mubr.msk.bf16.vlgmr.msra.gmra.mxu0 %vm85_vm0, %v8974_v10  ;;  %6267 = vmatmul.mubr.msk.bf16.vlgmr.msra.gmra.mxu1 %vm85_vm0, %v8974_v10 }
0x11ca   :  { %3858 = vmatpush1.bf16.msra.mxu0 %v6254_v49  ;;  %3901 = vmatpush1.bf16.msra.mxu1 %v6256_v11  ;;  %v6214_v49 = vld [vmem:[%s9590_s11 + $0x170] sm:$0xff]  ;;  %v6262_v11 = vcombine.low %v6222_v38, %v6230_v39  ;;  %v9151_v38 = vld [vmem:[%s9591_s12 + $0x1] ss:$2 sm:$0xff] }
0x11cb   :  { %3859 = vmatprep.subr.bf16.mxu0 %v6239_v23  ;;  %3902 = vmatprep.subr.bf16.mxu1 %v6241_v15  ;;  %v6247_v52 = vcombine.high %v6206_v28, %v6214_v49  ;;  %v6246_v14 = vcombine.low %v6206_v28, %v6214_v49  ;;  %v7477_v23 = vld [vmem:[%s9592_s13 + $0x458] sm:$0xff]   ;;  %v3523_v46 = vrot.slane %v9151_v38, %v8292_v9 }
0x11cc   :  { %3877 = vmatprep.mubr.bf16.mxu0 %v7717_v4  ;;  %3920 = vmatprep.mubr.bf16.mxu1 %v7717_v4  ;;  %v7478_v15 = vld [vmem:[%s9592_s13 + $0x4d8] sm:$0xff]  }
0x11ce   :  { %3860 = vmatpush1.bf16.msra.mxu0 %v6238_v30  ;;  %3903 = vmatpush1.bf16.msra.mxu1 %v6240_v37  ;;  %v7483_v30 = vld [vmem:[%s9592_s13 + $0x410] sm:$0xff]  }
0x11cf   :  { %3943 = vmatprep.subr.bf16.mxu0 %v6259_v59  ;;  %3986 = vmatprep.subr.bf16.mxu1 %v6261_v31  ;;  %v7484_v37 = vld [vmem:[%s9592_s13 + $0x490] sm:$0xff]   ;;  %v7485_v59 = vld [vmem:[%s9592_s13 + $0x448] sm:$0xff]  }
0x11d0   :  { %v7486_v31 = vld [vmem:[%s9592_s13 + $0x4c8] sm:$0xff]  }
0x11d1   :  { %6268 = vmatmul.mubr.msk.bf16.vlgmr.msra.gmra.mxu0 %vm85_vm0, %v8974_v10  ;;  %6269 = vmatmul.mubr.msk.bf16.vlgmr.msra.gmra.mxu1 %vm85_vm0, %v8974_v10 }
0x11d2   :  { %3944 = vmatpush1.bf16.msra.mxu0 %v6258_v33  ;;  %3987 = vmatpush1.bf16.msra.mxu1 %v6260_v34  ;;  %v7491_v33 = vld [vmem:[%s9592_s13 + $0x400] sm:$0xff]  }
0x11d3   :  { %3945 = vmatprep.subr.bf16.mxu0 %v6243_v26  ;;  %3988 = vmatprep.subr.bf16.mxu1 %v6245_v36  ;;  %v7492_v34 = vld [vmem:[%s9592_s13 + $0x480] sm:$0xff]   ;;  %v7493_v26 = vld [vmem:[%s9592_s13 + $0x578] sm:$0xff]  }
0x11d4   :  { %3963 = vmatprep.mubr.bf16.mxu0 %v7717_v4  ;;  %4006 = vmatprep.mubr.bf16.mxu1 %v7717_v4  ;;  %v7494_v36 = vld [vmem:[%s9592_s13 + $0x5f8] sm:$0xff]  }
0x11d6   :  { %3946 = vmatpush1.bf16.msra.mxu0 %v6242_v47  ;;  %3989 = vmatpush1.bf16.msra.mxu1 %v6244_v6  ;;  %v3531_v47 = vrot.slane %v9151_v38, %v8295_v42  ;;  %v3519_v6 = vrot.slane %v9151_v38, %v8298_v43 }
0x11d7   :  { %4029 = vmatprep.subr.bf16.mxu0 %v6263_v48  ;;  %4072 = vmatprep.subr.bf16.mxu1 %v6265_v7  ;;  %v3527_v48 = vrot.slane %v9151_v38, %v8301_v44 }
0x11d9   :  { %6270 = vmatmul.mubr.msk.bf16.vlgmr.msra.gmra.mxu0 %vm85_vm0, %v8974_v10  ;;  %6271 = vmatmul.mubr.msk.bf16.vlgmr.msra.gmra.mxu1 %vm85_vm0, %v8974_v10 }
0x11da   :  { %4030 = vmatpush1.bf16.msra.mxu0 %v6262_v11  ;;  %4073 = vmatpush1.bf16.msra.mxu1 %v6264_v51 }
0x11db   :  { %4031 = vmatprep.subr.bf16.mxu0 %v6247_v52  ;;  %4074 = vmatprep.subr.bf16.mxu1 %v6249_v53 }
0x11dc   :  { %4049 = vmatprep.mubr.bf16.mxu0 %v7717_v4  ;;  %4092 = vmatprep.mubr.bf16.mxu1 %v7717_v4  ;;  %v7466_v4 = vld [vmem:[%s9592_s13 + $0x4f0] sm:$0xff]  }
0x11de   :  { %4032 = vmatpush1.bf16.msra.mxu0 %v6246_v14  ;;  %4075 = vmatpush1.bf16.msra.mxu1 %v6248_v54 }
0x11df   :  { %6934 = vmatprep.subr.bf16.mxu0 %v7461_v57  ;;  %6956 = vmatprep.subr.bf16.mxu1 %v7462_v58 }
0x11e1   :  { %6272 = vmatmul.mubr.msk.bf16.vlgmr.msra.gmra.mxu0 %vm85_vm0, %v8974_v10  ;;  %6273 = vmatmul.mubr.msk.bf16.vlgmr.msra.gmra.mxu1 %vm85_vm0, %v8974_v10  ;;  %v7476_v10 = vld [vmem:[%s9592_s13 + $0x4a0] sm:$0xff]  }
0x11e2   :  { %6935 = vmatpush3.bf16.msra.mxu0 %v7463_v60  ;;  %6957 = vmatpush3.bf16.msra.mxu1 %v7464_v62 }
0x11e3   :  { %6936 = vmatprep.subr.bf16.mxu0 %v7465_v16  ;;  %6958 = vmatprep.subr.bf16.mxu1 %v7466_v4 }
0x11e6   :  { %6937 = vmatpush3.bf16.msra.mxu0 %v7467_v63  ;;  %6959 = vmatpush3.bf16.msra.mxu1 %v7468_v22  ;;  %v3539_v22 = vrot.slane %v9151_v38, %v8317_v55 }
0x11e7   :  { %6938 = vmatprep.subr.bf16.mxu0 %v7469_v3  ;;  %6960 = vmatprep.subr.bf16.mxu1 %v7470_v0  ;;  %v3547_v3 = vrot.slane %v9151_v38, %v8320_v56 }
0x11ea   :  { %6939 = vmatpush3.bf16.msra.mxu0 %v7471_v35  ;;  %6961 = vmatpush3.bf16.msra.mxu1 %v7472_v1 }
0x11eb   :  { %6940 = vmatprep.subr.bf16.mxu0 %v7473_v61  ;;  %6962 = vmatprep.subr.bf16.mxu1 %v7474_v2 }
0x11ee   :  { %6941 = vmatpush3.bf16.msra.mxu0 %v7475_v20  ;;  %6963 = vmatpush3.bf16.msra.mxu1 %v7476_v10 }
0x11ef   :  { %6942 = vmatprep.subr.bf16.mxu0 %v7477_v23  ;;  %6964 = vmatprep.subr.bf16.mxu1 %v7478_v15 }
0x11f2   :  { %6943 = vmatpush3.bf16.msra.mxu0 %v7479_v19  ;;  %6965 = vmatpush3.bf16.msra.mxu1 %v7480_v21  ;;  %v7495_v21 = vld [vmem:[%s9592_s13 + $0x538] sm:$0xff]  }
0x11f3   :  { %6944 = vmatprep.subr.bf16.mxu0 %v7481_v24  ;;  %6966 = vmatprep.subr.bf16.mxu1 %v7482_v25  ;;  %v7496_v24 = vld [vmem:[%s9592_s13 + $0x5b8] sm:$0xff]  }
0x11f6   :  { %6945 = vmatpush3.bf16.msra.mxu0 %v7483_v30  ;;  %6967 = vmatpush3.bf16.msra.mxu1 %v7484_v37 }
0x11f7   :  { %6946 = vmatprep.subr.bf16.mxu0 %v7485_v59  ;;  %6968 = vmatprep.subr.bf16.mxu1 %v7486_v31  ;;  %v7497_v31 = vld [vmem:[%s9592_s13 + $0x570] sm:$0xff]  }
0x11fa   :  { %6947 = vmatpush3.bf16.msra.mxu0 %v7487_v17  ;;  %6969 = vmatpush3.bf16.msra.mxu1 %v7488_v45  ;;  %v7498_v17 = vld [vmem:[%s9592_s13 + $0x5f0] sm:$0xff]  }
0x11fb   :  { %6948 = vmatprep.subr.bf16.mxu0 %v7489_v32  ;;  %6970 = vmatprep.subr.bf16.mxu1 %v7490_v18 }
0x11fe   :  { %6949 = vmatpush3.bf16.msra.mxu0 %v7491_v33  ;;  %6971 = vmatpush3.bf16.msra.mxu1 %v7492_v34 }
0x11ff   :  { %6978 = vmatprep.subr.bf16.mxu0 %v7493_v26  ;;  %7000 = vmatprep.subr.bf16.mxu1 %v7494_v36  ;;  %v7499_v36 = vld [vmem:[%s9592_s13 + $0x530] sm:$0xff]  }
0x1289   :  { %v3793_v39 = vpop.f32.mrf.mxu0  ;;  %v3836_v27 = vpop.f32.mrf.mxu1 }
0x128a   :  { %v3794_v53 = vadd.f32 %v3793_v39, %v3519_v6  ;;  %v3837_v14 = vadd.f32 %v3836_v27, %v3527_v48  ;;  %v7500_v39 = vld [vmem:[%s9592_s13 + $0x5b0] sm:$0xff]   ;;  %v7501_v27 = vld [vmem:[%s9592_s13 + $0x568] sm:$0xff]  }
0x128b   :  { %v3795_v7 = vpop.f32.mrf.mxu0  ;;  %v3838_v28 = vpop.f32.mrf.mxu1 }
0x128c   :  { %v3796_v50 = vadd.f32 %v3795_v7, %v3523_v46  ;;  %v3839_v11 = vadd.f32 %v3838_v28, %v3531_v47  ;;  %v4103_v2 = vmax.f32 %v3794_v53, 0.0  ;;  %v4105_v20 = vmax.f32 %v3837_v14, 0.0  ;;  %v7502_v7 = vld [vmem:[%s9592_s13 + $0x5e8] sm:$0xff]   ;;  %v7507_v53 = vld [vmem:[%s9592_s13 + $0x520] sm:$0xff]  }
0x128d   :  { %v3797_v49 = vpop.f32.mrf.mxu0  ;;  %v3840_v29 = vpop.f32.mrf.mxu1 }
0x128e   :  { %v3798_v51 = vadd.f32 %v3797_v49, %v3519_v6  ;;  %v3841_v52 = vadd.f32 %v3840_v29, %v3527_v48  ;;  %v4104_v0 = vmax.f32 %v3796_v50, 0.0  ;;  %v4106_v35 = vmax.f32 %v3839_v11, 0.0  ;;  %v7503_v29 = vld [vmem:[%s9592_s13 + $0x528] sm:$0xff]   ;;  %v7505_v11 = vld [vmem:[%s9592_s13 + $0x560] sm:$0xff]  }
0x128f   :  { %v3799_v54 = vpop.f32.mrf.mxu0  ;;  %v3842_v57 = vpop.f32.mrf.mxu1  ;;  %v7504_v50 = vld [vmem:[%s9592_s13 + $0x5a8] sm:$0xff]  }
0x1290   :  { %v3800_v58 = vadd.f32 %v3799_v54, %v3523_v46  ;;  %v3843_v60 = vadd.f32 %v3842_v57, %v3531_v47  ;;  %v4119_v62 = vmax.f32 %v3798_v51, 0.0  ;;  %v4121_v16 = vmax.f32 %v3841_v52, 0.0  ;;  %v7506_v51 = vld [vmem:[%s9592_s13 + $0x5e0] sm:$0xff]   ;;  %v7509_v57 = vld [vmem:[%s9592_s13 + $0x558] sm:$0xff]  }
0x1291   :  { %v9161_v4 = vpop.f32.mrf.mxu0  ;;  %v9163_v63 = vpop.f32.mrf.mxu1  ;;  %v7508_v54 = vld [vmem:[%s9592_s13 + $0x5a0] sm:$0xff]  }
0x1292   :  { %v4120_v1 = vmax.f32 %v3800_v58, 0.0  ;;  %v4122_v61 = vmax.f32 %v3843_v60, 0.0  ;;  %v4135_v25 = vpack.c.bf16 %v4119_v62, %v4103_v2  ;;  %v4137_v30 = vpack.c.bf16 %v4121_v16, %v4105_v20  ;;  %v7510_v58 = vld [vmem:[%s9592_s13 + $0x5d8] sm:$0xff]   ;;  %v7516_v2 = vld [vmem:[%s9592_s13 + $0x590] sm:$0xff]   ;;  %v7517_v20 = vld [vmem:[%s9592_s13 + $0x548] sm:$0xff]  }
0x1293   :  { %v3881_v10 = vpop.f32.mrf.mxu0  ;;  %v3924_v23 = vpop.f32.mrf.mxu1  ;;  %v7511_v62 = vld [vmem:[%s9592_s13 + $0x518] sm:$0xff]  }
0x1294   :  { %v4136_v15 = vpack.c.bf16 %v4120_v1, %v4104_v0  ;;  %v4138_v19 = vpack.c.bf16 %v4122_v61, %v4106_v35  ;;  %v3882_v45 = vadd.f32 %v3881_v10, %v3539_v22  ;;  %v3925_v32 = vadd.f32 %v3924_v23, %v3547_v3  ;;  %v7514_v0 = vld [vmem:[%s9592_s13 + $0x5d0] sm:$0xff]   ;;  %v7518_v10 = vld [vmem:[%s9592_s13 + $0x5c8] sm:$0xff]  }
0x1295   :  { %v9175_v37 = vpop.f32.mrf.mxu0  ;;  %v9177_v59 = vpop.f32.mrf.mxu1  ;;  %v7515_v1 = vld [vmem:[%s9592_s13 + $0x510] sm:$0xff]   ;;  %v3535_v23 = vrot.slane %v9151_v38, %v8399_v12 }
0x1296   :  { %5213 = vmatprep.mubr.bf16.mxu0 %v4136_v15  ;;  %5254 = vmatprep.mubr.bf16.mxu1 %v4138_v19  ;;  %v4108_v46 = vmax.f32 %v3882_v45, 0.0  ;;  %v4110_v47 = vmax.f32 %v3925_v32, 0.0  ;;  %v3543_v15 = vrot.slane %v9151_v38, %v8402_v13  ;;  %v9260_v19 = vld [vmem:[%s9591_s12 + $0x11] ss:$2 sm:$0xff]  ;;  %v7520_v38 = vld [vmem:[%s9592_s13 + $0x588] sm:$0xff]  }
0x1297   :  { %v3885_v18 = vpop.f32.mrf.mxu0  ;;  %v3928_v33 = vpop.f32.mrf.mxu1  ;;  %5214 = vmatmul.mubr.bf16.vlgmr.msra.gmra.mxu0 %v4135_v25  ;;  %5255 = vmatmul.mubr.bf16.vlgmr.msra.gmra.mxu1 %v4137_v30  ;;  %v3884_v25 = vadd.f32 %v9175_v37, %v3535_v23  ;;  %v3555_v30 = vrot.slane %v9260_v19, %v8292_v9  ;;  %v3563_v32 = vrot.slane %v9260_v19, %v8295_v42  ;;  %v7522_v9 = vld [vmem:[%s9592_s13 + $0x5c0] sm:$0xff]  }
0x1298   :  { %v3886_v34 = vadd.f32 %v3885_v18, %v3539_v22  ;;  %v3929_v26 = vadd.f32 %v3928_v33, %v3547_v3  ;;  %6979 = vmatpush3.bf16.msra.mxu0 %v7495_v21  ;;  %7001 = vmatpush3.bf16.msra.mxu1 %v7496_v24  ;;  %v7512_v22 = vld [vmem:[%s9592_s13 + $0x598] sm:$0xff]   ;;  %v7513_v3 = vld [vmem:[%s9592_s13 + $0x550] sm:$0xff]   ;;  %v7519_v24 = vld [vmem:[%s9592_s13 + $0x508] sm:$0xff]   ;;  %v3927_v45 = vadd.f32 %v9177_v59, %v3543_v15 }
0x1299   :  { %6980 = vmatprep.subr.bf16.mxu0 %v7497_v31  ;;  %7002 = vmatprep.subr.bf16.mxu1 %v7498_v17  ;;  %v9209_v52 = vpop.f32.mrf.mxu0  ;;  %v9214_v14 = vpop.f32.mrf.mxu1  ;;  %v7521_v17 = vld [vmem:[%s9592_s13 + $0x540] sm:$0xff]   ;;  %v3880_v37 = vadd.f32 %v9161_v4, %v3535_v23  ;;  %v3923_v33 = vadd.f32 %v9163_v63, %v3543_v15  ;;  %v4123_v59 = vmax.f32 %v3884_v25, 0.0  ;;  %v7525_v4 = vld [vmem:[%s9592_s13 + $0x678] sm:$0xff]  }
0x129a   :  { %v4124_v6 = vmax.f32 %v3886_v34, 0.0  ;;  %v4126_v48 = vmax.f32 %v3929_v26, 0.0  ;;  %v7523_v26 = vld [vmem:[%s9592_s13 + $0x500] sm:$0xff]   ;;  %v7541_v15 = vld [vmem:[%s9592_s13 + $0x658] sm:$0xff]  }
0x129b   :  { %v3967_v60 = vpop.f32.mrf.mxu0  ;;  %v4010_v16 = vpop.f32.mrf.mxu1  ;;  %v7524_v42 = vld [vmem:[%s9592_s13 + $0x580] sm:$0xff]   ;;  %v7543_v25 = vld [vmem:[%s9592_s13 + $0x618] sm:$0xff]  }
0x129c   :  { %v4140_v28 = vpack.c.bf16 %v4124_v6, %v4108_v46  ;;  %v4142_v49 = vpack.c.bf16 %v4126_v48, %v4110_v47  ;;  %6981 = vmatpush3.bf16.msra.mxu0 %v7499_v36  ;;  %7003 = vmatpush3.bf16.msra.mxu1 %v7500_v39  ;;  %v3968_v36 = vadd.f32 %v3967_v60, %v3555_v30  ;;  %v4125_v39 = vmax.f32 %v3927_v45, 0.0  ;;  %v7532_v60 = vld [vmem:[%s9592_s13 + $0x6b0] sm:$0xff]   ;;  %v7540_v23 = vld [vmem:[%s9592_s13 + $0x6a0] sm:$0xff]  }
0x129d   :  { %6982 = vmatprep.subr.bf16.mxu0 %v7501_v27  ;;  %7004 = vmatprep.subr.bf16.mxu1 %v7502_v7  ;;  %v9237_v35 = vpop.f32.mrf.mxu0  ;;  %v9242_v61 = vpop.f32.mrf.mxu1  ;;  %v4011_v63 = vadd.f32 %v4010_v16, %v3563_v32  ;;  %v7526_v27 = vld [vmem:[%s9592_s13 + $0x6f8] sm:$0xff]   ;;  %v4107_v46 = vmax.f32 %v3880_v37, 0.0  ;;  %v4109_v6 = vmax.f32 %v3923_v33, 0.0  ;;  %v7534_v16 = vld [vmem:[%s9592_s13 + $0x6e8] sm:$0xff]   ;;  %v7548_v37 = vld [vmem:[%s9592_s13 + $0x690] sm:$0xff]  }
0x129e   :  { %5295 = vmatprep.mubr.bf16.mxu0 %v4140_v28  ;;  %5336 = vmatprep.mubr.bf16.mxu1 %v4142_v49  ;;  %v7527_v7 = vld [vmem:[%s9592_s13 + $0x638] sm:$0xff]   ;;  %v4112_v49 = vmax.f32 %v3968_v36, 0.0  ;;  %v7550_v33 = vld [vmem:[%s9592_s13 + $0x6c8] sm:$0xff]  }
0x129f   :  { %v3971_v21 = vpop.f32.mrf.mxu0  ;;  %v4014_v31 = vpop.f32.mrf.mxu1  ;;  %v4139_v28 = vpack.c.bf16 %v4123_v59, %v4107_v46  ;;  %v7551_v36 = vld [vmem:[%s9592_s13 + $0x608] sm:$0xff]  }
0x12a0   :  { %6983 = vmatpush3.bf16.msra.mxu0 %v7503_v29  ;;  %7005 = vmatpush3.bf16.msra.mxu1 %v7504_v50  ;;  %v3972_v18 = vadd.f32 %v3971_v21, %v3555_v30  ;;  %v4015_v34 = vadd.f32 %v4014_v31, %v3563_v32  ;;  %v7528_v29 = vld [vmem:[%s9592_s13 + $0x6b8] sm:$0xff]   ;;  %v4141_v50 = vpack.c.bf16 %v4125_v39, %v4109_v6  ;;  %v7547_v32 = vld [vmem:[%s9592_s13 + $0x610] sm:$0xff]  }
0x12a1   :  { %6984 = vmatprep.subr.bf16.mxu0 %v7505_v11  ;;  %7006 = vmatprep.subr.bf16.mxu1 %v7506_v51  ;;  %v4114_v11 = vmax.f32 %v4011_v63, 0.0  ;;  %v7529_v51 = vld [vmem:[%s9592_s13 + $0x670] sm:$0xff]   ;;  %v7542_v21 = vld [vmem:[%s9592_s13 + $0x6d8] sm:$0xff]  }
0x12a2   :  { %v4128_v47 = vmax.f32 %v3972_v18, 0.0  ;;  %v4130_v48 = vmax.f32 %v4015_v34, 0.0  ;;  %v7544_v31 = vld [vmem:[%s9592_s13 + $0x698] sm:$0xff]   ;;  %v7549_v18 = vld [vmem:[%s9592_s13 + $0x648] sm:$0xff]   ;;  %v3551_v34 = vrot.slane %v9260_v19, %v8298_v43 }
0x12a3   :  { %v7552_v43 = vld [vmem:[%s9592_s13 + $0x688] sm:$0xff]  }
0x12a4   :  { %6985 = vmatpush3.bf16.msra.mxu0 %v7507_v53  ;;  %7007 = vmatpush3.bf16.msra.mxu1 %v7508_v54  ;;  %v4144_v53 = vpack.c.bf16 %v4128_v47, %v4112_v49  ;;  %v7530_v54 = vld [vmem:[%s9592_s13 + $0x6f0] sm:$0xff]   ;;  %v7558_v49 = vld [vmem:[%s9592_s13 + $0x7f8] sm:$0xff]  }
0x12a5   :  { %6986 = vmatprep.subr.bf16.mxu0 %v7509_v57  ;;  %7008 = vmatprep.subr.bf16.mxu1 %v7510_v58  ;;  %v4146_v57 = vpack.c.bf16 %v4130_v48, %v4114_v11  ;;  %v7531_v58 = vld [vmem:[%s9592_s13 + $0x630] sm:$0xff]   ;;  %v7555_v48 = vld [vmem:[%s9592_s13 + $0x600] sm:$0xff]  }
0x12a8   :  { %6987 = vmatpush3.bf16.msra.mxu0 %v7511_v62  ;;  %7009 = vmatpush3.bf16.msra.mxu1 %v7512_v22  ;;  %v7533_v62 = vld [vmem:[%s9592_s13 + $0x668] sm:$0xff]  }
0x12a9   :  { %6988 = vmatprep.subr.bf16.mxu0 %v7513_v3  ;;  %7010 = vmatprep.subr.bf16.mxu1 %v7514_v0  ;;  %v7535_v22 = vld [vmem:[%s9592_s13 + $0x628] sm:$0xff]   ;;  %v7537_v0 = vld [vmem:[%s9592_s13 + $0x660] sm:$0xff]  }
0x12aa   :  { %v7536_v3 = vld [vmem:[%s9592_s13 + $0x6a8] sm:$0xff]  }
0x12ac   :  { %6989 = vmatpush3.bf16.msra.mxu0 %v7515_v1  ;;  %7011 = vmatpush3.bf16.msra.mxu1 %v7516_v2  ;;  %v7538_v1 = vld [vmem:[%s9592_s13 + $0x6e0] sm:$0xff]   ;;  %v9330_v2 = vpop.f32.mrf.mxu0 }
0x12ad   :  { %6990 = vmatprep.subr.bf16.mxu0 %v7517_v20  ;;  %7012 = vmatprep.subr.bf16.mxu1 %v7518_v10  ;;  %v7539_v20 = vld [vmem:[%s9592_s13 + $0x620] sm:$0xff]   ;;  %v9335_v10 = vpop.f32.mrf.mxu1 }
0x12af   :  { %v4096_v30 = vpop.f32.mrf.mxu1 }
0x12b0   :  { %6991 = vmatpush3.bf16.msra.mxu0 %v7519_v24  ;;  %7013 = vmatpush3.bf16.msra.mxu1 %v7520_v38  ;;  %v4053_v24 = vpop.f32.mrf.mxu0  ;;  %v7545_v38 = vld [vmem:[%s9592_s13 + $0x650] sm:$0xff]  }
0x12b1   :  { %6992 = vmatprep.subr.bf16.mxu0 %v7521_v17  ;;  %7014 = vmatprep.subr.bf16.mxu1 %v7522_v9  ;;  %v7546_v17 = vld [vmem:[%s9592_s13 + $0x6d0] sm:$0xff]   ;;  %v9363_v9 = vpop.f32.mrf.mxu1 }
0x12b2   :  { %v9358_v45 = vpop.f32.mrf.mxu0 }
0x12b3   :  { %v4100_v39 = vpop.f32.mrf.mxu1 }
0x12b4   :  { %6993 = vmatpush3.bf16.msra.mxu0 %v7523_v26  ;;  %7015 = vmatpush3.bf16.msra.mxu1 %v7524_v42  ;;  %v3559_v26 = vrot.slane %v9260_v19, %v8301_v44  ;;  %v4057_v59 = vpop.f32.mrf.mxu0  ;;  %v3970_v42 = vadd.f32 %v9237_v35, %v3551_v34  ;;  %v7553_v44 = vld [vmem:[%s9592_s13 + $0x640] sm:$0xff]   ;;  %v3966_v35 = vadd.f32 %v9209_v52, %v3551_v34  ;;  %v7557_v52 = vld [vmem:[%s9592_s13 + $0x778] sm:$0xff]   ;;  %v7578_v34 = vld [vmem:[%s9592_s13 + $0x7d0] sm:$0xff]  }
0x12b5   :  { %7022 = vmatprep.subr.bf16.mxu0 %v7525_v4  ;;  %7044 = vmatprep.subr.bf16.mxu1 %v7526_v27  ;;  %v3571_v4 = vrot.slane %v9260_v19, %v8317_v55  ;;  %v3579_v27 = vrot.slane %v9260_v19, %v8320_v56  ;;  %v7554_v55 = vld [vmem:[%s9592_s13 + $0x6c0] sm:$0xff]  }
0x12b6   :  { %v4013_v63 = vadd.f32 %v9242_v61, %v3559_v26  ;;  %v4009_v47 = vadd.f32 %v9214_v14, %v3559_v26  ;;  %v4127_v61 = vmax.f32 %v3970_v42, 0.0  ;;  %v7556_v56 = vld [vmem:[%s9592_s13 + $0x680] sm:$0xff]   ;;  %v7579_v26 = vld [vmem:[%s9592_s13 + $0x710] sm:$0xff]   ;;  %v7582_v42 = vld [vmem:[%s9592_s13 + $0x7c8] sm:$0xff]  }
0x12b7   :  { %5296 = vmatmul.mubr.bf16.vlgmr.msra.gmra.mxu0 %v4139_v28  ;;  %5337 = vmatmul.mubr.bf16.vlgmr.msra.gmra.mxu1 %v4141_v50  ;;  %v4058_v46 = vadd.f32 %v4057_v59, %v3571_v4  ;;  %v4101_v6 = vadd.f32 %v4100_v39, %v3579_v27  ;;  %v4097_v14 = vadd.f32 %v4096_v30, %v3579_v27  ;;  %v7570_v30 = vld [vmem:[%s9592_s13 + $0x7e0] sm:$0xff]   ;;  %v7580_v59 = vld [vmem:[%s9592_s13 + $0x790] sm:$0xff]  }
0x12b8   :  { %7023 = vmatpush3.bf16.msra.mxu0 %v7527_v7  ;;  %5377 = vmatprep.mubr.bf16.mxu0 %v4144_v53  ;;  %v4054_v7 = vadd.f32 %v4053_v24, %v3571_v4  ;;  %v4129_v28 = vmax.f32 %v4013_v63, 0.0  ;;  %v4113_v11 = vmax.f32 %v4009_v47, 0.0  ;;  %v7559_v53 = vld [vmem:[%s9592_s13 + $0x738] sm:$0xff]   ;;  %v7568_v24 = vld [vmem:[%s9592_s13 + $0x7a8] sm:$0xff]   ;;  %v3567_v4 = vrot.slane %v9260_v19, %v8399_v12  ;;  %v7585_v12 = vld [vmem:[%s9592_s13 + $0x740] sm:$0xff]  }
0x12b9   :  { %7045 = vmatpush3.bf16.msra.mxu1 %v7528_v29  ;;  %5418 = vmatprep.mubr.bf16.mxu1 %v4146_v57  ;;  %v4111_v29 = vmax.f32 %v3966_v35, 0.0  ;;  %v4132_v50 = vmax.f32 %v4058_v46, 0.0  ;;  %v3575_v39 = vrot.slane %v9260_v19, %v8402_v13  ;;  %v7584_v63 = vld [vmem:[%s9592_s13 + $0x788] sm:$0xff]   ;;  %v7586_v13 = vld [vmem:[%s9592_s13 + $0x7c0] sm:$0xff]  }
0x12ba   :  { %7024 = vmatprep.subr.bf16.mxu0 %v7529_v51  ;;  %7046 = vmatprep.subr.bf16.mxu1 %v7530_v54  ;;  %v4134_v51 = vmax.f32 %v4101_v6, 0.0  ;;  %v4116_v57 = vmax.f32 %v4054_v7, 0.0  ;;  %v4052_v19 = vadd.f32 %v9330_v2, %v3567_v4 }
0x12bb   :  { %v4143_v54 = vpack.c.bf16 %v4127_v61, %v4111_v29  ;;  %v4099_v27 = vadd.f32 %v9363_v9, %v3575_v39  ;;  %v7588_v9 = vld [vmem:[%s9592_s13 + $0x780] sm:$0xff]  }
0x12bc   :  { %7025 = vmatpush3.bf16.msra.mxu0 %v7531_v58  ;;  %v7560_v58 = vld [vmem:[%s9592_s13 + $0x7b8] sm:$0xff]   ;;  %v4115_v47 = vmax.f32 %v4052_v19, 0.0 }
0x12bd   :  { %7047 = vmatpush3.bf16.msra.mxu1 %v7532_v60  ;;  %7026 = vmatprep.subr.bf16.mxu0 %v7533_v62  ;;  %v4145_v60 = vpack.c.bf16 %v4129_v28, %v4113_v11  ;;  %v4118_v62 = vmax.f32 %v4097_v14, 0.0  ;;  %v4133_v46 = vmax.f32 %v4099_v27, 0.0 }
0x12be   :  { %7048 = vmatprep.subr.bf16.mxu1 %v7534_v16  ;;  %v7561_v16 = vld [vmem:[%s9592_s13 + $0x770] sm:$0xff]  }
0x12c0   :  { %7027 = vmatpush3.bf16.msra.mxu0 %v7535_v22  ;;  %v4148_v22 = vpack.c.bf16 %v4132_v50, %v4116_v57 }
0x12c1   :  { %7049 = vmatpush3.bf16.msra.mxu1 %v7536_v3  ;;  %7028 = vmatprep.subr.bf16.mxu0 %v7537_v0  ;;  %v7562_v3 = vld [vmem:[%s9592_s13 + $0x7f0] sm:$0xff]   ;;  %v4150_v0 = vpack.c.bf16 %v4134_v51, %v4118_v62 }
0x12c2   :  { %7050 = vmatprep.subr.bf16.mxu1 %v7538_v1  ;;  %v7563_v1 = vld [vmem:[%s9592_s13 + $0x730] sm:$0xff]  }
0x12c4   :  { %7029 = vmatpush3.bf16.msra.mxu0 %v7539_v20  ;;  %v7564_v20 = vld [vmem:[%s9592_s13 + $0x7b0] sm:$0xff]  }
0x12c5   :  { %7051 = vmatpush3.bf16.msra.mxu1 %v7540_v23  ;;  %7030 = vmatprep.subr.bf16.mxu0 %v7541_v15  ;;  %v7565_v23 = vld [vmem:[%s9592_s13 + $0x768] sm:$0xff]  }
0x12c6   :  { %7052 = vmatprep.subr.bf16.mxu1 %v7542_v21  ;;  %v7566_v15 = vld [vmem:[%s9592_s13 + $0x7e8] sm:$0xff]  }
0x12c7   :  { %v7567_v21 = vld [vmem:[%s9592_s13 + $0x728] sm:$0xff]  }
0x12c8   :  { %7031 = vmatpush3.bf16.msra.mxu0 %v7543_v25  ;;  %v7569_v25 = vld [vmem:[%s9592_s13 + $0x760] sm:$0xff]  }
0x12c9   :  { %7053 = vmatpush3.bf16.msra.mxu1 %v7544_v31  ;;  %7032 = vmatprep.subr.bf16.mxu0 %v7545_v38  ;;  %v7571_v31 = vld [vmem:[%s9592_s13 + $0x720] sm:$0xff]  }
0x12ca   :  { %7054 = vmatprep.subr.bf16.mxu1 %v7546_v17  ;;  %v7572_v38 = vld [vmem:[%s9592_s13 + $0x7a0] sm:$0xff]   ;;  %v7573_v17 = vld [vmem:[%s9592_s13 + $0x758] sm:$0xff]  }
0x12cc   :  { %7033 = vmatpush3.bf16.msra.mxu0 %v7547_v32  ;;  %v7574_v32 = vld [vmem:[%s9592_s13 + $0x7d8] sm:$0xff]  }
0x12cd   :  { %7055 = vmatpush3.bf16.msra.mxu1 %v7548_v37  ;;  %7034 = vmatprep.subr.bf16.mxu0 %v7549_v18  ;;  %v7575_v37 = vld [vmem:[%s9592_s13 + $0x718] sm:$0xff]  }
0x12ce   :  { %7056 = vmatprep.subr.bf16.mxu1 %v7550_v33  ;;  %v7576_v18 = vld [vmem:[%s9592_s13 + $0x798] sm:$0xff]   ;;  %v7577_v33 = vld [vmem:[%s9592_s13 + $0x750] sm:$0xff]  }
0x12d0   :  { %7035 = vmatpush3.bf16.msra.mxu0 %v7551_v36  ;;  %v7581_v36 = vld [vmem:[%s9592_s13 + $0x748] sm:$0xff]  }
0x12d1   :  { %7057 = vmatpush3.bf16.msra.mxu1 %v7552_v43  ;;  %7036 = vmatprep.subr.bf16.mxu0 %v7553_v44  ;;  %v7583_v43 = vld [vmem:[%s9592_s13 + $0x708] sm:$0xff]   ;;  %v4056_v44 = vadd.f32 %v9358_v45, %v3567_v4  ;;  %v4095_v45 = vadd.f32 %v9335_v10, %v3575_v39 }
0x12d2   :  { %7058 = vmatprep.subr.bf16.mxu1 %v7554_v55  ;;  %v7587_v55 = vld [vmem:[%s9592_s13 + $0x700] sm:$0xff]   ;;  %s5948_s13 = sshll.u32 %s7720_s8, 4  ;;  %s5949_s13 = int_to_ptr.vmem [resolvable:$true] %s5948_s13 }
0x12d3   :  { %v4131_v35 = vmax.f32 %v4056_v44, 0.0  ;;  %v4117_v6 = vmax.f32 %v4095_v45, 0.0  ;;  %s7687_s28 = scalar_lea.vmem %s5949_s13, 32  ;;  %p7692_p1 = scmp.lt.s32.totalorder %s5949_s13, %s5949_s13 }
0x12d4   :  { %7037 = vmatpush3.bf16.msra.mxu0 %v7555_v48  ;;  %p7688_p0 = scmp.ne.s32.totalorder %s5949_s13, %s7687_s28  ;;  %p7693_p2 = scmp.lt.s32.totalorder %s7687_s28, %s7687_s28 }
0x12d5   :  { %7059 = vmatpush3.bf16.msra.mxu1 %v7556_v56  ;;  %7066 = vmatprep.subr.bf16.mxu0 %v7557_v52  ;;  %v4147_v2 = vpack.c.bf16 %v4131_v35, %v4115_v47  ;;  %v4149_v10 = vpack.c.bf16 %v4133_v46, %v4117_v6 }
0x12d6   :  { %7088 = vmatprep.subr.bf16.mxu1 %v7558_v49  ;;  %p7694_p3 = por %p7693_p2, %p7692_p1 }
0x12d7   :  { %5378 = vmatmul.mubr.bf16.vlgmr.msra.gmra.mxu0 %v4143_v54 }
0x12d8   :  { %5419 = vmatmul.mubr.bf16.vlgmr.msra.gmra.mxu1 %v4145_v60  ;;  %7067 = vmatpush3.bf16.msra.mxu0 %v7559_v53  ;;  %v6530_v60 = vld [vmem:[%s9593_s14 + $0x1] ss:$0 sm:$0xff]  ;;  %p7695_p4 = pnand %p7694_p3, %p7688_p0 }
0x12d9   :  { %5459 = vmatprep.mubr.bf16.mxu0 %v4148_v22  ;;  %7089 = vmatpush3.bf16.msra.mxu1 %v7560_v58 }
0x12da   :  { %5500 = vmatprep.mubr.bf16.mxu1 %v4150_v0  ;;  %7068 = vmatprep.subr.bf16.mxu0 %v7561_v16 }
0x12db   :  { %7090 = vmatprep.subr.bf16.mxu1 %v7562_v3 }
0x12dc   :  { %7069 = vmatpush3.bf16.msra.mxu0 %v7563_v1 }
0x12dd   :  { %7091 = vmatpush3.bf16.msra.mxu1 %v7564_v20  ;;  %7070 = vmatprep.subr.bf16.mxu0 %v7565_v23 }
0x12de   :  { %7092 = vmatprep.subr.bf16.mxu1 %v7566_v15 }
0x12e0   :  { %7071 = vmatpush3.bf16.msra.mxu0 %v7567_v21 }
0x12e1   :  { %7093 = vmatpush3.bf16.msra.mxu1 %v7568_v24  ;;  %7072 = vmatprep.subr.bf16.mxu0 %v7569_v25 }
0x12e2   :  { %7094 = vmatprep.subr.bf16.mxu1 %v7570_v30 }
0x12e4   :  { %7073 = vmatpush3.bf16.msra.mxu0 %v7571_v31 }
0x12e5   :  { %7095 = vmatpush3.bf16.msra.mxu1 %v7572_v38  ;;  %7074 = vmatprep.subr.bf16.mxu0 %v7573_v17 }
0x12e6   :  { %7096 = vmatprep.subr.bf16.mxu1 %v7574_v32 }
0x12e8   :  { %7075 = vmatpush3.bf16.msra.mxu0 %v7575_v37 }
0x12e9   :  { %7097 = vmatpush3.bf16.msra.mxu1 %v7576_v18  ;;  %7076 = vmatprep.subr.bf16.mxu0 %v7577_v33 }
0x12ea   :  { %7098 = vmatprep.subr.bf16.mxu1 %v7578_v34 }
0x12ec   :  { %7077 = vmatpush3.bf16.msra.mxu0 %v7579_v26 }
0x12ed   :  { %7099 = vmatpush3.bf16.msra.mxu1 %v7580_v59  ;;  %7078 = vmatprep.subr.bf16.mxu0 %v7581_v36 }
0x12ee   :  { %7100 = vmatprep.subr.bf16.mxu1 %v7582_v42 }
0x12f0   :  { %7079 = vmatpush3.bf16.msra.mxu0 %v7583_v43 }
0x12f1   :  { %7101 = vmatpush3.bf16.msra.mxu1 %v7584_v63  ;;  %7080 = vmatprep.subr.bf16.mxu0 %v7585_v12 }
0x12f2   :  { %7102 = vmatprep.subr.bf16.mxu1 %v7586_v13 }
0x12f4   :  { %7081 = vmatpush3.bf16.msra.mxu0 %v7587_v55 }
0x12f5   :  { %7103 = vmatpush3.bf16.msra.mxu1 %v7588_v9 }
0x12f7   :  { %5460 = vmatmul.mubr.bf16.vlgmr.msra.gmra.mxu0 %v4147_v2 }
0x12f8   :  { %5501 = vmatmul.mubr.bf16.vlgmr.msra.gmra.mxu1 %v4149_v10 }
0x1357   :  { %v6950_v48 = vpop.f32.mrf.mxu0  ;;  %v6972_v61 = vpop.f32.mrf.mxu1 }
0x1359   :  { %v6951_v7 = vpop.f32.mrf.mxu0  ;;  %v6973_v56 = vpop.f32.mrf.mxu1 }
0x135a   :  { %v6952_v58 = vadd.f32 %v6951_v7, %v6950_v48  ;;  %v6974_v20 = vadd.f32 %v6973_v56, %v6972_v61 }
0x135b   :  { %v6953_v52 = vpop.f32.mrf.mxu0  ;;  %v6975_v28 = vpop.f32.mrf.mxu1 }
0x135c   :  { %v5216_v22 = vadd.f32 %v6952_v58, %v6530_v60 }
0x135d   :  { %v6954_v14 = vpop.f32.mrf.mxu0  ;;  %v6976_v29 = vpop.f32.mrf.mxu1 }
0x135e   :  { %v6955_v3 = vadd.f32 %v6954_v14, %v6953_v52  ;;  %v5257_v15 = vadd.f32 %v6974_v20, %v5216_v22  ;;  %v6977_v30 = vadd.f32 %v6976_v29, %v6975_v28  ;;  %v5552_v22 = vld [vmem:[%s9594_s15 + $0x8] sm:$0xff] }
0x1360   :  { %v5219_v21 = vadd.f32 %v6955_v3, %v6530_v60  ;;  %v5551_v3 = vld [vmem:[%s9594_s15] sm:$0xff] }
0x1362   :  { %v5260_v17 = vadd.f32 %v6977_v30, %v5219_v21 }
0x1377   :  { %v6994_v49 = vpop.f32.mrf.mxu0  ;;  %v7016_v50 = vpop.f32.mrf.mxu1 }
0x1379   :  { %v6995_v11 = vpop.f32.mrf.mxu0  ;;  %v7017_v51 = vpop.f32.mrf.mxu1 }
0x137a   :  { %v6996_v23 = vadd.f32 %v6995_v11, %v6994_v49  ;;  %v7018_v32 = vadd.f32 %v7017_v51, %v7016_v50 }
0x137b   :  { %v6997_v53 = vpop.f32.mrf.mxu0  ;;  %v7019_v54 = vpop.f32.mrf.mxu1 }
0x137c   :  { %v5298_v31 = vadd.f32 %v6996_v23, %v5257_v15 }
0x137d   :  { %v6998_v57 = vpop.f32.mrf.mxu0  ;;  %v7020_v16 = vpop.f32.mrf.mxu1 }
0x137e   :  { %v6999_v38 = vadd.f32 %v6998_v57, %v6997_v53  ;;  %v5339_v34 = vadd.f32 %v7018_v32, %v5298_v31  ;;  %v7021_v59 = vadd.f32 %v7020_v16, %v7019_v54  ;;  %v5553_v16 = vld [vmem:[%s9594_s15 + $0x10] sm:$0xff]  ;;  %v6660_v31 = vld [vmem:[%s9589_s10 + $0x1] ss:$0 sm:$0xff] }
0x1380   :  { %v5301_v26 = vadd.f32 %v6999_v38, %v5260_v17 }
0x1382   :  { %v5342_v43 = vadd.f32 %v7021_v59, %v5301_v26  ;;  %v6661_v26 = vld [vmem:[#allocation2] ss:$0 sm:$0xff] }
0x1397   :  { %v7038_v62 = vpop.f32.mrf.mxu0 }
0x1398   :  { %v7060_v0 = vpop.f32.mrf.mxu1 }
0x1399   :  { %v7039_v1 = vpop.f32.mrf.mxu0 }
0x139a   :  { %v7061_v24 = vpop.f32.mrf.mxu1  ;;  %v7040_v37 = vadd.f32 %v7039_v1, %v7038_v62 }
0x139b   :  { %v7041_v25 = vpop.f32.mrf.mxu0  ;;  %v7062_v44 = vadd.f32 %v7061_v24, %v7060_v0 }
0x139c   :  { %v7063_v18 = vpop.f32.mrf.mxu1  ;;  %v5380_v36 = vadd.f32 %v7040_v37, %v5339_v34  ;;  %v7718_v34 = vmov 0.0  }
0x139d   :  { %v7042_v33 = vpop.f32.mrf.mxu0  ;;  %7294 = vmatprep.subr.mxu1 %v7718_v34  ;;  %7298 = vmatprep.mubr.msk.f32.mxu1 %vm7719_vm5, %v7718_v34 }
0x139e   :  { %v7043_v42 = vadd.f32 %v7042_v33, %v7041_v25  ;;  %v7064_v4 = vpop.f32.mrf.mxu1  ;;  %v5421_v27 = vadd.f32 %v7062_v44, %v5380_v36  ;;  %v6659_v25 = vld [vmem:[%s9588_s9 + $0x1] ss:$0 sm:$0xff] }
0x139f   :  { %v7065_v35 = vadd.f32 %v7064_v4, %v7063_v18 }
0x13a0   :  { %v5383_v13 = vadd.f32 %v7043_v42, %v5342_v43 }
0x13a2   :  { %v5424_v2 = vadd.f32 %v7065_v35, %v5383_v13 }
0x13b7   :  { %v7082_v39 = vpop.f32.mrf.mxu0 }
0x13b8   :  { %v7104_v63 = vpop.f32.mrf.mxu1 }
0x13b9   :  { %v7083_v12 = vpop.f32.mrf.mxu0 }
0x13ba   :  { %v7084_v19 = vadd.f32 %v7083_v12, %v7082_v39  ;;  %v7105_v45 = vpop.f32.mrf.mxu1 }
0x13bb   :  { %v7085_v55 = vpop.f32.mrf.mxu0  ;;  %v7106_v46 = vadd.f32 %v7105_v45, %v7104_v63 }
0x13bc   :  { %v5462_v9 = vadd.f32 %v7084_v19, %v5421_v27  ;;  %v7107_v47 = vpop.f32.mrf.mxu1 }
0x13bd   :  { %v7086_v6 = vpop.f32.mrf.mxu0 }
0x13be   :  { %v5503_v10 = vadd.f32 %v7106_v46, %v5462_v9  ;;  %v7087_v48 = vadd.f32 %v7086_v6, %v7085_v55  ;;  %v7108_v61 = vpop.f32.mrf.mxu1  ;;  %v5662_v6 = vand.u32 127, %v780_v40 }
0x13bf   :  { %v7109_v56 = vadd.f32 %v7108_v61, %v7107_v47  ;;  %v5665_v47 = vadd.s32 1, %v8289_v41 }
0x13c0   :  { %v5465_v7 = vadd.f32 %v7087_v48, %v5424_v2  ;;  %v5509_v52 = vadd.f32 %v5503_v10, %v8968_v5  ;;  %v5663_v2 = vmul.u32 8, %v8289_v41 }
0x13c1   :  { %v5666_v10 = vmul.u32 8, %v5665_v47 }
0x13c2   :  { %v5506_v28 = vadd.f32 %v7109_v56, %v5465_v7  ;;  %v5513_v14 = vsel %vm85_vm0, %v5509_v52, 0.0  ;;  %vm5664_vm7 = vcmp.ge.s32.totalorder %v5662_v6, %v5663_v2 }
0x13c3   :  { %5514 = vadd.xlane.f32.xlu1 %v5513_v14  ;;  %vm5667_vm8 = vcmp.lt.s32.totalorder %v5662_v6, %v5666_v10 }
0x13c4   :  { %v5510_v49 = vadd.f32 %v5506_v28, %v8970_v8  ;;  %v5554_v8 = vld [vmem:[%s9594_s15 + $0x18] sm:$0xff]  ;;  %vm5668_vm9 = vmand %vm5664_vm7, %vm5667_vm8  ;;  %s9622_s15 = sld [smem:[#allocation8_spill]] }
0x13c5   :  { %7283 = vmatprep.subr.mxu0 %v5554_v8  ;;  %v6664_v7 = vsel %vm5668_vm9, 1.0, %v7718_v34 }
0x13c6   :  { %v5516_v29 = vsel %vm85_vm0, %v5510_v49, 0.0  ;;  %7284 = vmatpush3.msra.mxu0 %v5554_v8 }
0x13c7   :  { %5517 = vadd.xlane.f32.xlu0 %v5516_v29  ;;  %7285 = vmatprep.subr.mxu0 %v5553_v16 }
0x13c8   :  { %7286 = vmatpush3.msra.mxu0 %v5553_v16 }
0x13c9   :  { %7287 = vmatprep.subr.mxu0 %v5552_v22 }
0x13ca   :  { %7288 = vmatpush3.msra.mxu0 %v5552_v22  ;;  %v5865_v8 = vld [vmem:[%s9622_s15 + $0x10] sm:$0xff]  ;;  %v5864_v16 = vld [vmem:[%s9622_s15 + $0x8] sm:$0xff]  ;;  %v5863_v22 = vld [vmem:[%s9622_s15] sm:$0xff] }
0x13cb   :  { %7289 = vmatprep.subr.mxu0 %v5551_v3 }
0x13cc   :  { %7290 = vmatpush3.msra.mxu0 %v5551_v3 }
0x13cd   :  { %7301 = vmatprep.subr.mxu0 %v7718_v34 }
0x144c   :  { %v5515_v50 = vpop.xlane.xlu1 %5514 }
0x144d   :  { %v5519_v11 = vmul.f32 0.03125, %v5515_v50 }
0x144f   :  { %v5521_v51 = vsub.f32 %v5509_v52, %v5519_v11 }
0x1450   :  { %v5518_v53 = vpop.xlane.xlu0 %5517 }
0x1451   :  { %v5520_v54 = vmul.f32 0.03125, %v5518_v53  ;;  %v5523_v57 = vmul.f32 %v5521_v51, %v5521_v51 }
0x1453   :  { %v5522_v58 = vsub.f32 %v5510_v49, %v5520_v54  ;;  %v5525_v60 = vsel %vm85_vm0, %v5523_v57, 0.0 }
0x1454   :  { %5526 = vadd.xlane.f32.xlu1 %v5525_v60 }
0x1455   :  { %v5524_v5 = vmul.f32 %v5522_v58, %v5522_v58 }
0x1457   :  { %v5528_v62 = vsel %vm85_vm0, %v5524_v5, 0.0 }
0x1458   :  { %5529 = vadd.xlane.f32.xlu0 %v5528_v62  ;;  %v5866_v62 = vld [vmem:[%s9622_s15 + $0x18] sm:$0xff] }
0x14dd   :  { %v5527_v0 = vpop.xlane.xlu1 %5526 }
0x14de   :  { %v5531_v1 = vmul.f32 0.03125, %v5527_v0 }
0x14e0   :  { %v5533_v20 = vadd.f32 1e-05, %v5531_v1 }
0x14e1   :  { %v5530_v23 = vpop.xlane.xlu0 %5529 }
0x14e2   :  { %7665 = vrsqrt.f32 %v5533_v20  ;;  %v5532_v15 = vmul.f32 0.03125, %v5530_v23  ;;  %v6667_v23 = vld [vmem:[%s9596_s17] ss:$0 sm:$0xff] }
0x14e4   :  { %v5534_v21 = vadd.f32 1e-05, %v5532_v15 }
0x14e6   :  { %7667 = vrsqrt.f32 %v5534_v21  ;;  %v6668_v21 = vld [vmem:[%s9597_s18] ss:$0 sm:$0xff] }
0x14ef   :  { %v7666_v24 = vpop.eup %7665 }
0x14f0   :  { %v5537_v30 = vmul.f32 %v7666_v24, %v5521_v51 }
0x14f2   :  { %v5543_v38 = vmul.f32 %v6659_v25, %v5537_v30 }
0x14f3   :  { %v7668_v17 = vpop.eup %7667 }
0x14f4   :  { %v5538_v32 = vmul.f32 %v7668_v17, %v5522_v58  ;;  %v5549_v37 = vadd.f32 %v6660_v31, %v5543_v38 }
0x14f6   :  { %v5544_v18 = vmul.f32 %v6659_v25, %v5538_v32  ;;  %7291 = vmatprep.mubr.msk.f32.mxu0 %vm85_vm0, %v5549_v37 }
0x14f8   :  { %v5550_v33 = vadd.f32 %v6660_v31, %v5544_v18 }
0x14fa   :  { %7292 = vmatmul.mubr.msk.f32.vlgmr.msra.gmra.mxu0 %vm85_vm0, %v5550_v33 }
0x14fb   :  { %7305 = vmatprep.mubr.msk.f32.mxu0 %vm7719_vm5, %v7718_v34 }
0x15ba   :  { %v7293_v59 = vpop.f32.mrf.mxu0 }
0x15bb   :  { %v5640_v36 = vadd.f32 %v7293_v59, %v6661_v26 }
0x15bc   :  { %v5634_v42 = vpop.f32.mrf.mxu0 }
0x15bd   :  { %v5635_v4 = vadd.f32 %v6661_v26, %v5634_v42  ;;  %v5645_v39 = vsel %vm5643_vm6, %v5640_v36, -inf }
0x15bf   :  { %v5644_v43 = vsel %vm5643_vm6, %v5635_v4, -inf }
0x15c0   :  { %v5646_v44 = vmax.f32 %v5644_v43, %v5645_v39 }
0x15c2   :  { %v5647_v63 = vrot.slane %v5646_v44, 4 }
0x15c4   :  { %v5648_v12 = vmax.f32 %v5646_v44, %v5647_v63 }
0x15c6   :  { %v5649_v27 = vrot.slane %v5648_v12, 2 }
0x15c8   :  { %v5650_v13 = vmax.f32 %v5648_v12, %v5649_v27 }
0x15ca   :  { %v5651_v19 = vrot.slane %v5650_v13, 1 }
0x15cc   :  { %v5652_v45 = vmax.f32 %v5650_v13, %v5651_v19 }
0x15ce   :  { %v5653_v55 = vsub.f32 %v5635_v4, %v5652_v45  ;;  %v5654_v35 = vsub.f32 %v5640_v36, %v5652_v45 }
0x15d0   :  { %v5655_v9 = vmul.f32 1.442695, %v5653_v55  ;;  %v5657_v46 = vmul.f32 1.442695, %v5654_v35 }
0x15d2   :  { %7669 = vpow2.f32 %v5655_v9 }
0x15d3   :  { %7671 = vpow2.f32 %v5657_v46 }
0x15df   :  { %v7670_v48 = vpop.eup %7669 }
0x15e0   :  { %v7672_v61 = vpop.eup %7671  ;;  %5746 = vperm.xlu0 %7332, %v7670_v48  }
0x15e1   :  { %5751 = vperm.xlu1 %7331, %v7672_v61   ;;  %7295 = vmatpush3.msra.mxu1 %v7672_v61 }
0x15e2   :  { %7296 = vmatprep.subr.mxu1 %v7718_v34 }
0x15e3   :  { %7297 = vmatpush3.msra.mxu1 %v7670_v48 }
0x15e4   :  { %7299 = vmatmul.mubr.msk.f32.vlgmr.msra.gmra.mxu1 %vm603_vm3, %v6664_v7  ;;  %7308 = vmatprep.subr.mxu1 %v7718_v34 }
0x15e5   :  { %7316 = vmatprep.mubr.msk.f32.mxu1 %vm7719_vm5, %v7718_v34  ;;  %7309 = vmatpush3.msra.mxu1 %v5866_v62 }
0x15e6   :  { %7310 = vmatprep.subr.mxu1 %v7718_v34 }
0x15e7   :  { %7311 = vmatpush3.msra.mxu1 %v5865_v8 }
0x15e8   :  { %7312 = vmatprep.subr.mxu1 %v7718_v34 }
0x15e9   :  { %7313 = vmatpush3.msra.mxu1 %v5864_v16 }
0x15ea   :  { %7314 = vmatprep.subr.mxu1 %v7718_v34 }
0x15eb   :  { %7315 = vmatpush3.msra.mxu1 %v5863_v22 }
0x165b   :  { %v5747_v41 = vpop.permute.xlu0 %5746 }
0x165c   :  { %v5752_v40 = vpop.permute.xlu1 %5751  ;;  %v5754_v52 = vmul.f32 %v5747_v41, %v5549_v37 }
0x165d   :  { %v5755_v56 = vmul.f32 %v5752_v40, %v5550_v33 }
0x165f   :  { %7302 = vmatpush3.msra.mxu0 %v5755_v56 }
0x1660   :  { %7303 = vmatprep.subr.mxu0 %v7718_v34 }
0x1661   :  { %7304 = vmatpush3.msra.mxu0 %v5754_v52 }
0x1662   :  { %7306 = vmatmul.mubr.msk.f32.vlgmr.msra.gmra.mxu0 %vm603_vm3, %v6664_v7 }
0x16a4   :  { %v5740_v28 = vpop.f32.mrf.mxu1 }
0x16a5   :  { %7673 = vrcp.f32 %v5740_v28 }
0x16a6   :  { %v7300_v14 = vpop.f32.mrf.mxu1 }
0x16b2   :  { %v7674_v49 = vpop.eup %7673 }
0x16b3   :  { %5829 = vperm.xlu1 %7331, %v7674_v49  }
0x1722   :  { %v5822_v29 = vpop.f32.mrf.mxu0 }
0x1724   :  { %v7307_v50 = vpop.f32.mrf.mxu0 }
0x172e   :  { %v5830_v11 = vpop.permute.xlu1 %5829 }
0x172f   :  { %v5832_v51 = vmul.f32 %v5830_v11, %v5822_v29 }
0x1731   :  { %v5836_v53 = vsel %vm5835_vm10, %v5832_v51, 0.0 }
0x1732   :  { %5837 = vadd.xlane.f32.xlu1 %v5836_v53 }
0x17bb   :  { %v5838_v54 = vpop.xlane.xlu1 %5837 }
0x17bc   :  { %v5839_v57 = vmul.f32 0.03125, %v5838_v54 }
0x17be   :  { %v5840_v58 = vsub.f32 %v5832_v51, %v5839_v57 }
0x17c0   :  { %v5841_v60 = vmul.f32 %v5840_v58, %v5840_v58 }
0x17c2   :  { %v5842_v5 = vsel %vm5835_vm10, %v5841_v60, 0.0 }
0x17c3   :  { %5843 = vadd.xlane.f32.xlu0 %v5842_v5 }
0x184c   :  { %v5844_v3 = vpop.xlane.xlu0 %5843 }
0x184d   :  { %v5845_v0 = vmul.f32 0.03125, %v5844_v3 }
0x184f   :  { %v5846_v1 = vadd.f32 1e-05, %v5845_v0 }
0x1851   :  { %7675 = vrsqrt.f32 %v5846_v1 }
0x185e   :  { %v7676_v20 = vpop.eup %7675 }
0x185f   :  { %v5848_v15 = vmul.f32 %v7676_v20, %v5840_v58 }
0x1861   :  { %v5855_v24 = vmul.f32 %v6667_v23, %v5848_v15 }
0x1863   :  { %v5862_v25 = vadd.f32 %v6668_v21, %v5855_v24 }
0x1865   :  { %7317 = vmatmul.mubr.msk.f32.vlgmr.msra.gmra.mxu1 %vm85_vm0, %v5862_v25 }
0x1925   :  { %v5936_v30 = vpop.f32.mrf.mxu1 }
0x1926   :  { %5941 = vst.msk [vmem:[#allocation3] sm:$0x3] %vm5940_vm11, %v5936_v30 }
0x1927   :  { %v7318_v31 = vpop.f32.mrf.mxu1 }
0x1928   :  { %7698 = shalt.err (!%p7695_p4)
}
0x1929   :  { %5951 = dma.vmem_to_hbm [thread:$0]  %s5949_s13, 32, %s9598_s19, [#allocation4]  }
0x192a   :  { %7707 = dma.done.wait [#allocation4], 32  }
0x192b   :  { %7708 = vsyncadd [#allocation4], 4294967264 }
0x192c   :  { %5955 = vsyncpa [#allocation4], 1 }

</bundles_post_ra>
